<compile_context>
chip_gen: v6e
topology: v6e:2x2x1
jax: 0.10.0
libtpu: 0.0.40
codegen_flags: <defaults>
</compile_context>

<pallas_src>
import functools
import math

import jax
import jax.numpy as jnp
from jax.experimental import pallas as pl
from jax.experimental.pallas import tpu as pltpu

# -------------------------- config (small, consistent with the module) ----------------
N_NODES = 16
IN_DIM = 8
POS_ENC_DIM = 8
HIDDEN_DIM = 32
OUT_DIM = 32
NUM_HEADS = 4
HEAD_DIM = OUT_DIM // NUM_HEADS
NUM_CLASSES = 4
BN_EPS = 1e-5  # PyTorch BatchNorm1d default

LANE = 128                       # lane width; all packed slabs use 128 columns
B_GRAPHS = 32                    # graphs per forward call
GRAPHS_PER_BLOCK = 8             # graphs per grid step -> 8*16 = 128 rows per block
BLOCK_ROWS = GRAPHS_PER_BLOCK * N_NODES

# ---- packed weight slab row layout (all offsets are multiples of 8 -> aligned slices) ----
R_EMB = 0                                    # (IN+POS, HIDDEN)      rows  0:16
R_QKV = R_EMB + IN_DIM + POS_ENC_DIM         # (HIDDEN, 3*OUT)       rows 16:48
R_O = R_QKV + HIDDEN_DIM                     # (OUT, OUT)            rows 48:80
R_F1 = R_O + OUT_DIM                         # (OUT, 2*OUT)          rows 80:112
R_F2 = R_F1 + OUT_DIM                        # (2*OUT, OUT)          rows 112:176
R_M0 = R_F2 + 2 * OUT_DIM                    # (OUT, OUT/2)          rows 176:208
R_M1 = R_M0 + OUT_DIM                        # (OUT/2, OUT/4)        rows 208:224
R_M2 = R_M1 + OUT_DIM // 2                   # (OUT/4, 128 padded)   rows 224:232
W_ROWS = R_M2 + OUT_DIM // 4                 # 232

# ---- packed bias/scale slab rows ----
B_EMB, B_O, B_S1, B_F1, B_F2, B_S2, B_M0, B_M1, B_M2 = range(9)
B_ROWS = 16


# -------------------------------- fused Pallas kernel ----------------------------------
def _graph_transformer_kernel(x_ref, adj_ref, w_ref, b_ref, o_ref, *, num_heads, head_dim):
    f32 = jnp.float32
    # contract the last dim of both operands (no k.T materialization)
    dn_last = (((1,), (1,)), ((), ()))

    x = x_ref[...]                                            # (M, IN+POS)
    adj = adj_ref[...]                                        # (M, M) block-diag edge mask

    # --- embeddings: h = embedding_h(h) + embedding_lap_pos_enc(lap)  (pre-fused matmul) ---
    h0 = (jnp.dot(x, w_ref[R_EMB:R_QKV, 0:HIDDEN_DIM], preferred_element_type=f32)
          + b_ref[B_EMB:B_EMB + 1, 0:HIDDEN_DIM])
    # in_feat_dropout: identity in eval mode

    # --- fused QKV projection (use_bias=False); 1/sqrt(d_head) is folded into Q weights ---
    qkv = jnp.dot(h0, w_ref[R_QKV:R_O, 0:3 * OUT_DIM], preferred_element_type=f32)  # (M, 96)

    # Multi-head masked attention + O-projection accumulated per head (no head concat).
    # Start the accumulator with the folded BN bias and the BN-scaled residual:
    #   BN1(attn@Wo + bo + h0) = sum_h head_h@(Wo*s1)[h] + (bo*s1 + beta - mean*s1) + h0*s1
    h1 = b_ref[B_O:B_O + 1, 0:OUT_DIM] + h0 * b_ref[B_S1:B_S1 + 1, 0:OUT_DIM]
    for hh in range(num_heads):                               # static unroll
        lo = hh * head_dim
        qh = qkv[:, lo:lo + head_dim]                         # (M, d_h)  dst (pre-scaled)
        kh = qkv[:, OUT_DIM + lo:OUT_DIM + lo + head_dim]     # (M, d_h)  src
        vh = qkv[:, 2 * OUT_DIM + lo:2 * OUT_DIM + lo + head_dim]
        s = jax.lax.dot_general(qh, kh, dn_last, preferred_element_type=f32)  # (dst, src)
        score = jnp.exp(jnp.clip(s, -5.0, 5.0)) * adj
        wv = jnp.dot(score, vh, preferred_element_type=f32)   # (M, d_h)
        z = jnp.sum(score, axis=-1, keepdims=True)            # (M, 1)
        head = wv / (z + 1e-6)                                # exact divide (matches torch)
        h1 = h1 + jnp.dot(head, w_ref[R_O + lo:R_O + lo + head_dim, 0:OUT_DIM],
                          preferred_element_type=f32)

    # FFN (x2, ReLU) + residual + BatchNorm1d (eval), BN folded into the second linear.
    ff = jnp.maximum(
        jnp.dot(h1, w_ref[R_F1:R_F2, 0:2 * OUT_DIM], preferred_element_type=f32)
        + b_ref[B_F1:B_F1 + 1, 0:2 * OUT_DIM], 0.0)
    h2 = (jnp.dot(ff, w_ref[R_F2:R_M0, 0:OUT_DIM], preferred_element_type=f32)
          + b_ref[B_F2:B_F2 + 1, 0:OUT_DIM]
          + h1 * b_ref[B_S2:B_S2 + 1, 0:OUT_DIM])

    # --- MLPReadout (L=2): Linear->ReLU, Linear->ReLU, Linear (padded to 128 lanes) ---
    y = jnp.maximum(
        jnp.dot(h2, w_ref[R_M0:R_M1, 0:OUT_DIM // 2], preferred_element_type=f32)
        + b_ref[B_M0:B_M0 + 1, 0:OUT_DIM // 2], 0.0)
    y = jnp.maximum(
        jnp.dot(y, w_ref[R_M1:R_M2, 0:OUT_DIM // 4], preferred_element_type=f32)
        + b_ref[B_M1:B_M1 + 1, 0:OUT_DIM // 4], 0.0)
    y = (jnp.dot(y, w_ref[R_M2:W_ROWS, :], preferred_element_type=f32)
         + b_ref[B_M2:B_M2 + 1, :])
    o_ref[...] = y.astype(o_ref.dtype)                        # full 128-lane unmasked store


# -------------------------------- one-time weight preparation --------------------------
def _fold_bn(w, b, bn):
    # Eval-mode BN(x) = x*s + (beta - mean*s) with s = gamma*rsqrt(var+eps).
    gamma, beta, mean, var = bn
    s = gamma * jax.lax.rsqrt(var + BN_EPS)
    return w * s[None, :], b * s + beta - mean * s, s


def prepare_params(params):
    """Run ONCE outside the per-call path: fuse/fold/pack weights into two slabs."""
    p = params["layer0"]
    w_h, b_h = params["embedding_h"]
    w_lap, b_lap = params["embedding_lap_pos_enc"]
    w_emb = jnp.concatenate([w_h, w_lap], axis=0)                 # (IN+POS, HIDDEN)
    b_emb = b_h + b_lap

    scale = 1.0 / math.sqrt(float(HEAD_DIM))
    w_qkv = jnp.concatenate([p["Wq"] * scale, p["Wk"], p["Wv"]], axis=1)   # (HIDDEN, 3*OUT)

    w_o, b_o, s1 = _fold_bn(p["Wo"], p["bo"], p["bn1"])
    w_f2, b_f2, s2 = _fold_bn(p["W_ffn2"], p["b_ffn2"], p["bn2"])
    (w_m0, b_m0), (w_m1, b_m1), (w_m2, b_m2) = params["mlp"]

    def pad_cols(w):
        return jnp.pad(w, ((0, 0), (0, LANE - w.shape[1])))

    def pad_row(v):
        return jnp.pad(v, (0, LANE - v.shape[0]))[None, :]

    w_slab = jnp.concatenate(
        [pad_cols(w_emb), pad_cols(w_qkv), pad_cols(w_o), pad_cols(p["W_ffn1"]),
         pad_cols(w_f2), pad_cols(w_m0), pad_cols(w_m1), pad_cols(w_m2)], axis=0)
    assert w_slab.shape == (W_ROWS, LANE)

    b_slab = jnp.concatenate(
        [pad_row(b_emb), pad_row(b_o), pad_row(s1), pad_row(p["b_ffn1"]),
         pad_row(b_f2), pad_row(s2), pad_row(b_m0), pad_row(b_m1), pad_row(b_m2),
         jnp.zeros((B_ROWS - 9, LANE), jnp.float32)], axis=0)
    assert b_slab.shape == (B_ROWS, LANE)
    return w_slab.astype(jnp.float32), b_slab.astype(jnp.float32)


# -------------------------------- jitted forward ----------------------------------------
@jax.jit
def graph_transformer_forward(w_slab, b_slab, adj, x_nodes):
    """x_nodes: (B, N, IN+POS) pre-concatenated [h | lap]; adj: (B, N, N) edge mask."""
    B, N, F = x_nodes.shape
    GB = GRAPHS_PER_BLOCK
    assert B % GB == 0 and N == N_NODES
    nblk = B // GB
    M = GB * N

    x2d = x_nodes.reshape(B * N, F)

    # Block-diagonal adjacency per grid step (cheap XLA prep; could also be done by the
    # data loader). Cross-graph score entries are masked to 0, so batching is exact.
    a = adj.reshape(nblk, GB, N, N)
    eye_g = jnp.eye(GB, dtype=adj.dtype)
    bd = a[:, :, None, :, :] * eye_g[None, :, :, None, None]      # (nblk, GB, GB, N, N)
    bd = bd.transpose(0, 1, 3, 2, 4).reshape(nblk * M, M)

    out = pl.pallas_call(
        functools.partial(_graph_transformer_kernel,
                          num_heads=NUM_HEADS, head_dim=HEAD_DIM),
        out_shape=jax.ShapeDtypeStruct((B * N, LANE), jnp.float32),
        grid_spec=pltpu.PrefetchScalarGridSpec(
            num_scalar_prefetch=0,
            grid=(nblk,),
            in_specs=[
                pl.BlockSpec((M, F), lambda i: (i, 0)),           # node features
                pl.BlockSpec((M, M), lambda i: (i, 0)),           # block-diag adjacency
                pl.BlockSpec((W_ROWS, LANE), lambda i: (0, 0)),   # packed weights
                pl.BlockSpec((B_ROWS, LANE), lambda i: (0, 0)),   # packed biases/scales
            ],
            out_specs=pl.BlockSpec((M, LANE), lambda i: (i, 0)),
        ),
        compiler_params=pltpu.CompilerParams(
            dimension_semantics=("parallel",)),                   # free 2x on v7x megacore
    )(x2d, bd, w_slab, b_slab)

    return out[:, :NUM_CLASSES].reshape(B, N, NUM_CLASSES)


# ------------------------------ parameter init (deterministic) -------------------------
def init_linear(key, fan_in, fan_out, bias=True):
    # PyTorch nn.Linear default: U(-1/sqrt(fan_in), 1/sqrt(fan_in)); stored as (in, out).
    kw, kb = jax.random.split(key)
    bound = 1.0 / math.sqrt(fan_in)
    w = jax.random.uniform(kw, (fan_in, fan_out), jnp.float32, -bound, bound)
    if bias:
        b = jax.random.uniform(kb, (fan_out,), jnp.float32, -bound, bound)
    else:
        b = jnp.zeros((fan_out,), jnp.float32)
    return w, b


def init_batchnorm(dim):
    # PyTorch BatchNorm1d fresh init: gamma=1, beta=0, running_mean=0, running_var=1.
    return (jnp.ones((dim,), jnp.float32), jnp.zeros((dim,), jnp.float32),
            jnp.zeros((dim,), jnp.float32), jnp.ones((dim,), jnp.float32))


def init_params(key):
    ks = jax.random.split(key, 16)
    p = {}
    p["embedding_h"] = init_linear(ks[0], IN_DIM, HIDDEN_DIM)
    p["embedding_lap_pos_enc"] = init_linear(ks[1], POS_ENC_DIM, HIDDEN_DIM)
    layer = {}
    layer["Wq"], _ = init_linear(ks[2], HIDDEN_DIM, OUT_DIM, bias=False)
    layer["Wk"], _ = init_linear(ks[3], HIDDEN_DIM, OUT_DIM, bias=False)
    layer["Wv"], _ = init_linear(ks[4], HIDDEN_DIM, OUT_DIM, bias=False)
    layer["Wo"], layer["bo"] = init_linear(ks[5], OUT_DIM, OUT_DIM)
    layer["bn1"] = init_batchnorm(OUT_DIM)
    layer["W_ffn1"], layer["b_ffn1"] = init_linear(ks[6], OUT_DIM, OUT_DIM * 2)
    layer["W_ffn2"], layer["b_ffn2"] = init_linear(ks[7], OUT_DIM * 2, OUT_DIM)
    layer["bn2"] = init_batchnorm(OUT_DIM)
    p["layer0"] = layer
    p["mlp"] = [
        init_linear(ks[8], OUT_DIM, OUT_DIM // 2),
        init_linear(ks[9], OUT_DIM // 2, OUT_DIM // 4),
        init_linear(ks[10], OUT_DIM // 4, NUM_CLASSES),
    ]
    return p


# ------------------------------ main -----------------------------------------------------
if __name__ == "__main__":
    key = jax.random.PRNGKey(0)
    k_par, k_h, k_lap, k_edges = jax.random.split(key, 4)

    params = init_params(k_par)
    w_slab, b_slab = prepare_params(params)      # one-time weight prep (outside jit path)

    # Batched node features + Laplacian positional encodings; concat done OUTSIDE the kernel.
    h = jax.random.normal(k_h, (B_GRAPHS, N_NODES, IN_DIM), jnp.float32)
    h_lap_pos_enc = jax.random.normal(k_lap, (B_GRAPHS, N_NODES, POS_ENC_DIM), jnp.float32)
    x_nodes = jnp.concatenate([h, h_lap_pos_enc], axis=-1)

    # deterministic synthetic graphs: ring + self-loops + random extra edges; adj[g, dst, src]
    eye = jnp.eye(N_NODES, dtype=jnp.float32)
    ring = jnp.roll(eye, 1, axis=1) + jnp.roll(eye, -1, axis=1)
    extra = jax.random.bernoulli(
        k_edges, 0.2, (B_GRAPHS, N_NODES, N_NODES)).astype(jnp.float32)
    adj = jnp.clip(eye[None] + ring[None] + extra, 0.0, 1.0)

    out = graph_transformer_forward(w_slab, b_slab, adj, x_nodes)
    out = jax.block_until_ready(out)

    assert out.shape == (B_GRAPHS, N_NODES, NUM_CLASSES)
    assert bool(jnp.all(jnp.isfinite(out)))
    print("KERNEL_OK")
</pallas_src>

<mosaic_0001>
module attributes {stable_mosaic.version = 11 : i64} {
  func.func @_graph_transformer_kernel(%arg0: i32, %arg1: memref<128x16xf32, #tpu.memory_space<vmem>>, %arg2: memref<128x128xf32, #tpu.memory_space<vmem>>, %arg3: memref<232x128xf32, #tpu.memory_space<vmem>>, %arg4: memref<16x128xf32, #tpu.memory_space<vmem>>, %arg5: memref<128x128xf32, #tpu.memory_space<vmem>>) attributes {dimension_semantics = [#tpu.dimension_semantics<parallel>], iteration_bounds = array<i64: 4>, scalar_prefetch = 0 : i64, scratch_operands = 0 : i64, tpu.core_type = #tpu.core_type<tc>, window_params = [{transform_indices = @transform_0, window_bounds = array<i64: 128, 16>}, {transform_indices = @transform_1, window_bounds = array<i64: 128, 128>}, {pipeline_mode = #tpu.pipeline_mode<synchronous>, transform_indices = @transform_2, window_bounds = array<i64: 232, 128>}, {pipeline_mode = #tpu.pipeline_mode<synchronous>, transform_indices = @transform_3, window_bounds = array<i64: 16, 128>}, {transform_indices = @transform_4, window_bounds = array<i64: 128, 128>}]} {
    %c0 = arith.constant 0 : index
    %c0_0 = arith.constant 0 : index
    %0 = vector.load %arg1[%c0, %c0_0] : memref<128x16xf32, #tpu.memory_space<vmem>>, vector<128x16xf32>
    %c0_1 = arith.constant 0 : index
    %c0_2 = arith.constant 0 : index
    %1 = vector.load %arg2[%c0_1, %c0_2] : memref<128x128xf32, #tpu.memory_space<vmem>>, vector<128x128xf32>
    %c0_3 = arith.constant 0 : index
    %c0_4 = arith.constant 0 : index
    %2 = vector.load %arg3[%c0_3, %c0_4] : memref<232x128xf32, #tpu.memory_space<vmem>>, vector<16x32xf32>
    %cst = arith.constant dense<0.000000e+00> : vector<128x32xf32>
    %3 = tpu.matmul %0, %2, %cst {dimension_numbers = #tpu.dot_dimension_numbers<[1], [0], [0], [1], [0, 0, 1, 1], [], []>} : vector<128x16xf32>, vector<16x32xf32>, vector<128x32xf32> -> vector<128x32xf32>
    %c0_5 = arith.constant 0 : index
    %c0_6 = arith.constant 0 : index
    %4 = vector.load %arg4[%c0_5, %c0_6] : memref<16x128xf32, #tpu.memory_space<vmem>>, vector<1x32xf32>
    %5 = vector.broadcast %4 : vector<1x32xf32> to vector<128x32xf32>
    %6 = arith.addf %3, %5 : vector<128x32xf32>
    %c16 = arith.constant 16 : index
    %c0_7 = arith.constant 0 : index
    %7 = vector.load %arg3[%c16, %c0_7] : memref<232x128xf32, #tpu.memory_space<vmem>>, vector<32x96xf32>
    %cst_8 = arith.constant dense<0.000000e+00> : vector<128x96xf32>
    %8 = tpu.matmul %6, %7, %cst_8 {dimension_numbers = #tpu.dot_dimension_numbers<[1], [0], [0], [1], [0, 0, 1, 1], [], []>} : vector<128x32xf32>, vector<32x96xf32>, vector<128x96xf32> -> vector<128x96xf32>
    %c1 = arith.constant 1 : index
    %c0_9 = arith.constant 0 : index
    %9 = vector.load %arg4[%c1, %c0_9] : memref<16x128xf32, #tpu.memory_space<vmem>>, vector<1x32xf32>
    %c2 = arith.constant 2 : index
    %c0_10 = arith.constant 0 : index
    %10 = vector.load %arg4[%c2, %c0_10] : memref<16x128xf32, #tpu.memory_space<vmem>>, vector<1x32xf32>
    %11 = vector.broadcast %10 : vector<1x32xf32> to vector<128x32xf32>
    %12 = arith.mulf %6, %11 : vector<128x32xf32>
    %13 = vector.broadcast %9 : vector<1x32xf32> to vector<128x32xf32>
    %14 = arith.addf %13, %12 : vector<128x32xf32>
    %15 = vector.extract_strided_slice %8 {offsets = [0, 0], sizes = [128, 8], strides = [1, 1]} : vector<128x96xf32> to vector<128x8xf32>
    %16 = vector.extract_strided_slice %8 {offsets = [0, 32], sizes = [128, 8], strides = [1, 1]} : vector<128x96xf32> to vector<128x8xf32>
    %17 = vector.extract_strided_slice %8 {offsets = [0, 64], sizes = [128, 8], strides = [1, 1]} : vector<128x96xf32> to vector<128x8xf32>
    %cst_11 = arith.constant dense<0.000000e+00> : vector<128x128xf32>
    %18 = tpu.matmul %15, %16, %cst_11 {dimension_numbers = #tpu.dot_dimension_numbers<[1], [1], [0], [0], [0, 0, 1, 0], [], []>} : vector<128x8xf32>, vector<128x8xf32>, vector<128x128xf32> -> vector<128x128xf32>
    %cst_12 = arith.constant -5.000000e+00 : f32
    %cst_13 = arith.constant 5.000000e+00 : f32
    %19 = vector.broadcast %cst_12 : f32 to vector<128x128xf32>
    %20 = arith.maximumf %19, %18 : vector<128x128xf32>
    %21 = vector.broadcast %cst_13 : f32 to vector<128x128xf32>
    %22 = arith.minimumf %21, %20 : vector<128x128xf32>
    %23 = math.exp %22 : vector<128x128xf32>
    %24 = arith.mulf %23, %1 : vector<128x128xf32>
    %cst_14 = arith.constant dense<0.000000e+00> : vector<128x8xf32>
    %25 = tpu.matmul %24, %17, %cst_14 {dimension_numbers = #tpu.dot_dimension_numbers<[1], [0], [0], [1], [0, 0, 1, 1], [], []>} : vector<128x128xf32>, vector<128x8xf32>, vector<128x8xf32> -> vector<128x8xf32>
    %cst_15 = arith.constant dense<0.000000e+00> : vector<128xf32>
    %26 = vector.multi_reduction <add>, %24, %cst_15 [1] : vector<128x128xf32> to vector<128xf32>
    %27 = vector.shape_cast %26 : vector<128xf32> to vector<128x1xf32>
    %cst_16 = arith.constant 9.99999997E-7 : f32
    %28 = vector.broadcast %cst_16 : f32 to vector<128x1xf32>
    %29 = arith.addf %27, %28 : vector<128x1xf32>
    %30 = vector.broadcast %29 : vector<128x1xf32> to vector<128x8xf32>
    %31 = arith.divf %25, %30 : vector<128x8xf32>
    %c48 = arith.constant 48 : index
    %c0_17 = arith.constant 0 : index
    %32 = vector.load %arg3[%c48, %c0_17] : memref<232x128xf32, #tpu.memory_space<vmem>>, vector<8x32xf32>
    %cst_18 = arith.constant dense<0.000000e+00> : vector<128x32xf32>
    %33 = tpu.matmul %31, %32, %cst_18 {dimension_numbers = #tpu.dot_dimension_numbers<[1], [0], [0], [1], [0, 0, 1, 1], [], []>} : vector<128x8xf32>, vector<8x32xf32>, vector<128x32xf32> -> vector<128x32xf32>
    %34 = arith.addf %14, %33 : vector<128x32xf32>
    %35 = vector.extract_strided_slice %8 {offsets = [0, 8], sizes = [128, 8], strides = [1, 1]} : vector<128x96xf32> to vector<128x8xf32>
    %36 = vector.extract_strided_slice %8 {offsets = [0, 40], sizes = [128, 8], strides = [1, 1]} : vector<128x96xf32> to vector<128x8xf32>
    %37 = vector.extract_strided_slice %8 {offsets = [0, 72], sizes = [128, 8], strides = [1, 1]} : vector<128x96xf32> to vector<128x8xf32>
    %cst_19 = arith.constant dense<0.000000e+00> : vector<128x128xf32>
    %38 = tpu.matmul %35, %36, %cst_19 {dimension_numbers = #tpu.dot_dimension_numbers<[1], [1], [0], [0], [0, 0, 1, 0], [], []>} : vector<128x8xf32>, vector<128x8xf32>, vector<128x128xf32> -> vector<128x128xf32>
    %cst_20 = arith.constant -5.000000e+00 : f32
    %cst_21 = arith.constant 5.000000e+00 : f32
    %39 = vector.broadcast %cst_20 : f32 to vector<128x128xf32>
    %40 = arith.maximumf %39, %38 : vector<128x128xf32>
    %41 = vector.broadcast %cst_21 : f32 to vector<128x128xf32>
    %42 = arith.minimumf %41, %40 : vector<128x128xf32>
    %43 = math.exp %42 : vector<128x128xf32>
    %44 = arith.mulf %43, %1 : vector<128x128xf32>
    %cst_22 = arith.constant dense<0.000000e+00> : vector<128x8xf32>
    %45 = tpu.matmul %44, %37, %cst_22 {dimension_numbers = #tpu.dot_dimension_numbers<[1], [0], [0], [1], [0, 0, 1, 1], [], []>} : vector<128x128xf32>, vector<128x8xf32>, vector<128x8xf32> -> vector<128x8xf32>
    %cst_23 = arith.constant dense<0.000000e+00> : vector<128xf32>
    %46 = vector.multi_reduction <add>, %44, %cst_23 [1] : vector<128x128xf32> to vector<128xf32>
    %47 = vector.shape_cast %46 : vector<128xf32> to vector<128x1xf32>
    %cst_24 = arith.constant 9.99999997E-7 : f32
    %48 = vector.broadcast %cst_24 : f32 to vector<128x1xf32>
    %49 = arith.addf %47, %48 : vector<128x1xf32>
    %50 = vector.broadcast %49 : vector<128x1xf32> to vector<128x8xf32>
    %51 = arith.divf %45, %50 : vector<128x8xf32>
    %c56 = arith.constant 56 : index
    %c0_25 = arith.constant 0 : index
    %52 = vector.load %arg3[%c56, %c0_25] : memref<232x128xf32, #tpu.memory_space<vmem>>, vector<8x32xf32>
    %cst_26 = arith.constant dense<0.000000e+00> : vector<128x32xf32>
    %53 = tpu.matmul %51, %52, %cst_26 {dimension_numbers = #tpu.dot_dimension_numbers<[1], [0], [0], [1], [0, 0, 1, 1], [], []>} : vector<128x8xf32>, vector<8x32xf32>, vector<128x32xf32> -> vector<128x32xf32>
    %54 = arith.addf %34, %53 : vector<128x32xf32>
    %55 = vector.extract_strided_slice %8 {offsets = [0, 16], sizes = [128, 8], strides = [1, 1]} : vector<128x96xf32> to vector<128x8xf32>
    %56 = vector.extract_strided_slice %8 {offsets = [0, 48], sizes = [128, 8], strides = [1, 1]} : vector<128x96xf32> to vector<128x8xf32>
    %57 = vector.extract_strided_slice %8 {offsets = [0, 80], sizes = [128, 8], strides = [1, 1]} : vector<128x96xf32> to vector<128x8xf32>
    %cst_27 = arith.constant dense<0.000000e+00> : vector<128x128xf32>
    %58 = tpu.matmul %55, %56, %cst_27 {dimension_numbers = #tpu.dot_dimension_numbers<[1], [1], [0], [0], [0, 0, 1, 0], [], []>} : vector<128x8xf32>, vector<128x8xf32>, vector<128x128xf32> -> vector<128x128xf32>
    %cst_28 = arith.constant -5.000000e+00 : f32
    %cst_29 = arith.constant 5.000000e+00 : f32
    %59 = vector.broadcast %cst_28 : f32 to vector<128x128xf32>
    %60 = arith.maximumf %59, %58 : vector<128x128xf32>
    %61 = vector.broadcast %cst_29 : f32 to vector<128x128xf32>
    %62 = arith.minimumf %61, %60 : vector<128x128xf32>
    %63 = math.exp %62 : vector<128x128xf32>
    %64 = arith.mulf %63, %1 : vector<128x128xf32>
    %cst_30 = arith.constant dense<0.000000e+00> : vector<128x8xf32>
    %65 = tpu.matmul %64, %57, %cst_30 {dimension_numbers = #tpu.dot_dimension_numbers<[1], [0], [0], [1], [0, 0, 1, 1], [], []>} : vector<128x128xf32>, vector<128x8xf32>, vector<128x8xf32> -> vector<128x8xf32>
    %cst_31 = arith.constant dense<0.000000e+00> : vector<128xf32>
    %66 = vector.multi_reduction <add>, %64, %cst_31 [1] : vector<128x128xf32> to vector<128xf32>
    %67 = vector.shape_cast %66 : vector<128xf32> to vector<128x1xf32>
    %cst_32 = arith.constant 9.99999997E-7 : f32
    %68 = vector.broadcast %cst_32 : f32 to vector<128x1xf32>
    %69 = arith.addf %67, %68 : vector<128x1xf32>
    %70 = vector.broadcast %69 : vector<128x1xf32> to vector<128x8xf32>
    %71 = arith.divf %65, %70 : vector<128x8xf32>
    %c64 = arith.constant 64 : index
    %c0_33 = arith.constant 0 : index
    %72 = vector.load %arg3[%c64, %c0_33] : memref<232x128xf32, #tpu.memory_space<vmem>>, vector<8x32xf32>
    %cst_34 = arith.constant dense<0.000000e+00> : vector<128x32xf32>
    %73 = tpu.matmul %71, %72, %cst_34 {dimension_numbers = #tpu.dot_dimension_numbers<[1], [0], [0], [1], [0, 0, 1, 1], [], []>} : vector<128x8xf32>, vector<8x32xf32>, vector<128x32xf32> -> vector<128x32xf32>
    %74 = arith.addf %54, %73 : vector<128x32xf32>
    %75 = vector.extract_strided_slice %8 {offsets = [0, 24], sizes = [128, 8], strides = [1, 1]} : vector<128x96xf32> to vector<128x8xf32>
    %76 = vector.extract_strided_slice %8 {offsets = [0, 56], sizes = [128, 8], strides = [1, 1]} : vector<128x96xf32> to vector<128x8xf32>
    %77 = vector.extract_strided_slice %8 {offsets = [0, 88], sizes = [128, 8], strides = [1, 1]} : vector<128x96xf32> to vector<128x8xf32>
    %cst_35 = arith.constant dense<0.000000e+00> : vector<128x128xf32>
    %78 = tpu.matmul %75, %76, %cst_35 {dimension_numbers = #tpu.dot_dimension_numbers<[1], [1], [0], [0], [0, 0, 1, 0], [], []>} : vector<128x8xf32>, vector<128x8xf32>, vector<128x128xf32> -> vector<128x128xf32>
    %cst_36 = arith.constant -5.000000e+00 : f32
    %cst_37 = arith.constant 5.000000e+00 : f32
    %79 = vector.broadcast %cst_36 : f32 to vector<128x128xf32>
    %80 = arith.maximumf %79, %78 : vector<128x128xf32>
    %81 = vector.broadcast %cst_37 : f32 to vector<128x128xf32>
    %82 = arith.minimumf %81, %80 : vector<128x128xf32>
    %83 = math.exp %82 : vector<128x128xf32>
    %84 = arith.mulf %83, %1 : vector<128x128xf32>
    %cst_38 = arith.constant dense<0.000000e+00> : vector<128x8xf32>
    %85 = tpu.matmul %84, %77, %cst_38 {dimension_numbers = #tpu.dot_dimension_numbers<[1], [0], [0], [1], [0, 0, 1, 1], [], []>} : vector<128x128xf32>, vector<128x8xf32>, vector<128x8xf32> -> vector<128x8xf32>
    %cst_39 = arith.constant dense<0.000000e+00> : vector<128xf32>
    %86 = vector.multi_reduction <add>, %84, %cst_39 [1] : vector<128x128xf32> to vector<128xf32>
    %87 = vector.shape_cast %86 : vector<128xf32> to vector<128x1xf32>
    %cst_40 = arith.constant 9.99999997E-7 : f32
    %88 = vector.broadcast %cst_40 : f32 to vector<128x1xf32>
    %89 = arith.addf %87, %88 : vector<128x1xf32>
    %90 = vector.broadcast %89 : vector<128x1xf32> to vector<128x8xf32>
    %91 = arith.divf %85, %90 : vector<128x8xf32>
    %c72 = arith.constant 72 : index
    %c0_41 = arith.constant 0 : index
    %92 = vector.load %arg3[%c72, %c0_41] : memref<232x128xf32, #tpu.memory_space<vmem>>, vector<8x32xf32>
    %cst_42 = arith.constant dense<0.000000e+00> : vector<128x32xf32>
    %93 = tpu.matmul %91, %92, %cst_42 {dimension_numbers = #tpu.dot_dimension_numbers<[1], [0], [0], [1], [0, 0, 1, 1], [], []>} : vector<128x8xf32>, vector<8x32xf32>, vector<128x32xf32> -> vector<128x32xf32>
    %94 = arith.addf %74, %93 : vector<128x32xf32>
    %c80 = arith.constant 80 : index
    %c0_43 = arith.constant 0 : index
    %95 = vector.load %arg3[%c80, %c0_43] : memref<232x128xf32, #tpu.memory_space<vmem>>, vector<32x64xf32>
    %cst_44 = arith.constant dense<0.000000e+00> : vector<128x64xf32>
    %96 = tpu.matmul %94, %95, %cst_44 {dimension_numbers = #tpu.dot_dimension_numbers<[1], [0], [0], [1], [0, 0, 1, 1], [], []>} : vector<128x32xf32>, vector<32x64xf32>, vector<128x64xf32> -> vector<128x64xf32>
    %c3 = arith.constant 3 : index
    %c0_45 = arith.constant 0 : index
    %97 = vector.load %arg4[%c3, %c0_45] : memref<16x128xf32, #tpu.memory_space<vmem>>, vector<1x64xf32>
    %98 = vector.broadcast %97 : vector<1x64xf32> to vector<128x64xf32>
    %99 = arith.addf %96, %98 : vector<128x64xf32>
    %cst_46 = arith.constant 0.000000e+00 : f32
    %100 = vector.broadcast %cst_46 : f32 to vector<128x64xf32>
    %101 = arith.maximumf %99, %100 : vector<128x64xf32>
    %c112 = arith.constant 112 : index
    %c0_47 = arith.constant 0 : index
    %102 = vector.load %arg3[%c112, %c0_47] : memref<232x128xf32, #tpu.memory_space<vmem>>, vector<64x32xf32>
    %cst_48 = arith.constant dense<0.000000e+00> : vector<128x32xf32>
    %103 = tpu.matmul %101, %102, %cst_48 {dimension_numbers = #tpu.dot_dimension_numbers<[1], [0], [0], [1], [0, 0, 1, 1], [], []>} : vector<128x64xf32>, vector<64x32xf32>, vector<128x32xf32> -> vector<128x32xf32>
    %c4 = arith.constant 4 : index
    %c0_49 = arith.constant 0 : index
    %104 = vector.load %arg4[%c4, %c0_49] : memref<16x128xf32, #tpu.memory_space<vmem>>, vector<1x32xf32>
    %105 = vector.broadcast %104 : vector<1x32xf32> to vector<128x32xf32>
    %106 = arith.addf %103, %105 : vector<128x32xf32>
    %c5 = arith.constant 5 : index
    %c0_50 = arith.constant 0 : index
    %107 = vector.load %arg4[%c5, %c0_50] : memref<16x128xf32, #tpu.memory_space<vmem>>, vector<1x32xf32>
    %108 = vector.broadcast %107 : vector<1x32xf32> to vector<128x32xf32>
    %109 = arith.mulf %94, %108 : vector<128x32xf32>
    %110 = arith.addf %106, %109 : vector<128x32xf32>
    %c176 = arith.constant 176 : index
    %c0_51 = arith.constant 0 : index
    %111 = vector.load %arg3[%c176, %c0_51] : memref<232x128xf32, #tpu.memory_space<vmem>>, vector<32x16xf32>
    %cst_52 = arith.constant dense<0.000000e+00> : vector<128x16xf32>
    %112 = tpu.matmul %110, %111, %cst_52 {dimension_numbers = #tpu.dot_dimension_numbers<[1], [0], [0], [1], [0, 0, 1, 1], [], []>} : vector<128x32xf32>, vector<32x16xf32>, vector<128x16xf32> -> vector<128x16xf32>
    %c6 = arith.constant 6 : index
    %c0_53 = arith.constant 0 : index
    %113 = vector.load %arg4[%c6, %c0_53] : memref<16x128xf32, #tpu.memory_space<vmem>>, vector<1x16xf32>
    %114 = vector.broadcast %113 : vector<1x16xf32> to vector<128x16xf32>
    %115 = arith.addf %112, %114 : vector<128x16xf32>
    %cst_54 = arith.constant 0.000000e+00 : f32
    %116 = vector.broadcast %cst_54 : f32 to vector<128x16xf32>
    %117 = arith.maximumf %115, %116 : vector<128x16xf32>
    %c208 = arith.constant 208 : index
    %c0_55 = arith.constant 0 : index
    %118 = vector.load %arg3[%c208, %c0_55] : memref<232x128xf32, #tpu.memory_space<vmem>>, vector<16x8xf32>
    %cst_56 = arith.constant dense<0.000000e+00> : vector<128x8xf32>
    %119 = tpu.matmul %117, %118, %cst_56 {dimension_numbers = #tpu.dot_dimension_numbers<[1], [0], [0], [1], [0, 0, 1, 1], [], []>} : vector<128x16xf32>, vector<16x8xf32>, vector<128x8xf32> -> vector<128x8xf32>
    %c7 = arith.constant 7 : index
    %c0_57 = arith.constant 0 : index
    %120 = vector.load %arg4[%c7, %c0_57] : memref<16x128xf32, #tpu.memory_space<vmem>>, vector<1x8xf32>
    %121 = vector.broadcast %120 : vector<1x8xf32> to vector<128x8xf32>
    %122 = arith.addf %119, %121 : vector<128x8xf32>
    %cst_58 = arith.constant 0.000000e+00 : f32
    %123 = vector.broadcast %cst_58 : f32 to vector<128x8xf32>
    %124 = arith.maximumf %122, %123 : vector<128x8xf32>
    %c224 = arith.constant 224 : index
    %c0_59 = arith.constant 0 : index
    %125 = vector.load %arg3[%c224, %c0_59] : memref<232x128xf32, #tpu.memory_space<vmem>>, vector<8x128xf32>
    %cst_60 = arith.constant dense<0.000000e+00> : vector<128x128xf32>
    %126 = tpu.matmul %124, %125, %cst_60 {dimension_numbers = #tpu.dot_dimension_numbers<[1], [0], [0], [1], [0, 0, 1, 1], [], []>} : vector<128x8xf32>, vector<8x128xf32>, vector<128x128xf32> -> vector<128x128xf32>
    %c8 = arith.constant 8 : index
    %c0_61 = arith.constant 0 : index
    %127 = vector.load %arg4[%c8, %c0_61] : memref<16x128xf32, #tpu.memory_space<vmem>>, vector<1x128xf32>
    %128 = vector.broadcast %127 : vector<1x128xf32> to vector<128x128xf32>
    %129 = arith.addf %126, %128 : vector<128x128xf32>
    %c0_62 = arith.constant 0 : index
    %c0_63 = arith.constant 0 : index
    %130 = vector.load %arg5[%c0_62, %c0_63] : memref<128x128xf32, #tpu.memory_space<vmem>>, vector<128x128xf32>
    tpu.vector_store %arg5[%c0_62, %c0_63], %129 {strides = array<i32>} : memref<128x128xf32, #tpu.memory_space<vmem>>, vector<128x128xf32>,
    return
  }
  func.func @transform_0(%arg0: i32) -> (i32, i32) {
    %c0_i32 = arith.constant 0 : i32
    %c0_i32_0 = arith.constant 0 : i32
    return %arg0, %c0_i32 : i32, i32
  }
  func.func @transform_1(%arg0: i32) -> (i32, i32) {
    %c0_i32 = arith.constant 0 : i32
    %c0_i32_0 = arith.constant 0 : i32
    return %arg0, %c0_i32 : i32, i32
  }
  func.func @transform_2(%arg0: i32) -> (i32, i32) {
    %c0_i32 = arith.constant 0 : i32
    %c0_i32_0 = arith.constant 0 : i32
    %c0_i32_1 = arith.constant 0 : i32
    return %c0_i32, %c0_i32_0 : i32, i32
  }
  func.func @transform_3(%arg0: i32) -> (i32, i32) {
    %c0_i32 = arith.constant 0 : i32
    %c0_i32_0 = arith.constant 0 : i32
    %c0_i32_1 = arith.constant 0 : i32
    return %c0_i32, %c0_i32_0 : i32, i32
  }
  func.func @transform_4(%arg0: i32) -> (i32, i32) {
    %c0_i32 = arith.constant 0 : i32
    %c0_i32_0 = arith.constant 0 : i32
    return %arg0, %c0_i32 : i32, i32
  }
}

</mosaic_0001>

<bundles_post_ra>
// kernel: graph_transformer_forward.1
= control target key start
LH: loop header
LB: loop body
LE: loop exit
PB: predicated region body
PF: predicated region fallthrough
CT: control target
= control target key end

     0   :  { %s7170_s15 = smov 0   ;;  %s9055_s0 = inlined_call_operand.vmem [shape: f32[512,16], index: 0, kind: input, shape index: {}]   ;;  %s9056_s1 = inlined_call_operand.vmem [shape: f32[512,128], index: 1, kind: input, shape index: {}]   ;;  %s9057_s2 = inlined_call_operand.vmem [shape: f32[232,128], index: 2, kind: input, shape index: {}]   ;;  %s9058_s3 = inlined_call_operand.vmem [shape: f32[16,128], index: 3, kind: input, shape index: {}]   ;;  %s9059_s4 = inlined_call_operand.vmem [shape: f32[512,128], index: 4, kind: output, shape index: {}]  }
   0x1 LB: > { %s5204_s16 = sadd.s32 4294967295, %s7132_s15   ;;  %p5208_p0 = scmp.ge.s32.totalorder %s7132_s15, 1  ;;  %s7132_s15 = sphi %s7170_s15, %s14_s15  }
   0x2   : > { %p174_p1 = scmp.lt.s32.totalorder %s7132_s15, 5 }
   0x4   : > { %p175_p2 = pnand %p5208_p0, %p174_p1 }
   0x6   : > { %178 = sbr.rel (%p175_p2) target bundleno = 2961 (0xb91), region = 36 }
   0xb   : > { %v256_v0 = vld [vmem:[%s9057_s2 + $0x8] sm:$0xff]  ;;  %v255_v1 = vld [vmem:[%s9057_s2] sm:$0xff]  ;;  %s5209_s21 = sshll.u32 %s5204_s16, 4  ;;  %vm262_vm0 = vcmask 130048   ;;  %v457_v20 = vld [vmem:[%s9057_s2 + $0x18] sm:$0xff]  ;;  %vm460_vm1 = vcmask 261120  }
   0xc   : > { %v459_v2 = vld [vmem:[%s9057_s2 + $0x28] sm:$0xff]  ;;  %6055 = vmatprep.subr.mxu0 %v256_v0  ;;  %p206_p3 = scmp.lt.s32.totalorder %s5209_s21, 63  ;;  %v458_v19 = vld [vmem:[%s9057_s2 + $0x20] sm:$0xff]  ;;  %v456_v21 = vld [vmem:[%s9057_s2 + $0x10] sm:$0xff]  ;;  %vm744_vm2 = vcmask 64512   ;;  %s7134_s10 = smov 96  }
   0xd   : > { %6083 = vmatprep.subr.mxu1 %v459_v2  ;;  %6056 = vmatpush3.msra.mxu0 %v256_v0  ;;  %v5215_v23 = vld [vmem:[%s9058_s3] ss:$0 sm:$0xff]  ;;  %s7135_s11 = smov 88   ;;  %s7136_s12 = smov 64   ;;  %vm4256_vm3 = vcmask 523264  }
   0xe   : > { %6084 = vmatpush3.msra.mxu1 %v459_v2  ;;  %6057 = vmatprep.subr.mxu0 %v255_v1  ;;  %s9190_s21 = smov (!%p206_p3, %s5209_s21), 63  ;;  %s7137_s13 = smov 120  }
   0xf   : > { %6058 = vmatpush3.msra.mxu0 %v255_v1  ;;  %s7187_s24 = sshll.u32 %s9190_s21, 3  ;;  %6085 = vmatprep.subr.mxu1 %v458_v19  ;;  %s7138_s14 = smov 80  }
  0x10   : > { %s7193_s27 = scalar_lea.vmem %s9055_s0, %s7187_s24  ;;  %6086 = vmatpush3.msra.mxu1 %v458_v19  ;;  %s7139_s16 = smov 56  }
  0x11   : > { %v223_v3 = vld [vmem:[%s7193_s27] sm:$0xff]  ;;  %v224_v4 = vld [vmem:[%s7193_s27 + $0x8] sm:$0xff]  ;;  %v225_v5 = vld [vmem:[%s7193_s27 + $0x10] sm:$0xff]  ;;  %6087 = vmatprep.subr.mxu1 %v457_v20  ;;  %s7683_s21 = scalar_lea.vmem %s9056_s1, %s7187_s24  ;;  %s7140_s22 = smov 112  }
  0x12   : > { %6059 = vmatprep.mubr.msk.f32.mxu0 %vm262_vm0, %v223_v3  ;;  %v226_v6 = vld [vmem:[%s7193_s27 + $0x18] sm:$0xff]  ;;  %v227_v7 = vld [vmem:[%s7193_s27 + $0x20] sm:$0xff]  ;;  %v228_v8 = vld [vmem:[%s7193_s27 + $0x28] sm:$0xff]  ;;  %6088 = vmatpush3.msra.mxu1 %v457_v20  ;;  %s7141_s23 = smov 72   ;;  %s7142_s25 = smov 48  }
  0x13   : > { %6060 = vmatmul.mubr.msk.f32.vlgmr.msra.gmra.mxu0 %vm262_vm0, %v224_v4  ;;  %v229_v9 = vld [vmem:[%s7193_s27 + $0x30] sm:$0xff]  ;;  %v230_v10 = vld [vmem:[%s7193_s27 + $0x38] sm:$0xff]  ;;  %v231_v11 = vld [vmem:[%s7193_s27 + $0x40] sm:$0xff]  ;;  %6089 = vmatprep.subr.mxu1 %v456_v21  ;;  %s7143_s28 = smov 104   ;;  %s7144_s29 = smov 40  }
  0x14   : > { %6062 = vmatprep.mubr.msk.f32.mxu0 %vm262_vm0, %v225_v5  ;;  %v232_v12 = vld [vmem:[%s7193_s27 + $0x48] sm:$0xff]  ;;  %v233_v13 = vld [vmem:[%s7193_s27 + $0x50] sm:$0xff]  ;;  %v234_v14 = vld [vmem:[%s7193_s27 + $0x58] sm:$0xff]  ;;  %6090 = vmatpush3.msra.mxu1 %v456_v21 }
  0x15   : > { %v235_v15 = vld [vmem:[%s7193_s27 + $0x60] sm:$0xff]  ;;  %v236_v16 = vld [vmem:[%s7193_s27 + $0x68] sm:$0xff]  ;;  %v237_v17 = vld [vmem:[%s7193_s27 + $0x70] sm:$0xff] }
  0x16   : > { %v238_v18 = vld [vmem:[%s7193_s27 + $0x78] sm:$0xff] }
  0x17   : > { %6063 = vmatmul.mubr.msk.f32.gmra.mxu0 %vm262_vm0, %v226_v6 }
  0x18   : > { %6065 = vmatprep.mubr.msk.f32.mxu0 %vm262_vm0, %v227_v7 }
  0x1b   : > { %6066 = vmatmul.mubr.msk.f32.gmra.mxu0 %vm262_vm0, %v228_v8 }
  0x1c   : > { %6068 = vmatprep.mubr.msk.f32.mxu0 %vm262_vm0, %v229_v9 }
  0x1f   : > { %6069 = vmatmul.mubr.msk.f32.gmra.mxu0 %vm262_vm0, %v230_v10 }
  0x20   : > { %6071 = vmatprep.mubr.msk.f32.mxu0 %vm262_vm0, %v231_v11 }
  0x23   : > { %6072 = vmatmul.mubr.msk.f32.gmra.mxu0 %vm262_vm0, %v232_v12 }
  0x24   : > { %6074 = vmatprep.mubr.msk.f32.mxu0 %vm262_vm0, %v233_v13 }
  0x27   : > { %6075 = vmatmul.mubr.msk.f32.gmra.mxu0 %vm262_vm0, %v234_v14 }
  0x28   : > { %6077 = vmatprep.mubr.msk.f32.mxu0 %vm262_vm0, %v235_v15 }
  0x2b   : > { %6078 = vmatmul.mubr.msk.f32.gmra.mxu0 %vm262_vm0, %v236_v16 }
  0x2c   : > { %6080 = vmatprep.mubr.msk.f32.mxu0 %vm262_vm0, %v237_v17 }
  0x2f   : > { %6081 = vmatmul.mubr.msk.f32.gmra.mxu0 %vm262_vm0, %v238_v18 }
  0xd3   : > { %v6061_v22 = vpop.f32.mrf.mxu0 }
  0xd4   : > { %v7241_v26 = vadd.f32 %v6061_v22, %v5215_v23 }
  0xd5   : > { %v377_v24 = vpop.f32.mrf.mxu0 }
  0xd6   : > { %v7239_v25 = vadd.f32 %v5215_v23, %v377_v24  ;;  %9106 = vst [vmem:[#allocation3_spill] sm:$0xff] %v7241_v26 }
  0xd7   : > { %v6064_v27 = vpop.f32.mrf.mxu0 }
  0xd8   : > { %9105 = vst [vmem:[#allocation2_spill] sm:$0xff] %v7239_v25  ;;  %6091 = vmatprep.mubr.msk.f32.mxu1 %vm460_vm1, %v7239_v25  ;;  %v7249_v30 = vadd.f32 %v6064_v27, %v5215_v23 }
  0xd9   : > { %v387_v28 = vpop.f32.mrf.mxu0  ;;  %6092 = vmatmul.mubr.msk.f32.vlgmr.msra.gmra.mxu1 %vm460_vm1, %v7241_v26 }
  0xda   : > { %v7247_v29 = vadd.f32 %v5215_v23, %v387_v28  ;;  %9108 = vst [vmem:[#allocation5_spill] sm:$0xff] %v7249_v30 }
  0xdb   : > { %v6067_v31 = vpop.f32.mrf.mxu0 }
  0xdc   : > { %9107 = vst [vmem:[#allocation4_spill] sm:$0xff] %v7247_v29  ;;  %6094 = vmatprep.mubr.msk.f32.mxu1 %vm460_vm1, %v7247_v29  ;;  %v7257_v34 = vadd.f32 %v6067_v31, %v5215_v23  ;;  %v7712_v29 = vld [vmem:[%s7683_s21 + $0x30] sm:$0xff] }
  0xdd   : > { %v397_v32 = vpop.f32.mrf.mxu0  ;;  %6095 = vmatmul.mubr.msk.f32.gmra.mxu1 %vm460_vm1, %v7249_v30 }
  0xde   : > { %v7255_v33 = vadd.f32 %v5215_v23, %v397_v32  ;;  %9110 = vst [vmem:[#allocation7_spill] sm:$0xff] %v7257_v34 }
  0xdf   : > { %v6070_v35 = vpop.f32.mrf.mxu0 }
  0xe0   : > { %9109 = vst [vmem:[#allocation6_spill] sm:$0xff] %v7255_v33  ;;  %6097 = vmatprep.mubr.msk.f32.mxu1 %vm460_vm1, %v7255_v33  ;;  %v7265_v38 = vadd.f32 %v6070_v35, %v5215_v23 }
  0xe1   : > { %v407_v36 = vpop.f32.mrf.mxu0  ;;  %6098 = vmatmul.mubr.msk.f32.gmra.mxu1 %vm460_vm1, %v7257_v34 }
  0xe2   : > { %v7263_v37 = vadd.f32 %v5215_v23, %v407_v36  ;;  %9112 = vst [vmem:[#allocation9_spill] sm:$0xff] %v7265_v38 }
  0xe3   : > { %v6073_v39 = vpop.f32.mrf.mxu0 }
  0xe4   : > { %9111 = vst [vmem:[#allocation8_spill] sm:$0xff] %v7263_v37  ;;  %6100 = vmatprep.mubr.msk.f32.mxu1 %vm460_vm1, %v7263_v37  ;;  %v7273_v42 = vadd.f32 %v6073_v39, %v5215_v23 }
  0xe5   : > { %v417_v40 = vpop.f32.mrf.mxu0  ;;  %6101 = vmatmul.mubr.msk.f32.gmra.mxu1 %vm460_vm1, %v7265_v38 }
  0xe6   : > { %v7271_v41 = vadd.f32 %v5215_v23, %v417_v40  ;;  %9114 = vst [vmem:[#allocation11_spill] sm:$0xff] %v7273_v42 }
  0xe7   : > { %v6076_v43 = vpop.f32.mrf.mxu0 }
  0xe8   : > { %9113 = vst [vmem:[#allocation10_spill] sm:$0xff] %v7271_v41  ;;  %6103 = vmatprep.mubr.msk.f32.mxu1 %vm460_vm1, %v7271_v41  ;;  %v7281_v46 = vadd.f32 %v6076_v43, %v5215_v23 }
  0xe9   : > { %v427_v44 = vpop.f32.mrf.mxu0  ;;  %6104 = vmatmul.mubr.msk.f32.gmra.mxu1 %vm460_vm1, %v7273_v42 }
  0xea   : > { %v7279_v45 = vadd.f32 %v5215_v23, %v427_v44  ;;  %9116 = vst [vmem:[#allocation13_spill] sm:$0xff] %v7281_v46 }
  0xeb   : > { %v6079_v47 = vpop.f32.mrf.mxu0 }
  0xec   : > { %9115 = vst [vmem:[#allocation12_spill] sm:$0xff] %v7279_v45  ;;  %6106 = vmatprep.mubr.msk.f32.mxu1 %vm460_vm1, %v7279_v45  ;;  %v7289_v50 = vadd.f32 %v6079_v47, %v5215_v23 }
  0xed   : > { %v437_v48 = vpop.f32.mrf.mxu0  ;;  %6107 = vmatmul.mubr.msk.f32.gmra.mxu1 %vm460_vm1, %v7281_v46 }
  0xee   : > { %v7287_v49 = vadd.f32 %v5215_v23, %v437_v48  ;;  %9118 = vst [vmem:[#allocation15_spill] sm:$0xff] %v7289_v50 }
  0xef   : > { %v6082_v51 = vpop.f32.mrf.mxu0 }
  0xf0   : > { %9117 = vst [vmem:[#allocation14_spill] sm:$0xff] %v7287_v49  ;;  %6109 = vmatprep.mubr.msk.f32.mxu1 %vm460_vm1, %v7287_v49  ;;  %v7297_v54 = vadd.f32 %v6082_v51, %v5215_v23  ;;  %v7744_v49 = vld [vmem:[%s7683_s21 + $0x70] sm:$0xff] }
  0xf1   : > { %v447_v52 = vpop.f32.mrf.mxu0  ;;  %6110 = vmatmul.mubr.msk.f32.gmra.mxu1 %vm460_vm1, %v7289_v50 }
  0xf2   : > { %v7295_v53 = vadd.f32 %v5215_v23, %v447_v52  ;;  %9120 = vst [vmem:[#allocation17_spill] sm:$0xff] %v7297_v54 }
  0xf4   : > { %9119 = vst [vmem:[#allocation16_spill] sm:$0xff] %v7295_v53  ;;  %6112 = vmatprep.mubr.msk.f32.mxu1 %vm460_vm1, %v7295_v53 }
  0xf5   : > { %6113 = vmatmul.mubr.msk.f32.gmra.mxu1 %vm460_vm1, %v7297_v54 }
 0x199   : > { %v7303_v55 = vpop.f32.mrf.mxu1 }
 0x19a   : > { %9121 = vst [vmem:[#allocation18_spill] sm:$0xff] %v7303_v55 }
 0x19b   : > { %v7305_v56 = vpop.f32.mrf.mxu1 }
 0x19c   : > { %9122 = vst [vmem:[#allocation19_spill] sm:$0xff] %v7305_v56  ;;  %6147 = vmatprep.mubr.msk.f32.mxu0 %vm744_vm2, %v7305_v56 }
 0x19d   : > { %v7309_v57 = vpop.f32.mrf.mxu1 }
 0x19f   : > { %v7311_v58 = vpop.f32.mrf.mxu1 }
 0x1a1   : > { %v7313_v59 = vpop.f32.mrf.mxu1 }
 0x1a2   : > { %9123 = vst [vmem:[#allocation20_spill] sm:$0xff] %v7313_v59 }
 0x1a3   : > { %v7315_v60 = vpop.f32.mrf.mxu1 }
 0x1a4   : > { %9124 = vst [vmem:[#allocation21_spill] sm:$0xff] %v7315_v60 }
 0x1a5   : > { %v7317_v61 = vpop.f32.mrf.mxu1 }
 0x1a6   : > { %9125 = vst [vmem:[#allocation22_spill] sm:$0xff] %v7317_v61 }
 0x1a7   : > { %v7319_v62 = vpop.f32.mrf.mxu1 }
 0x1a8   : > { %9126 = vst [vmem:[#allocation23_spill] sm:$0xff] %v7319_v62 }
 0x1a9   : > { %v7321_v63 = vpop.f32.mrf.mxu1 }
 0x1aa   : > { %9127 = vst [vmem:[#allocation24_spill] sm:$0xff] %v7321_v63 }
 0x1ab   : > { %v7323_v0 = vpop.f32.mrf.mxu1 }
 0x1ac   : > { %9128 = vst [vmem:[#allocation25_spill] sm:$0xff] %v7323_v0 }
 0x1ad   : > { %v7325_v1 = vpop.f32.mrf.mxu1 }
 0x1ae   : > { %9129 = vst [vmem:[#allocation26_spill] sm:$0xff] %v7325_v1 }
 0x1af   : > { %v7327_v2 = vpop.f32.mrf.mxu1 }
 0x1b0   : > { %9130 = vst [vmem:[#allocation27_spill] sm:$0xff] %v7327_v2 }
 0x1b1   : > { %v7329_v3 = vpop.f32.mrf.mxu1 }
 0x1b2   : > { %9131 = vst [vmem:[#allocation28_spill] sm:$0xff] %v7329_v3  ;;  %738 = vrot.lane.b32.xlu1 %v7329_v3, %s7134_s10 }
 0x1b3   : > { %v7332_v4 = vpop.f32.mrf.mxu1 }
 0x1b4   : > { %9132 = vst [vmem:[#allocation29_spill] sm:$0xff] %v7332_v4 }
 0x1b5   : > { %v7334_v5 = vpop.f32.mrf.mxu1 }
 0x1b6   : > { %9133 = vst [vmem:[#allocation30_spill] sm:$0xff] %v7334_v5  ;;  %736 = vrot.lane.b32.xlu1 %v7332_v4, %s7134_s10  ;;  %742 = vrot.lane.b32.xlu0 %v7334_v5, %s7134_s10 }
 0x1b7   : > { %v7338_v6 = vpop.f32.mrf.mxu1 }
 0x1b8   : > { %9134 = vst [vmem:[#allocation31_spill] sm:$0xff] %v7338_v6 }
 0x1ba   : > { %732 = vrot.lane.b32.xlu1 %v7327_v2, %s7134_s10  ;;  %740 = vrot.lane.b32.xlu0 %v7338_v6, %s7134_s10 }
 0x1be   : > { %728 = vrot.lane.b32.xlu1 %v7323_v0, %s7134_s10  ;;  %734 = vrot.lane.b32.xlu0 %v7325_v1, %s7134_s10 }
 0x1c2   : > { %724 = vrot.lane.b32.xlu1 %v7319_v62, %s7134_s10  ;;  %730 = vrot.lane.b32.xlu0 %v7321_v63, %s7134_s10 }
 0x1c6   : > { %720 = vrot.lane.b32.xlu1 %v7315_v60, %s7134_s10  ;;  %726 = vrot.lane.b32.xlu0 %v7317_v61, %s7134_s10 }
 0x1ca   : > { %716 = vrot.lane.b32.xlu1 %v7311_v58, %s7134_s10  ;;  %722 = vrot.lane.b32.xlu0 %v7313_v59, %s7134_s10 }
 0x1ce   : > { %712 = vrot.lane.b32.xlu1 %v7305_v56, %s7134_s10  ;;  %718 = vrot.lane.b32.xlu0 %v7309_v57, %s7134_s10 }
 0x1d2   : > { %1573 = vrot.lane.b32.xlu1 %v7332_v4, %s7135_s11  ;;  %714 = vrot.lane.b32.xlu0 %v7303_v55, %s7134_s10 }
 0x1d6   : > { %1064 = vrot.lane.b32.xlu1 %v7334_v5, %s7136_s12  ;;  %1579 = vrot.lane.b32.xlu0 %v7334_v5, %s7135_s11 }
 0x1da   : > { %1577 = vrot.lane.b32.xlu1 %v7338_v6, %s7135_s11  ;;  %1575 = vrot.lane.b32.xlu0 %v7329_v3, %s7135_s11 }
 0x1de   : > { %1569 = vrot.lane.b32.xlu1 %v7327_v2, %s7135_s11  ;;  %1571 = vrot.lane.b32.xlu0 %v7325_v1, %s7135_s11 }
 0x1e2   : > { %1058 = vrot.lane.b32.xlu1 %v7332_v4, %s7136_s12  ;;  %1060 = vrot.lane.b32.xlu0 %v7329_v3, %s7136_s12 }
 0x1e6   : > { %1056 = vrot.lane.b32.xlu1 %v7325_v1, %s7136_s12  ;;  %1567 = vrot.lane.b32.xlu0 %v7321_v63, %s7135_s11 }
 0x1ea   : > { %1565 = vrot.lane.b32.xlu1 %v7323_v0, %s7135_s11  ;;  %1054 = vrot.lane.b32.xlu0 %v7327_v2, %s7136_s12 }
 0x1ee   : > { %1050 = vrot.lane.b32.xlu1 %v7323_v0, %s7136_s12  ;;  %1052 = vrot.lane.b32.xlu0 %v7321_v63, %s7136_s12 }
 0x1f2   : > { %1048 = vrot.lane.b32.xlu1 %v7317_v61, %s7136_s12  ;;  %1062 = vrot.lane.b32.xlu0 %v7338_v6, %s7136_s12 }
 0x1f6   : > { %1561 = vrot.lane.b32.xlu1 %v7319_v62, %s7135_s11  ;;  %1563 = vrot.lane.b32.xlu0 %v7317_v61, %s7135_s11 }
 0x1fa   : > { %1042 = vrot.lane.b32.xlu1 %v7315_v60, %s7136_s12  ;;  %1046 = vrot.lane.b32.xlu0 %v7319_v62, %s7136_s12 }
 0x1fe   : > { %1040 = vrot.lane.b32.xlu1 %v7309_v57, %s7136_s12  ;;  %1044 = vrot.lane.b32.xlu0 %v7313_v59, %s7136_s12 }
 0x202   : > { %1557 = vrot.lane.b32.xlu1 %v7315_v60, %s7135_s11  ;;  %1559 = vrot.lane.b32.xlu0 %v7313_v59, %s7135_s11 }
 0x206   : > { %1034 = vrot.lane.b32.xlu1 %v7305_v56, %s7136_s12  ;;  %1038 = vrot.lane.b32.xlu0 %v7311_v58, %s7136_s12 }
 0x20a   : > { %1553 = vrot.lane.b32.xlu1 %v7311_v58, %s7135_s11  ;;  %1036 = vrot.lane.b32.xlu0 %v7303_v55, %s7136_s12 }
 0x20e   : > { %1549 = vrot.lane.b32.xlu1 %v7305_v56, %s7135_s11  ;;  %1555 = vrot.lane.b32.xlu0 %v7309_v57, %s7135_s11 }
 0x212   : > { %1519 = vrot.lane.b32.xlu1 %v7303_v55, %s7137_s13  ;;  %1551 = vrot.lane.b32.xlu0 %v7303_v55, %s7135_s11 }
 0x216   : > { %1523 = vrot.lane.b32.xlu1 %v7309_v57, %s7137_s13  ;;  %1517 = vrot.lane.b32.xlu0 %v7305_v56, %s7137_s13 }
 0x21a   : > { %1527 = vrot.lane.b32.xlu1 %v7313_v59, %s7137_s13  ;;  %1521 = vrot.lane.b32.xlu0 %v7311_v58, %s7137_s13 }
 0x21e   : > { %1531 = vrot.lane.b32.xlu1 %v7317_v61, %s7137_s13  ;;  %1525 = vrot.lane.b32.xlu0 %v7315_v60, %s7137_s13 }
 0x222   : > { %1535 = vrot.lane.b32.xlu1 %v7321_v63, %s7137_s13  ;;  %1529 = vrot.lane.b32.xlu0 %v7319_v62, %s7137_s13 }
 0x224   : > { %v739_v7 = vpop.permute.xlu1 %738 }
 0x226   : > { %1539 = vrot.lane.b32.xlu1 %v7325_v1, %s7137_s13  ;;  %1533 = vrot.lane.b32.xlu0 %v7323_v0, %s7137_s13 }
 0x228   : > { %v737_v8 = vpop.permute.xlu1 %736  ;;  %v743_v9 = vpop.permute.xlu0 %742 }
 0x229   : > { %6115 = vmatprep.subr.msk.mxu0 %vm744_vm2, %v743_v9 }
 0x22a   : > { %6116 = vmatpush3.xpose.msk.msra.mxu0 %vm744_vm2, %v743_v9  ;;  %1543 = vrot.lane.b32.xlu1 %v7329_v3, %s7137_s13 }
 0x22b   : > { %1537 = vrot.lane.b32.xlu0 %v7327_v2, %s7137_s13 }
 0x22c   : > { %v733_v10 = vpop.permute.xlu1 %732  ;;  %v741_v11 = vpop.permute.xlu0 %740 }
 0x22d   : > { %6117 = vmatprep.subr.msk.mxu0 %vm744_vm2, %v741_v11 }
 0x22e   : > { %1547 = vrot.lane.b32.xlu1 %v7334_v5, %s7137_s13  ;;  %6118 = vmatpush3.xpose.msk.msra.mxu0 %vm744_vm2, %v741_v11 }
 0x22f   : > { %1541 = vrot.lane.b32.xlu0 %v7332_v4, %s7137_s13  ;;  %6119 = vmatprep.subr.msk.mxu0 %vm744_vm2, %v739_v7 }
 0x230   : > { %v729_v12 = vpop.permute.xlu1 %728  ;;  %v735_v13 = vpop.permute.xlu0 %734 }
 0x232   : > { %2415 = vrot.lane.b32.xlu1 %v7334_v5, %s7138_s14  ;;  %6120 = vmatpush3.xpose.msk.msra.mxu0 %vm744_vm2, %v739_v7 }
 0x233   : > { %1545 = vrot.lane.b32.xlu0 %v7338_v6, %s7137_s13  ;;  %6121 = vmatprep.subr.msk.mxu0 %vm744_vm2, %v737_v8 }
 0x234   : > { %v725_v14 = vpop.permute.xlu1 %724  ;;  %v731_v15 = vpop.permute.xlu0 %730 }
 0x236   : > { %2411 = vrot.lane.b32.xlu1 %v7329_v3, %s7138_s14  ;;  %6122 = vmatpush3.xpose.msk.msra.mxu0 %vm744_vm2, %v737_v8 }
 0x237   : > { %2407 = vrot.lane.b32.xlu0 %v7325_v1, %s7138_s14  ;;  %6123 = vmatprep.subr.msk.mxu0 %vm744_vm2, %v735_v13 }
 0x238   : > { %v721_v16 = vpop.permute.xlu1 %720  ;;  %v727_v17 = vpop.permute.xlu0 %726 }
 0x23a   : > { %2409 = vrot.lane.b32.xlu1 %v7332_v4, %s7138_s14  ;;  %6124 = vmatpush3.xpose.msk.msra.mxu0 %vm744_vm2, %v735_v13 }
 0x23b   : > { %1900 = vrot.lane.b32.xlu0 %v7334_v5, %s7139_s16  ;;  %6125 = vmatprep.subr.msk.mxu0 %vm744_vm2, %v733_v10 }
 0x23c   : > { %v717_v18 = vpop.permute.xlu1 %716  ;;  %v723_v19 = vpop.permute.xlu0 %722 }
 0x23e   : > { %1894 = vrot.lane.b32.xlu1 %v7332_v4, %s7139_s16  ;;  %6126 = vmatpush3.xpose.msk.msra.mxu0 %vm744_vm2, %v733_v10 }
 0x23f   : > { %2405 = vrot.lane.b32.xlu0 %v7327_v2, %s7138_s14  ;;  %6127 = vmatprep.subr.msk.mxu0 %vm744_vm2, %v731_v15 }
 0x240   : > { %v713_v20 = vpop.permute.xlu1 %712  ;;  %v719_v21 = vpop.permute.xlu0 %718 }
 0x242   : > { %1888 = vrot.lane.b32.xlu1 %v7321_v63, %s7139_s16  ;;  %6128 = vmatpush3.xpose.msk.msra.mxu0 %vm744_vm2, %v731_v15 }
 0x243   : > { %1896 = vrot.lane.b32.xlu0 %v7329_v3, %s7139_s16  ;;  %6129 = vmatprep.subr.msk.mxu0 %vm744_vm2, %v729_v12 }
 0x244   : > { %v7466_v22 = vpop.permute.xlu1 %1573  ;;  %v715_v23 = vpop.permute.xlu0 %714 }
 0x246   : > { %2399 = vrot.lane.b32.xlu1 %v7317_v61, %s7138_s14  ;;  %6130 = vmatpush3.xpose.msk.msra.mxu0 %vm744_vm2, %v729_v12 }
 0x247   : > { %2403 = vrot.lane.b32.xlu0 %v7321_v63, %s7138_s14  ;;  %6131 = vmatprep.subr.msk.mxu0 %vm744_vm2, %v727_v17 }
 0x248   : > { %v1065_v24 = vpop.permute.xlu1 %1064  ;;  %v1580_v27 = vpop.permute.xlu0 %1579 }
 0x249   : > { %6171 = vmatprep.subr.mxu1 %v1065_v24 }
 0x24a   : > { %6172 = vmatpush3.msra.mxu1 %v1065_v24  ;;  %1882 = vrot.lane.b32.xlu1 %v7319_v62, %s7139_s16 }
 0x24b   : > { %1892 = vrot.lane.b32.xlu0 %v7325_v1, %s7139_s16  ;;  %6132 = vmatpush3.xpose.msk.msra.mxu0 %vm744_vm2, %v727_v17 }
 0x24c   : > { %6133 = vmatprep.subr.msk.mxu0 %vm744_vm2, %v725_v14  ;;  %v1578_v28 = vpop.permute.xlu1 %1577  ;;  %v7480_v31 = vpop.permute.xlu0 %1575 }
 0x24e   : > { %1880 = vrot.lane.b32.xlu1 %v7313_v59, %s7139_s16 }
 0x24f   : > { %1890 = vrot.lane.b32.xlu0 %v7327_v2, %s7139_s16  ;;  %6134 = vmatpush3.xpose.msk.msra.mxu0 %vm744_vm2, %v725_v14 }
 0x250   : > { %6135 = vmatprep.subr.msk.mxu0 %vm744_vm2, %v723_v19  ;;  %v7488_v32 = vpop.permute.xlu1 %1569  ;;  %v7490_v35 = vpop.permute.xlu0 %1571 }
 0x252   : > { %2395 = vrot.lane.b32.xlu1 %v7313_v59, %s7138_s14 }
 0x253   : > { %2401 = vrot.lane.b32.xlu0 %v7323_v0, %s7138_s14  ;;  %6136 = vmatpush3.xpose.msk.msra.mxu0 %vm744_vm2, %v723_v19 }
 0x254   : > { %6137 = vmatprep.subr.msk.mxu0 %vm744_vm2, %v721_v16  ;;  %v1059_v36 = vpop.permute.xlu1 %1058  ;;  %v1061_v39 = vpop.permute.xlu0 %1060 }
 0x257   : > { %1886 = vrot.lane.b32.xlu0 %v7323_v0, %s7139_s16  ;;  %6138 = vmatpush3.xpose.msk.msra.mxu0 %vm744_vm2, %v721_v16 }
 0x258   : > { %6139 = vmatprep.subr.msk.mxu0 %vm744_vm2, %v719_v21  ;;  %v1057_v40 = vpop.permute.xlu1 %1056  ;;  %v7502_v43 = vpop.permute.xlu0 %1567 }
 0x25b   : > { %1884 = vrot.lane.b32.xlu0 %v7317_v61, %s7139_s16  ;;  %6140 = vmatpush3.xpose.msk.msra.mxu0 %vm744_vm2, %v719_v21 }
 0x25c   : > { %6141 = vmatprep.subr.msk.mxu0 %vm744_vm2, %v717_v18  ;;  %v7508_v44 = vpop.permute.xlu1 %1565  ;;  %v1055_v47 = vpop.permute.xlu0 %1054 }
 0x25f   : > { %2397 = vrot.lane.b32.xlu0 %v7319_v62, %s7138_s14  ;;  %6142 = vmatpush3.xpose.msk.msra.mxu0 %vm744_vm2, %v717_v18 }
 0x260   : > { %6143 = vmatprep.subr.msk.mxu0 %vm744_vm2, %v715_v23  ;;  %v1051_v48 = vpop.permute.xlu1 %1050  ;;  %v1053_v51 = vpop.permute.xlu0 %1052 }
 0x263   : > { %1878 = vrot.lane.b32.xlu0 %v7315_v60, %s7139_s16  ;;  %6144 = vmatpush3.xpose.msk.msra.mxu0 %vm744_vm2, %v715_v23 }
 0x264   : > { %6145 = vmatprep.subr.msk.mxu0 %vm744_vm2, %v713_v20  ;;  %v1049_v52 = vpop.permute.xlu1 %1048  ;;  %v1063_v7 = vpop.permute.xlu0 %1062 }
 0x265   : > { %6173 = vmatprep.subr.mxu1 %v1063_v7 }
 0x266   : > { %6174 = vmatpush3.msra.mxu1 %v1063_v7 }
 0x267   : > { %1876 = vrot.lane.b32.xlu0 %v7309_v57, %s7139_s16  ;;  %6146 = vmatpush3.xpose.msk.msra.mxu0 %vm744_vm2, %v713_v20 }
 0x268   : > { %6175 = vmatprep.subr.mxu1 %v1061_v39  ;;  %6253 = vmatprep.subr.msk.mxu0 %vm744_vm2, %v1580_v27  ;;  %v7522_v8 = vpop.permute.xlu1 %1561  ;;  %v7524_v9 = vpop.permute.xlu0 %1563 }
 0x269   : > { %6176 = vmatpush3.msra.mxu1 %v1061_v39 }
 0x26a   : > { %6148 = vmatmul.mubr.msk.f32.vlgmr.msra.gmra.mxu0 %vm744_vm2, %v7303_v55  ;;  %6177 = vmatprep.subr.mxu1 %v1059_v36 }
 0x26b   : > { %2413 = vrot.lane.b32.xlu0 %v7338_v6, %s7138_s14  ;;  %6150 = vmatprep.mubr.msk.f32.mxu0 %vm744_vm2, %v7311_v58 }
 0x26c   : > { %6178 = vmatpush3.msra.mxu1 %v1059_v36  ;;  %6254 = vmatpush3.xpose.msk.msra.mxu0 %vm744_vm2, %v1580_v27  ;;  %v1043_v10 = vpop.permute.xlu1 %1042  ;;  %v1047_v11 = vpop.permute.xlu0 %1046 }
 0x26d   : > { %6179 = vmatprep.subr.mxu1 %v1057_v40  ;;  %6255 = vmatprep.subr.msk.mxu0 %vm744_vm2, %v1578_v28 }
 0x26e   : > { %6180 = vmatpush3.msra.mxu1 %v1057_v40  ;;  %6151 = vmatmul.mubr.msk.f32.gmra.mxu0 %vm744_vm2, %v7309_v57 }
 0x26f   : > { %6181 = vmatprep.subr.mxu1 %v1055_v47  ;;  %1898 = vrot.lane.b32.xlu0 %v7338_v6, %s7139_s16 }
 0x270   : > { %6153 = vmatprep.mubr.msk.f32.mxu0 %vm744_vm2, %v7315_v60  ;;  %6182 = vmatpush3.msra.mxu1 %v1055_v47  ;;  %v1041_v12 = vpop.permute.xlu1 %1040  ;;  %v1045_v13 = vpop.permute.xlu0 %1044 }
 0x271   : > { %6256 = vmatpush3.xpose.msk.msra.mxu0 %vm744_vm2, %v1578_v28  ;;  %6183 = vmatprep.subr.mxu1 %v1053_v51 }
 0x272   : > { %6257 = vmatprep.subr.msk.mxu0 %vm744_vm2, %v7480_v31  ;;  %6184 = vmatpush3.msra.mxu1 %v1053_v51 }
 0x273   : > { %6154 = vmatmul.mubr.msk.f32.gmra.mxu0 %vm744_vm2, %v7313_v59  ;;  %6185 = vmatprep.subr.mxu1 %v1051_v48 }
 0x274   : > { %6156 = vmatprep.mubr.msk.f32.mxu0 %vm744_vm2, %v7319_v62  ;;  %6186 = vmatpush3.msra.mxu1 %v1051_v48  ;;  %v7547_v14 = vpop.permute.xlu1 %1557  ;;  %v1560_v15 = vpop.permute.xlu0 %1559 }
 0x275   : > { %6258 = vmatpush3.xpose.msk.msra.mxu0 %vm744_vm2, %v7480_v31  ;;  %6187 = vmatprep.subr.mxu1 %v1049_v52 }
 0x276   : > { %6259 = vmatprep.subr.msk.mxu0 %vm744_vm2, %v7466_v22  ;;  %6188 = vmatpush3.msra.mxu1 %v1049_v52 }
 0x277   : > { %6157 = vmatmul.mubr.msk.f32.gmra.mxu0 %vm744_vm2, %v7317_v61  ;;  %6189 = vmatprep.subr.mxu1 %v1047_v11 }
 0x278   : > { %6159 = vmatprep.mubr.msk.f32.mxu0 %vm744_vm2, %v7323_v0  ;;  %6190 = vmatpush3.msra.mxu1 %v1047_v11  ;;  %v1035_v16 = vpop.permute.xlu1 %1034  ;;  %v1039_v17 = vpop.permute.xlu0 %1038 }
 0x279   : > { %6260 = vmatpush3.xpose.msk.msra.mxu0 %vm744_vm2, %v7466_v22  ;;  %6191 = vmatprep.subr.mxu1 %v1045_v13 }
 0x27a   : > { %6261 = vmatprep.subr.msk.mxu0 %vm744_vm2, %v7490_v35  ;;  %6192 = vmatpush3.msra.mxu1 %v1045_v13 }
 0x27b   : > { %6160 = vmatmul.mubr.msk.f32.gmra.mxu0 %vm744_vm2, %v7321_v63  ;;  %6193 = vmatprep.subr.mxu1 %v1043_v10 }
 0x27c   : > { %6162 = vmatprep.mubr.msk.f32.mxu0 %vm744_vm2, %v7327_v2  ;;  %6194 = vmatpush3.msra.mxu1 %v1043_v10  ;;  %v1554_v18 = vpop.permute.xlu1 %1553  ;;  %v1037_v19 = vpop.permute.xlu0 %1036 }
 0x27d   : > { %6262 = vmatpush3.xpose.msk.msra.mxu0 %vm744_vm2, %v7490_v35  ;;  %6195 = vmatprep.subr.mxu1 %v1041_v12 }
 0x27e   : > { %6263 = vmatprep.subr.msk.mxu0 %vm744_vm2, %v7488_v32  ;;  %6196 = vmatpush3.msra.mxu1 %v1041_v12 }
 0x27f   : > { %6163 = vmatmul.mubr.msk.f32.gmra.mxu0 %vm744_vm2, %v7325_v1  ;;  %6197 = vmatprep.subr.mxu1 %v1039_v17 }
 0x280   : > { %6165 = vmatprep.mubr.msk.f32.mxu0 %vm744_vm2, %v7332_v4  ;;  %6198 = vmatpush3.msra.mxu1 %v1039_v17  ;;  %v1550_v20 = vpop.permute.xlu1 %1549  ;;  %v1556_v21 = vpop.permute.xlu0 %1555 }
 0x281   : > { %6264 = vmatpush3.xpose.msk.msra.mxu0 %vm744_vm2, %v7488_v32  ;;  %6199 = vmatprep.subr.mxu1 %v1037_v19 }
 0x282   : > { %6265 = vmatprep.subr.msk.mxu0 %vm744_vm2, %v7502_v43  ;;  %6200 = vmatpush3.msra.mxu1 %v1037_v19 }
 0x283   : > { %6166 = vmatmul.mubr.msk.f32.gmra.mxu0 %vm744_vm2, %v7329_v3  ;;  %6201 = vmatprep.subr.mxu1 %v1035_v16 }
 0x284   : > { %6168 = vmatprep.mubr.msk.f32.mxu0 %vm744_vm2, %v7338_v6  ;;  %6202 = vmatpush3.msra.mxu1 %v1035_v16  ;;  %v1520_v22 = vpop.permute.xlu1 %1519  ;;  %v1552_v23 = vpop.permute.xlu0 %1551 }
 0x285   : > { %6266 = vmatpush3.xpose.msk.msra.mxu0 %vm744_vm2, %v7502_v43 }
 0x286   : > { %6267 = vmatprep.subr.msk.mxu0 %vm744_vm2, %v7508_v44 }
 0x287   : > { %6169 = vmatmul.mubr.msk.f32.gmra.mxu0 %vm744_vm2, %v7334_v5 }
 0x288   : > { %v1524_v24 = vpop.permute.xlu1 %1523  ;;  %v1518_v27 = vpop.permute.xlu0 %1517 }
 0x289   : > { %6268 = vmatpush3.xpose.msk.msra.mxu0 %vm744_vm2, %v7508_v44  ;;  %6285 = vmatprep.mubr.msk.f32.mxu0 %vm744_vm2, %v1518_v27 }
 0x28a   : > { %6269 = vmatprep.subr.msk.mxu0 %vm744_vm2, %v7524_v9 }
 0x28c   : > { %v1528_v28 = vpop.permute.xlu1 %1527  ;;  %v1522_v31 = vpop.permute.xlu0 %1521 }
 0x28d   : > { %6270 = vmatpush3.xpose.msk.msra.mxu0 %vm744_vm2, %v7524_v9 }
 0x28e   : > { %6271 = vmatprep.subr.msk.mxu0 %vm744_vm2, %v7522_v8 }
 0x290   : > { %v1532_v32 = vpop.permute.xlu1 %1531  ;;  %v1526_v35 = vpop.permute.xlu0 %1525 }
 0x291   : > { %6272 = vmatpush3.xpose.msk.msra.mxu0 %vm744_vm2, %v7522_v8 }
 0x292   : > { %6273 = vmatprep.subr.msk.mxu0 %vm744_vm2, %v1560_v15 }
 0x294   : > { %v1536_v36 = vpop.permute.xlu1 %1535  ;;  %v1530_v39 = vpop.permute.xlu0 %1529 }
 0x295   : > { %6274 = vmatpush3.xpose.msk.msra.mxu0 %vm744_vm2, %v1560_v15  ;;  %v7637_v15 = vld [vmem:[%s9057_s2 + $0x30] sm:$0xff] }
 0x296   : > { %6275 = vmatprep.subr.msk.mxu0 %vm744_vm2, %v7547_v14  ;;  %6227 = vmatprep.subr.mxu1 %v7637_v15 }
 0x298   : > { %v1540_v40 = vpop.permute.xlu1 %1539  ;;  %v1534_v43 = vpop.permute.xlu0 %1533 }
 0x299   : > { %6276 = vmatpush3.xpose.msk.msra.mxu0 %vm744_vm2, %v7547_v14 }
 0x29a   : > { %6277 = vmatprep.subr.msk.mxu0 %vm744_vm2, %v1556_v21 }
 0x29c   : > { %v1544_v44 = vpop.permute.xlu1 %1543 }
 0x29d   : > { %6278 = vmatpush3.xpose.msk.msra.mxu0 %vm744_vm2, %v1556_v21  ;;  %v1538_v47 = vpop.permute.xlu0 %1537 }
 0x29e   : > { %6279 = vmatprep.subr.msk.mxu0 %vm744_vm2, %v1554_v18 }
 0x2a0   : > { %v1548_v51 = vpop.permute.xlu1 %1547 }
 0x2a1   : > { %6280 = vmatpush3.xpose.msk.msra.mxu0 %vm744_vm2, %v1554_v18  ;;  %v1542_v48 = vpop.permute.xlu0 %1541 }
 0x2a2   : > { %6281 = vmatprep.subr.msk.mxu0 %vm744_vm2, %v1552_v23 }
 0x2a4   : > { %v2416_v7 = vpop.permute.xlu1 %2415 }
 0x2a5   : > { %6282 = vmatpush3.xpose.msk.msra.mxu0 %vm744_vm2, %v1552_v23  ;;  %v1546_v52 = vpop.permute.xlu0 %1545 }
 0x2a6   : > { %6283 = vmatprep.subr.msk.mxu0 %vm744_vm2, %v1550_v20 }
 0x2a9   : > { %6284 = vmatpush3.xpose.msk.msra.mxu0 %vm744_vm2, %v1550_v20  ;;  %v2408_v8 = vpop.permute.xlu0 %2407  ;;  %v2412_v20 = vpop.permute.xlu1 %2411 }
 0x2aa   : > { %6391 = vmatprep.subr.msk.mxu0 %vm744_vm2, %v2416_v7 }
 0x2ac   : > { %6286 = vmatmul.mubr.msk.f32.vlgmr.msra.gmra.mxu0 %vm744_vm2, %v1520_v22 }
 0x2ad   : > { %6288 = vmatprep.mubr.msk.f32.mxu0 %vm744_vm2, %v1522_v31  ;;  %6392 = vmatpush3.xpose.msk.msra.mxu0 %vm744_vm2, %v2416_v7  ;;  %v7616_v9 = vpop.permute.xlu0 %1900  ;;  %v2410_v23 = vpop.permute.xlu1 %2409 }
 0x2b0   : > { %6289 = vmatmul.mubr.msk.f32.gmra.mxu0 %vm744_vm2, %v1524_v24 }
 0x2b1   : > { %6291 = vmatprep.mubr.msk.f32.mxu0 %vm744_vm2, %v1526_v35  ;;  %v2406_v10 = vpop.permute.xlu0 %2405  ;;  %v7654_v27 = vpop.permute.xlu1 %1894 }
 0x2b4   : > { %6292 = vmatmul.mubr.msk.f32.gmra.mxu0 %vm744_vm2, %v1528_v28 }
 0x2b5   : > { %6294 = vmatprep.mubr.msk.f32.mxu0 %vm744_vm2, %v1530_v39  ;;  %v7622_v11 = vpop.permute.xlu0 %1896  ;;  %v7658_v28 = vpop.permute.xlu1 %1888 }
 0x2b8   : > { %6295 = vmatmul.mubr.msk.f32.gmra.mxu0 %vm744_vm2, %v1532_v32 }
 0x2b9   : > { %6297 = vmatprep.mubr.msk.f32.mxu0 %vm744_vm2, %v1534_v43  ;;  %v2404_v12 = vpop.permute.xlu0 %2403  ;;  %v2400_v31 = vpop.permute.xlu1 %2399 }
 0x2bc   : > { %6298 = vmatmul.mubr.msk.f32.gmra.mxu0 %vm744_vm2, %v1536_v36 }
 0x2bd   : > { %6300 = vmatprep.mubr.msk.f32.mxu0 %vm744_vm2, %v1538_v47  ;;  %v7628_v13 = vpop.permute.xlu0 %1892  ;;  %v7666_v32 = vpop.permute.xlu1 %1882 }
 0x2c0   : > { %6301 = vmatmul.mubr.msk.f32.gmra.mxu0 %vm744_vm2, %v1540_v40 }
 0x2c1   : > { %6303 = vmatprep.mubr.msk.f32.mxu0 %vm744_vm2, %v1542_v48  ;;  %v7632_v14 = vpop.permute.xlu0 %1890  ;;  %v7672_v35 = vpop.permute.xlu1 %1880 }
 0x2c4   : > { %6304 = vmatmul.mubr.msk.f32.gmra.mxu0 %vm744_vm2, %v1544_v44 }
 0x2c5   : > { %6306 = vmatprep.mubr.msk.f32.mxu0 %vm744_vm2, %v1546_v52  ;;  %v2402_v16 = vpop.permute.xlu0 %2401  ;;  %v2396_v36 = vpop.permute.xlu1 %2395 }
 0x2c8   : > { %6307 = vmatmul.mubr.msk.f32.gmra.mxu0 %vm744_vm2, %v1548_v51 }
 0x2c9   : > { %v7643_v17 = vpop.permute.xlu0 %1886 }
 0x2cd   : > { %v7645_v18 = vpop.permute.xlu0 %1884 }
 0x2d1   : > { %v2398_v19 = vpop.permute.xlu0 %2397 }
 0x2d5   : > { %v7647_v21 = vpop.permute.xlu0 %1878 }
 0x2d9   : > { %v7649_v22 = vpop.permute.xlu0 %1876 }
 0x2dd   : > { %v2414_v24 = vpop.permute.xlu0 %2413 }
 0x2de   : > { %6393 = vmatprep.subr.msk.mxu0 %vm744_vm2, %v2414_v24 }
 0x2df   : > { %6394 = vmatpush3.xpose.msk.msra.mxu0 %vm744_vm2, %v2414_v24 }
 0x2e0   : > { %6395 = vmatprep.subr.msk.mxu0 %vm744_vm2, %v2412_v20 }
 0x2e3   : > { %6396 = vmatpush3.xpose.msk.msra.mxu0 %vm744_vm2, %v2412_v20 }
 0x2e4   : > { %6397 = vmatprep.subr.msk.mxu0 %vm744_vm2, %v2410_v23 }
 0x2e7   : > { %6398 = vmatpush3.xpose.msk.msra.mxu0 %vm744_vm2, %v2410_v23 }
 0x2e8   : > { %6399 = vmatprep.subr.msk.mxu0 %vm744_vm2, %v2408_v8 }
 0x2eb   : > { %6400 = vmatpush3.xpose.msk.msra.mxu0 %vm744_vm2, %v2408_v8 }
 0x2ec   : > { %6401 = vmatprep.subr.msk.mxu0 %vm744_vm2, %v2406_v10 }
 0x2ef   : > { %6402 = vmatpush3.xpose.msk.msra.mxu0 %vm744_vm2, %v2406_v10 }
 0x2f0   : > { %6403 = vmatprep.subr.msk.mxu0 %vm744_vm2, %v2404_v12 }
 0x2f3   : > { %6404 = vmatpush3.xpose.msk.msra.mxu0 %vm744_vm2, %v2404_v12 }
 0x2f4   : > { %6405 = vmatprep.subr.msk.mxu0 %vm744_vm2, %v2402_v16 }
 0x2f7   : > { %6406 = vmatpush3.xpose.msk.msra.mxu0 %vm744_vm2, %v2402_v16 }
 0x2f8   : > { %6407 = vmatprep.subr.msk.mxu0 %vm744_vm2, %v2400_v31 }
 0x2fb   : > { %6408 = vmatpush3.xpose.msk.msra.mxu0 %vm744_vm2, %v2400_v31 }
 0x2fc   : > { %6409 = vmatprep.subr.msk.mxu0 %vm744_vm2, %v2398_v19 }
 0x2ff   : > { %6410 = vmatpush3.xpose.msk.msra.mxu0 %vm744_vm2, %v2398_v19 }
 0x300   : > { %6411 = vmatprep.subr.msk.mxu0 %vm744_vm2, %v2396_v36 }
 0x303   : > { %6412 = vmatpush3.xpose.msk.msra.mxu0 %vm744_vm2, %v2396_v36 }
 0x32a   : > { %v6149_v39 = vpop.f32.mrf.mxu0 }
 0x32b   : > { %v5283_v40 = vclamps-f32 %v6149_v39, 5.0 }
 0x32c   : > { %v875_v43 = vpop.f32.mrf.mxu0 }
 0x32d   : > { %v988_v44 = vmul.f32 1.442695, %v5283_v40  ;;  %v5282_v47 = vclamps-f32 %v875_v43, 5.0 }
 0x32e   : > { %v6152_v48 = vpop.f32.mrf.mxu0 }
 0x32f   : > { %6852 = vpow2.f32 %v988_v44  ;;  %v986_v51 = vmul.f32 1.442695, %v5282_v47  ;;  %v5285_v52 = vclamps-f32 %v6152_v48, 5.0  ;;  %v7686_v47 = vld [vmem:[%s7683_s21 + $0x8] sm:$0xff] }
 0x330   : > { %v885_v7 = vpop.f32.mrf.mxu0 }
 0x331   : > { %6854 = vpow2.f32 %v986_v51  ;;  %v992_v8 = vmul.f32 1.442695, %v5285_v52  ;;  %v5284_v10 = vclamps-f32 %v885_v7, 5.0 }
 0x333   : > { %6856 = vpow2.f32 %v992_v8  ;;  %v990_v12 = vmul.f32 1.442695, %v5284_v10  ;;  %v6155_v16 = vpop.f32.mrf.mxu0  ;;  %v7689_v8 = vld [vmem:[%s7683_s21] sm:$0xff] }
 0x334   : > { %v5287_v19 = vclamps-f32 %v6155_v16, 5.0 }
 0x335   : > { %6858 = vpow2.f32 %v990_v12  ;;  %v895_v20 = vpop.f32.mrf.mxu0 }
 0x336   : > { %v996_v23 = vmul.f32 1.442695, %v5287_v19  ;;  %v5286_v24 = vclamps-f32 %v895_v20, 5.0 }
 0x337   : > { %v6158_v31 = vpop.f32.mrf.mxu0 }
 0x338   : > { %v994_v36 = vmul.f32 1.442695, %v5286_v24  ;;  %v5289_v39 = vclamps-f32 %v6158_v31, 5.0  ;;  %6860 = vpow2.f32 %v996_v23 }
 0x339   : > { %v905_v40 = vpop.f32.mrf.mxu0 }
 0x33a   : > { %6862 = vpow2.f32 %v994_v36  ;;  %v1000_v43 = vmul.f32 1.442695, %v5289_v39  ;;  %v5288_v44 = vclamps-f32 %v905_v40, 5.0  ;;  %v7694_v40 = vld [vmem:[%s7683_s21 + $0x18] sm:$0xff] }
 0x33b   : > { %v6161_v48 = vpop.f32.mrf.mxu0 }
 0x33c   : > { %v6853_v51 = vpop.eup %6852  ;;  %v998_v52 = vmul.f32 1.442695, %v5288_v44  ;;  %v5291_v7 = vclamps-f32 %v6161_v48, 5.0  ;;  %6864 = vpow2.f32 %v1000_v43  ;;  %v7697_v44 = vld [vmem:[%s7683_s21 + $0x10] sm:$0xff] }
 0x33d   : > { %v915_v10 = vpop.f32.mrf.mxu0  ;;  %v1019_v12 = vmul.f32 %v6853_v51, %v7686_v47 }
 0x33e   : > { %v6855_v16 = vpop.eup %6854  ;;  %6866 = vpow2.f32 %v998_v52  ;;  %v1004_v19 = vmul.f32 1.442695, %v5291_v7  ;;  %v5290_v20 = vclamps-f32 %v915_v10, 5.0 }
 0x33f   : > { %v6164_v23 = vpop.f32.mrf.mxu0  ;;  %1229 = vadd.xlane.f32.xlu1 %v1019_v12  ;;  %v1018_v24 = vmul.f32 %v6855_v16, %v7689_v8 }
 0x340   : > { %v6857_v31 = vpop.eup %6856  ;;  %v1002_v36 = vmul.f32 1.442695, %v5290_v20  ;;  %v5293_v39 = vclamps-f32 %v6164_v23, 5.0  ;;  %6868 = vpow2.f32 %v1004_v19 }
 0x341   : > { %v925_v43 = vpop.f32.mrf.mxu0  ;;  %1227 = vadd.xlane.f32.xlu0 %v1018_v24  ;;  %6203 = vmatprep.mubr.f32.mxu1 %v1018_v24  ;;  %v1021_v10 = vmul.f32 %v6857_v31, %v7694_v40  ;;  %v7704_v24 = vld [vmem:[%s7683_s21 + $0x20] sm:$0xff] }
 0x342   : > { %v6859_v48 = vpop.eup %6858  ;;  %6870 = vpow2.f32 %v1002_v36  ;;  %v1008_v51 = vmul.f32 1.442695, %v5293_v39  ;;  %v5292_v52 = vclamps-f32 %v925_v43, 5.0  ;;  %6204 = vmatmul.mubr.f32.vlgmr.msra.gmra.mxu1 %v1019_v12  ;;  %v7707_v39 = vld [vmem:[%s7683_s21 + $0x28] sm:$0xff] }
 0x343   : > { %v6167_v7 = vpop.f32.mrf.mxu0  ;;  %6228 = vmatpush3.msra.mxu1 %v7637_v15  ;;  %v1020_v16 = vmul.f32 %v6859_v48, %v7697_v44 }
 0x344   : > { %v1006_v20 = vmul.f32 1.442695, %v5292_v52  ;;  %v5295_v23 = vclamps-f32 %v6167_v7, 5.0  ;;  %6309 = vmatprep.subr.mxu1 %v7616_v9  ;;  %6872 = vpow2.f32 %v1008_v51 }
 0x345   : > { %v935_v19 = vpop.f32.mrf.mxu0  ;;  %1233 = vadd.xlane.f32.xlu0 %v1021_v10  ;;  %6206 = vmatprep.mubr.f32.mxu1 %v1020_v16  ;;  %v6861_v12 = vpop.eup %6860 }
 0x346   : > { %6874 = vpow2.f32 %v1006_v20  ;;  %v1012_v36 = vmul.f32 1.442695, %v5295_v23  ;;  %v5294_v15 = vclamps-f32 %v935_v19, 5.0  ;;  %6207 = vmatmul.mubr.f32.gmra.mxu1 %v1021_v10  ;;  %v1023_v33 = vmul.f32 %v6861_v12, %v7707_v39  ;;  %v7715_v19 = vld [vmem:[%s7683_s21 + $0x38] sm:$0xff] }
 0x347   : > { %v6863_v31 = vpop.eup %6862  ;;  %v6170_v43 = vpop.f32.mrf.mxu0 }
 0x348   : > { %v1010_v48 = vmul.f32 1.442695, %v5294_v15  ;;  %v5297_v52 = vclamps-f32 %v6170_v43, 5.0  ;;  %v1022_v51 = vmul.f32 %v6863_v31, %v7704_v24  ;;  %6876 = vpow2.f32 %v1012_v36  ;;  %v7720_v36 = vld [vmem:[%s7683_s21 + $0x40] sm:$0xff] }
 0x349   : > { %v945_v7 = vpop.f32.mrf.mxu0  ;;  %1231 = vadd.xlane.f32.xlu0 %v1020_v16  ;;  %v6865_v20 = vpop.eup %6864 }
 0x34a   : > { %6878 = vpow2.f32 %v1010_v48  ;;  %v1016_v10 = vmul.f32 1.442695, %v5297_v52  ;;  %v5296_v23 = vclamps-f32 %v945_v7, 5.0  ;;  %1235 = vadd.xlane.f32.xlu1 %v1022_v51  ;;  %6209 = vmatprep.mubr.f32.mxu1 %v1022_v51  ;;  %v1025_v12 = vmul.f32 %v6865_v20, %v7715_v19  ;;  %v7723_v48 = vld [vmem:[%s7683_s21 + $0x48] sm:$0xff]  ;;  %v7728_v7 = vld [vmem:[%s7683_s21 + $0x50] sm:$0xff] }
 0x34b   : > { %v6867_v15 = vpop.eup %6866  ;;  %6210 = vmatmul.mubr.f32.gmra.mxu1 %v1023_v33 }
 0x34c   : > { %v1014_v31 = vmul.f32 1.442695, %v5296_v23  ;;  %v1024_v16 = vmul.f32 %v6867_v15, %v7712_v29  ;;  %6880 = vpow2.f32 %v1016_v10  ;;  %v7731_v10 = vld [vmem:[%s7683_s21 + $0x58] sm:$0xff] }
 0x34d   : > { %1237 = vadd.xlane.f32.xlu0 %v1023_v33  ;;  %v6869_v43 = vpop.eup %6868 }
 0x34e   : > { %6882 = vpow2.f32 %v1014_v31  ;;  %1239 = vadd.xlane.f32.xlu1 %v1024_v16  ;;  %6212 = vmatprep.mubr.f32.mxu1 %v1024_v16  ;;  %v1027_v33 = vmul.f32 %v6869_v43, %v7723_v48  ;;  %v7736_v16 = vld [vmem:[%s7683_s21 + $0x60] sm:$0xff]  ;;  %v7739_v43 = vld [vmem:[%s7683_s21 + $0x68] sm:$0xff] }
 0x34f   : > { %v6871_v52 = vpop.eup %6870  ;;  %6213 = vmatmul.mubr.f32.gmra.mxu1 %v1025_v12 }
 0x350   : > { %v1026_v51 = vmul.f32 %v6871_v52, %v7720_v36 }
 0x351   : > { %1241 = vadd.xlane.f32.xlu0 %v1025_v12  ;;  %v6873_v20 = vpop.eup %6872 }
 0x352   : > { %6215 = vmatprep.mubr.f32.mxu1 %v1026_v51  ;;  %v1029_v31 = vmul.f32 %v6873_v20, %v7731_v10 }
 0x353   : > { %v6875_v23 = vpop.eup %6874  ;;  %6216 = vmatmul.mubr.f32.gmra.mxu1 %v1027_v33 }
 0x354   : > { %v1028_v15 = vmul.f32 %v6875_v23, %v7728_v7 }
 0x355   : > { %1245 = vadd.xlane.f32.xlu0 %v1027_v33  ;;  %v6877_v12 = vpop.eup %6876  ;;  %v7747_v33 = vld [vmem:[%s7683_s21 + $0x78] sm:$0xff] }
 0x356   : > { %6218 = vmatprep.mubr.f32.mxu1 %v1028_v15  ;;  %v1031_v53 = vmul.f32 %v6877_v12, %v7739_v43  ;;  %9135 = vst [vmem:[#allocation32_spill] sm:$0xff] %v7747_v33 }
 0x357   : > { %v6879_v52 = vpop.eup %6878  ;;  %6219 = vmatmul.mubr.f32.gmra.mxu1 %v1029_v31 }
 0x358   : > { %v1030_v25 = vmul.f32 %v6879_v52, %v7736_v16 }
 0x359   : > { %1243 = vadd.xlane.f32.xlu0 %v1026_v51  ;;  %v6881_v45 = vpop.eup %6880 }
 0x35a   : > { %6221 = vmatprep.mubr.f32.mxu1 %v1030_v25  ;;  %v1033_v41 = vmul.f32 %v6881_v45, %v7747_v33 }
 0x35b   : > { %v6883_v20 = vpop.eup %6882  ;;  %6222 = vmatmul.mubr.f32.gmra.mxu1 %v1031_v53 }
 0x35c   : > { %v1032_v23 = vmul.f32 %v6883_v20, %v7744_v49 }
 0x35d   : > { %1249 = vadd.xlane.f32.xlu0 %v1029_v31 }
 0x35e   : > { %6224 = vmatprep.mubr.f32.mxu1 %v1032_v23 }
 0x35f   : > { %1874 = vrot.lane.b32.xlu1 %v7311_v58, %s7139_s16  ;;  %6225 = vmatmul.mubr.f32.gmra.mxu1 %v1033_v41 }
 0x361   : > { %1253 = vadd.xlane.f32.xlu0 %v1031_v53 }
 0x365   : > { %1251 = vadd.xlane.f32.xlu0 %v1030_v25 }
 0x369   : > { %1255 = vadd.xlane.f32.xlu0 %v1032_v23 }
 0x36c   : > { %v6287_v25 = vpop.f32.mrf.mxu0 }
 0x36d   : > { %v5347_v38 = vclamps-f32 %v6287_v25, 5.0 }
 0x36e   : > { %v1711_v45 = vpop.f32.mrf.mxu0 }
 0x36f   : > { %v1824_v26 = vmul.f32 1.442695, %v5347_v38 }
 0x370   : > { %v7807_v51 = vpop.f32.mrf.mxu0 }
 0x371   : > { %6884 = vpow2.f32 %v1824_v26 }
 0x372   : > { %v1721_v31 = vpop.f32.mrf.mxu0 }
 0x374   : > { %v6293_v52 = vpop.f32.mrf.mxu0 }
 0x376   : > { %v1731_v23 = vpop.f32.mrf.mxu0 }
 0x378   : > { %v7829_v54 = vpop.f32.mrf.mxu0 }
 0x37a   : > { %v1741_v46 = vpop.f32.mrf.mxu0 }
 0x37c   : > { %v7841_v34 = vpop.f32.mrf.mxu0 }
 0x37f   : > { %2393 = vrot.lane.b32.xlu0 %v7315_v60, %s7138_s14 }
 0x383   : > { %1247 = vadd.xlane.f32.xlu1 %v1028_v15  ;;  %1870 = vrot.lane.b32.xlu0 %v7305_v56, %s7139_s16 }
 0x387   : > { %1257 = vadd.xlane.f32.xlu1 %v1033_v41  ;;  %2389 = vrot.lane.b32.xlu0 %v7311_v58, %s7138_s14  ;;  %v7797_v41 = vpop.permute.xlu0 %1898 }
 0x38b   : > { %2385 = vrot.lane.b32.xlu0 %v7305_v56, %s7138_s14 }
 0x38f   : > { %2355 = vrot.lane.b32.xlu0 %v7303_v55, %s7140_s22 }
 0x393   : > { %2359 = vrot.lane.b32.xlu0 %v7309_v57, %s7140_s22 }
 0x397   : > { %2363 = vrot.lane.b32.xlu0 %v7313_v59, %s7140_s22 }
 0x398   : > { %1872 = vrot.lane.b32.xlu1 %v7303_v55, %s7139_s16 }
 0x39b   : > { %2367 = vrot.lane.b32.xlu0 %v7317_v61, %s7140_s22 }
 0x39c   : > { %2391 = vrot.lane.b32.xlu1 %v7309_v57, %s7138_s14 }
 0x39f   : > { %2371 = vrot.lane.b32.xlu0 %v7321_v63, %s7140_s22 }
 0x3a0   : > { %2387 = vrot.lane.b32.xlu1 %v7303_v55, %s7138_s14 }
 0x3a3   : > { %2375 = vrot.lane.b32.xlu0 %v7325_v1, %s7140_s22 }
 0x3a4   : > { %2353 = vrot.lane.b32.xlu1 %v7305_v56, %s7140_s22 }
 0x3a7   : > { %2379 = vrot.lane.b32.xlu0 %v7329_v3, %s7140_s22 }
 0x3a8   : > { %2357 = vrot.lane.b32.xlu1 %v7311_v58, %s7140_s22 }
 0x3ab   : > { %2383 = vrot.lane.b32.xlu0 %v7334_v5, %s7140_s22 }
 0x3ac   : > { %2361 = vrot.lane.b32.xlu1 %v7315_v60, %s7140_s22 }
 0x3af   : > { %3251 = vrot.lane.b32.xlu0 %v7334_v5, %s7141_s23 }
 0x3b0   : > { %2365 = vrot.lane.b32.xlu1 %v7319_v62, %s7140_s22 }
 0x3b3   : > { %3247 = vrot.lane.b32.xlu0 %v7329_v3, %s7141_s23 }
 0x3b4   : > { %2369 = vrot.lane.b32.xlu1 %v7323_v0, %s7140_s22 }
 0x3b7   : > { %3243 = vrot.lane.b32.xlu0 %v7325_v1, %s7141_s23 }
 0x3b8   : > { %2373 = vrot.lane.b32.xlu1 %v7327_v2, %s7140_s22 }
 0x3bb   : > { %2734 = vrot.lane.b32.xlu0 %v7338_v6, %s7142_s25 }
 0x3bc   : > { %2377 = vrot.lane.b32.xlu1 %v7332_v4, %s7140_s22 }
 0x3bf   : > { %3241 = vrot.lane.b32.xlu0 %v7327_v2, %s7141_s23 }
 0x3c0   : > { %2381 = vrot.lane.b32.xlu1 %v7338_v6, %s7140_s22 }
 0x3c3   : > { %2732 = vrot.lane.b32.xlu0 %v7329_v3, %s7142_s25 }
 0x3c4   : > { %3249 = vrot.lane.b32.xlu1 %v7338_v6, %s7141_s23  ;;  %v5348_v6 = vclamps-f32 %v1721_v31, 5.0  ;;  %v5346_v31 = vclamps-f32 %v1711_v45, 5.0 }
 0x3c6   : > { %v1822_v26 = vmul.f32 1.442695, %v5346_v31 }
 0x3c7   : > { %2730 = vrot.lane.b32.xlu0 %v7332_v4, %s7142_s25 }
 0x3c8   : > { %3245 = vrot.lane.b32.xlu1 %v7332_v4, %s7141_s23  ;;  %v1230_v38 = vpop.xlane.xlu1 %1229 }
 0x3ca   : > { %v1228_v53 = vpop.xlane.xlu0 %1227 }
 0x3cb   : > { %2728 = vrot.lane.b32.xlu0 %v7325_v1, %s7142_s25 }
 0x3cc   : > { %2736 = vrot.lane.b32.xlu1 %v7334_v5, %s7142_s25  ;;  %v5352_v5 = vclamps-f32 %v1741_v46, 5.0 }
 0x3ce   : > { %v1234_v15 = vpop.xlane.xlu0 %1233 }
 0x3cf   : > { %3237 = vrot.lane.b32.xlu0 %v7323_v0, %s7141_s23  ;;  %v1262_v45 = vadd.f32 1e-06, %v1234_v15 }
 0x3d0   : > { %3239 = vrot.lane.b32.xlu1 %v7321_v63, %s7141_s23 }
 0x3d2   : > { %v1232_v12 = vpop.xlane.xlu0 %1231 }
 0x3d3   : > { %2722 = vrot.lane.b32.xlu0 %v7323_v0, %s7142_s25  ;;  %v1826_v0 = vmul.f32 1.442695, %v5348_v6  ;;  %v5349_v6 = vclamps-f32 %v7807_v51, 5.0  ;;  %v1236_v46 = vpop.xlane.xlu1 %1235  ;;  %v1261_v33 = vadd.f32 1e-06, %v1232_v12 }
 0x3d4   : > { %2726 = vrot.lane.b32.xlu1 %v7327_v2, %s7142_s25  ;;  %v7847_v2 = vpop.f32.mrf.mxu0 }
 0x3d5   : > { %6886 = vpow2.f32 %v1826_v0  ;;  %v6885_v0 = vpop.eup %6884 }
 0x3d6   : > { %v7817_v20 = vpop.xlane.xlu0 %1237  ;;  %v7851_v25 = vpop.f32.mrf.mxu0 }
 0x3d7   : > { %2720 = vrot.lane.b32.xlu0 %v7317_v61, %s7142_s25  ;;  %v1264_v12 = vadd.f32 1e-06, %v7817_v20 }
 0x3d8   : > { %2724 = vrot.lane.b32.xlu1 %v7321_v63, %s7142_s25  ;;  %v1761_v63 = vpop.f32.mrf.mxu0 }
 0x3d9   : > { %v5356_v56 = vclamps-f32 %v1761_v63, 5.0  ;;  %v1828_v63 = vmul.f32 1.442695, %v5349_v6 }
 0x3da   : > { %v7823_v37 = vpop.xlane.xlu0 %1241 }
 0x3db   : > { %3233 = vrot.lane.b32.xlu0 %v7319_v62, %s7141_s23 }
 0x3dc   : > { %3235 = vrot.lane.b32.xlu1 %v7317_v61, %s7141_s23  ;;  %v1834_v61 = vmul.f32 1.442695, %v5352_v5  ;;  %v5351_v5 = vclamps-f32 %v6293_v52, 5.0 }
 0x3de   : > { %v7831_v50 = vpop.xlane.xlu0 %1245  ;;  %v1832_v51 = vmul.f32 1.442695, %v5351_v5 }
 0x3df   : > { %2714 = vrot.lane.b32.xlu0 %v7315_v60, %s7142_s25  ;;  %v1260_v60 = vadd.f32 1e-06, %v1230_v38 }
 0x3e0   : > { %2718 = vrot.lane.b32.xlu1 %v7319_v62, %s7142_s25  ;;  %v5350_v62 = vclamps-f32 %v1731_v23, 5.0 }
 0x3e2   : > { %v7837_v42 = vpop.xlane.xlu0 %1243  ;;  %v1830_v1 = vmul.f32 1.442695, %v5350_v62  ;;  %v1842_v62 = vmul.f32 1.442695, %v5356_v56  ;;  %v5353_v56 = vclamps-f32 %v7829_v54, 5.0 }
 0x3e3   : > { %v1266_v54 = vadd.f32 1e-06, %v7823_v37  ;;  %v1268_v37 = vadd.f32 1e-06, %v7831_v50 }
 0x3e4   : > { %2716 = vrot.lane.b32.xlu1 %v7313_v59, %s7142_s25  ;;  %6888 = vpow2.f32 %v1830_v1  ;;  %v1836_v38 = vmul.f32 1.442695, %v5353_v56 }
 0x3e5   : > { %6890 = vpow2.f32 %v1834_v61  ;;  %v1263_v61 = vadd.f32 1e-06, %v1236_v46  ;;  %v1267_v46 = vadd.f32 1e-06, %v7837_v42 }
 0x3e6   : > { %v7843_v30 = vpop.xlane.xlu0 %1249 }
 0x3e8   : > { %3231 = vrot.lane.b32.xlu1 %v7313_v59, %s7141_s23  ;;  %v1259_v59 = vadd.f32 1e-06, %v1228_v53  ;;  %v6887_v53 = vpop.eup %6886 }
 0x3e9   : > { %v7871_v52 = vmul.f32 %v6887_v53, %v7697_v44 }
 0x3ea   : > { %v7849_v4 = vpop.xlane.xlu0 %1253  ;;  %6892 = vrcp.f32 %v1259_v59  ;;  %v7863_v59 = vmul.f32 %v6885_v0, %v7686_v47 }
 0x3eb   : > { %6894 = vrcp.f32 %v1260_v60  ;;  %v1240_v60 = vpop.xlane.xlu1 %1239 }
 0x3ec   : > { %6896 = vpow2.f32 %v1822_v26 }
 0x3ed   : > { %6898 = vrcp.f32 %v1261_v33  ;;  %v1265_v33 = vadd.f32 1e-06, %v1240_v60 }
 0x3ee   : > { %v7853_v3 = vpop.xlane.xlu0 %1251  ;;  %6900 = vpow2.f32 %v1842_v62 }
 0x3ef   : > { %6902 = vrcp.f32 %v1262_v45 }
 0x3f0   : > { %6904 = vpow2.f32 %v1828_v63 }
 0x3f1   : > { %6906 = vrcp.f32 %v1263_v61  ;;  %v6889_v47 = vpop.eup %6888 }
 0x3f2   : > { %v7855_v55 = vpop.xlane.xlu0 %1255  ;;  %6908 = vpow2.f32 %v1832_v51  ;;  %v6891_v20 = vpop.eup %6890  ;;  %v7880_v62 = vmul.f32 %v6889_v47, %v7704_v24  ;;  %v5354_v24 = vclamps-f32 %v7847_v2, 5.0 }
 0x3f3   : > { %6910 = vrcp.f32 %v1264_v12  ;;  %v7888_v51 = vpop.permute.xlu1 %1874  ;;  %v7892_v50 = vmul.f32 %v6891_v20, %v7712_v29 }
 0x3f4   : > { %6912 = vrcp.f32 %v1265_v33  ;;  %v1838_v29 = vmul.f32 1.442695, %v5354_v24 }
 0x3f5   : > { %6914 = vpow2.f32 %v1836_v38 }
 0x3f6   : > { %v2394_v23 = vpop.permute.xlu0 %2393  ;;  %6916 = vrcp.f32 %v1266_v54 }
 0x3f7   : > { %6413 = vmatprep.subr.msk.mxu0 %vm744_vm2, %v2394_v23  ;;  %v6893_v6 = vpop.eup %6892  ;;  %6918 = vrcp.f32 %v1267_v46 }
 0x3f8   : > { %6414 = vmatpush3.xpose.msk.msra.mxu0 %vm744_vm2, %v2394_v23  ;;  %v5355_v23 = vclamps-f32 %v7841_v34, 5.0  ;;  %v6895_v0 = vpop.eup %6894  ;;  %6920 = vrcp.f32 %v1268_v37 }
 0x3f9   : > { %v6897_v34 = vpop.eup %6896 }
 0x3fa   : > { %v7860_v1 = vpop.permute.xlu0 %1870  ;;  %v6899_v42 = vpop.eup %6898  ;;  %v1840_v53 = vmul.f32 1.442695, %v5355_v23  ;;  %v7900_v47 = vmul.f32 %v6897_v34, %v7689_v8  ;;  %v5357_v8 = vclamps-f32 %v7851_v25, 5.0  ;;  %v1271_v23 = vadd.f32 1e-06, %v7853_v3 }
 0x3fb   : > { %v6901_v60 = vpop.eup %6900 }
 0x3fc   : > { %v6903_v33 = vpop.eup %6902  ;;  %6922 = vpow2.f32 %v1840_v53  ;;  %v7907_v20 = vmul.f32 %v6901_v60, %v7728_v7  ;;  %v1273_v60 = vadd.f32 1e-06, %v7855_v55 }
 0x3fd   : > { %v6905_v38 = vpop.eup %6904 }
 0x3fe   : > { %2065 = vadd.xlane.f32.xlu0 %v7863_v59  ;;  %v7868_v15 = vpop.permute.xlu0 %2389  ;;  %v7918_v7 = vmul.f32 %v6905_v38, %v7694_v40 }
 0x402   : > { %v6205_v31 = vpop.f32.mrf.mxu1  ;;  %2067 = vadd.xlane.f32.xlu0 %v7871_v52  ;;  %v7875_v26 = vpop.permute.xlu0 %2385 }
 0x403   : > { %v1278_v45 = vmul.f32 %v6895_v0, %v6205_v31  ;;  %v1270_v0 = vadd.f32 1e-06, %v7843_v30 }
 0x404   : > { %v1148_v44 = vpop.f32.mrf.mxu1 }
 0x405   : > { %v1276_v5 = vmul.f32 %v6893_v6, %v1148_v44  ;;  %v6907_v6 = vpop.eup %6906 }
 0x406   : > { %v6208_v63 = vpop.f32.mrf.mxu1  ;;  %2071 = vadd.xlane.f32.xlu0 %v7880_v62  ;;  %v7884_v61 = vpop.permute.xlu0 %2355 }
 0x407   : > { %6229 = vmatprep.mubr.msk.f32.mxu1 %vm744_vm2, %v1276_v5  ;;  %v1282_v54 = vmul.f32 %v6903_v33, %v6208_v63  ;;  %v1844_v63 = vmul.f32 1.442695, %v5357_v8 }
 0x408   : > { %v1158_v56 = vpop.f32.mrf.mxu1  ;;  %6230 = vmatmul.mubr.msk.f32.vlgmr.msra.gmra.mxu1 %vm744_vm2, %v1278_v45 }
 0x409   : > { %v1280_v12 = vmul.f32 %v6899_v42, %v1158_v56  ;;  %6310 = vmatpush3.msra.mxu1 %v7616_v9  ;;  %v1272_v42 = vadd.f32 1e-06, %v7849_v4 }
 0x40a   : > { %6311 = vmatprep.subr.mxu1 %v7797_v41  ;;  %2075 = vadd.xlane.f32.xlu0 %v7892_v50  ;;  %v7897_v2 = vpop.permute.xlu0 %2359 }
 0x40b   : > { %v6211_v31 = vpop.f32.mrf.mxu1  ;;  %6312 = vmatpush3.msra.mxu1 %v7797_v41  ;;  %6232 = vmatprep.mubr.msk.f32.mxu1 %vm744_vm2, %v1280_v12  ;;  %v6909_v41 = vpop.eup %6908 }
 0x40c   : > { %v1248_v9 = vpop.xlane.xlu1 %1247  ;;  %2063 = vadd.xlane.f32.xlu1 %v7900_v47  ;;  %6313 = vmatprep.subr.mxu1 %v7622_v11  ;;  %v6911_v25 = vpop.eup %6910 }
 0x40d   : > { %v1269_v46 = vadd.f32 1e-06, %v1248_v9  ;;  %v1168_v44 = vpop.f32.mrf.mxu1  ;;  %6233 = vmatmul.mubr.msk.f32.gmra.mxu1 %vm744_vm2, %v1282_v54  ;;  %v1286_v45 = vmul.f32 %v6911_v25, %v6211_v31 }
 0x40e   : > { %v1284_v5 = vmul.f32 %v6907_v6, %v1168_v44  ;;  %6314 = vmatpush3.msra.mxu1 %v7622_v11  ;;  %2083 = vadd.xlane.f32.xlu0 %v7907_v20  ;;  %v7915_v37 = vpop.permute.xlu0 %2363  ;;  %v6913_v11 = vpop.eup %6912 }
 0x40f   : > { %6924 = vrcp.f32 %v1269_v46  ;;  %6315 = vmatprep.subr.mxu1 %v7654_v27  ;;  %v6214_v3 = vpop.f32.mrf.mxu1  ;;  %v6915_v34 = vpop.eup %6914 }
 0x410   : > { %6926 = vpow2.f32 %v1838_v29  ;;  %6316 = vmatpush3.msra.mxu1 %v7654_v27  ;;  %v1258_v30 = vpop.xlane.xlu1 %1257  ;;  %2069 = vadd.xlane.f32.xlu1 %v7918_v7  ;;  %v7930_v27 = vmul.f32 %v6909_v41, %v7707_v39  ;;  %v6917_v56 = vpop.eup %6916  ;;  %v7945_v31 = vmul.f32 %v6915_v34, %v7715_v19 }
 0x411   : > { %6928 = vrcp.f32 %v1271_v23  ;;  %6235 = vmatprep.mubr.msk.f32.mxu1 %vm744_vm2, %v1284_v5  ;;  %6317 = vmatprep.subr.mxu1 %v7628_v13  ;;  %v1178_v40 = vpop.f32.mrf.mxu1  ;;  %v1290_v33 = vmul.f32 %v6917_v56, %v6214_v3  ;;  %v6919_v4 = vpop.eup %6918  ;;  %v1274_v54 = vadd.f32 1e-06, %v1258_v30 }
 0x412   : > { %6930 = vrcp.f32 %v1270_v0  ;;  %v1288_v53 = vmul.f32 %v6913_v11, %v1178_v40  ;;  %6236 = vmatmul.mubr.msk.f32.gmra.mxu1 %vm744_vm2, %v1286_v45  ;;  %v7927_v24 = vpop.permute.xlu0 %2367  ;;  %v6921_v29 = vpop.eup %6920 }
 0x413   : > { %6318 = vmatpush3.msra.mxu1 %v7628_v13  ;;  %v6217_v12 = vpop.f32.mrf.mxu1  ;;  %6932 = vpow2.f32 %v1844_v63  ;;  %v6923_v8 = vpop.eup %6922 }
 0x414   : > { %6319 = vmatprep.subr.mxu1 %v7632_v14  ;;  %v7935_v38 = vpop.permute.xlu1 %1872  ;;  %2073 = vadd.xlane.f32.xlu1 %v7930_v27  ;;  %6934 = vrcp.f32 %v1272_v42  ;;  %v1294_v9 = vmul.f32 %v6921_v29, %v6217_v12  ;;  %v7961_v44 = vmul.f32 %v6923_v8, %v7723_v48  ;;  %v7963_v0 = vpop.f32.mrf.mxu0 }
 0x415   : > { %6320 = vmatpush3.msra.mxu1 %v7632_v14  ;;  %6238 = vmatprep.mubr.msk.f32.mxu1 %vm744_vm2, %v1288_v53  ;;  %v1188_v39 = vpop.f32.mrf.mxu1  ;;  %6936 = vrcp.f32 %v1273_v60 }
 0x416   : > { %6321 = vmatprep.subr.mxu1 %v7658_v28  ;;  %v1292_v55 = vmul.f32 %v6919_v4, %v1188_v39  ;;  %6239 = vmatmul.mubr.msk.f32.gmra.mxu1 %vm744_vm2, %v1290_v33  ;;  %v7942_v13 = vpop.permute.xlu0 %2371  ;;  %6938 = vrcp.f32 %v1274_v54  ;;  %v1771_v40 = vpop.f32.mrf.mxu0 }
 0x417   : > { %6322 = vmatpush3.msra.mxu1 %v7658_v28  ;;  %v6220_v14 = vpop.f32.mrf.mxu1 }
 0x418   : > { %6323 = vmatprep.subr.mxu1 %v7643_v17  ;;  %v2392_v6 = vpop.permute.xlu1 %2391  ;;  %2077 = vadd.xlane.f32.xlu1 %v7945_v31  ;;  %v6308_v12 = vpop.f32.mrf.mxu0 }
 0x419   : > { %6324 = vmatpush3.msra.mxu1 %v7643_v17  ;;  %6241 = vmatprep.mubr.msk.f32.mxu1 %vm744_vm2, %v1292_v55  ;;  %v1198_v23 = vpop.f32.mrf.mxu1  ;;  %v5358_v55 = vclamps-f32 %v1771_v40, 5.0  ;;  %v9139_v40 = vld [vmem:[#allocation18_spill] sm:$0xff] }
 0x41a   : > { %6325 = vmatprep.subr.mxu1 %v7645_v18  ;;  %6242 = vmatmul.mubr.msk.f32.gmra.mxu1 %vm744_vm2, %v1294_v9  ;;  %v7954_v19 = vpop.permute.xlu0 %2375 }
 0x41b   : > { %6326 = vmatpush3.msra.mxu1 %v7645_v18  ;;  %6415 = vmatprep.subr.msk.mxu0 %vm744_vm2, %v2392_v6  ;;  %v6223_v28 = vpop.f32.mrf.mxu1 }
 0x41c   : > { %v6925_v46 = vpop.eup %6924  ;;  %6327 = vmatprep.subr.mxu1 %v7666_v32  ;;  %6416 = vmatpush3.xpose.msk.msra.mxu0 %vm744_vm2, %v2392_v6  ;;  %v2388_v17 = vpop.permute.xlu1 %2387 }
 0x41d   : > { %v6927_v41 = vpop.eup %6926  ;;  %v1296_v5 = vmul.f32 %v6925_v46, %v1198_v23  ;;  %6328 = vmatpush3.msra.mxu1 %v7666_v32  ;;  %6417 = vmatprep.subr.msk.mxu0 %vm744_vm2, %v7868_v15  ;;  %v1208_v18 = vpop.f32.mrf.mxu1 }
 0x41e   : > { %v6929_v25 = vpop.eup %6928  ;;  %2081 = vadd.xlane.f32.xlu1 %v7961_v44  ;;  %6329 = vmatprep.subr.mxu1 %v7672_v35  ;;  %v7970_v3 = vpop.permute.xlu0 %2379  ;;  %v7978_v63 = vmul.f32 %v6927_v41, %v7720_v36 }
 0x41f   : > { %v6931_v45 = vpop.eup %6930  ;;  %v1300_v48 = vmul.f32 %v6929_v25, %v1208_v18  ;;  %6330 = vmatpush3.msra.mxu1 %v7672_v35  ;;  %v6226_v30 = vpop.f32.mrf.mxu1  ;;  %6244 = vmatprep.mubr.msk.f32.mxu1 %vm744_vm2, %v1296_v5 }
 0x420   : > { %v1298_v11 = vmul.f32 %v6931_v45, %v6220_v14  ;;  %6331 = vmatprep.subr.mxu1 %v7647_v21  ;;  %6418 = vmatpush3.xpose.msk.msra.mxu0 %vm744_vm2, %v7868_v15  ;;  %v2354_v32 = vpop.permute.xlu1 %2353  ;;  %v6933_v34 = vpop.eup %6932  ;;  %v5359_v14 = vclamps-f32 %v7963_v0, 5.0 }
 0x421   : > { %6332 = vmatpush3.msra.mxu1 %v7647_v21  ;;  %6419 = vmatprep.subr.msk.mxu0 %vm744_vm2, %v2388_v17  ;;  %v1218_v35 = vpop.f32.mrf.mxu1  ;;  %v6935_v53 = vpop.eup %6934  ;;  %v7993_v60 = vmul.f32 %v6933_v34, %v7731_v10  ;;  %v2143_v10 = vld [vmem:[%s9057_s2 + $0x38] sm:$0xff]  ;;  %v9140_v34 = vld [vmem:[#allocation20_spill] sm:$0xff] }
 0x422   : > { %2079 = vadd.xlane.f32.xlu1 %v7978_v63  ;;  %6245 = vmatmul.mubr.msk.f32.gmra.mxu1 %vm744_vm2, %v1298_v11  ;;  %v7984_v42 = vpop.permute.xlu0 %2383  ;;  %v6937_v36 = vpop.eup %6936  ;;  %v1302_v15 = vmul.f32 %v6935_v53, %v6223_v28  ;;  %v9143_v53 = vld [vmem:[#allocation26_spill] sm:$0xff] }
 0x423   : > { %6333 = vmatprep.subr.mxu1 %v7649_v22  ;;  %6247 = vmatprep.mubr.msk.f32.mxu1 %vm744_vm2, %v1300_v48  ;;  %v1304_v56 = vmul.f32 %v6937_v36, %v1218_v35  ;;  %v9137_v48 = vld [vmem:[#allocation21_spill] sm:$0xff]  ;;  %v9141_v35 = vld [vmem:[#allocation22_spill] sm:$0xff]  ;;  %v9144_v36 = vld [vmem:[#allocation28_spill] sm:$0xff] }
 0x424   : > { %6334 = vmatpush3.msra.mxu1 %v7649_v22  ;;  %6423 = vmatprep.mubr.msk.f32.mxu0 %vm744_vm2, %v2354_v32  ;;  %v2358_v21 = vpop.permute.xlu1 %2357  ;;  %v6939_v22 = vpop.eup %6938  ;;  %v9138_v32 = vld [vmem:[#allocation19_spill] sm:$0xff] }
 0x425   : > { %6335 = vmatprep.subr.mxu1 %v7888_v51  ;;  %6420 = vmatpush3.xpose.msk.msra.mxu0 %vm744_vm2, %v2388_v17  ;;  %v1306_v39 = vmul.f32 %v6939_v22, %v6226_v30 }
 0x426   : > { %6336 = vmatpush3.msra.mxu1 %v7888_v51  ;;  %6421 = vmatprep.subr.msk.mxu0 %vm744_vm2, %v7875_v26  ;;  %v3252_v33 = vpop.permute.xlu0 %3251  ;;  %v1781_v51 = vpop.f32.mrf.mxu0 }
 0x427   : > { %2085 = vadd.xlane.f32.xlu1 %v7993_v60  ;;  %6248 = vmatmul.mubr.msk.f32.gmra.mxu1 %vm744_vm2, %v1302_v15  ;;  %v5360_v29 = vclamps-f32 %v1781_v51, 5.0  ;;  %v9146_v15 = vld [vmem:[#allocation23_spill] sm:$0xff] }
 0x428   : > { %6337 = vmatprep.subr.mxu1 %v7935_v38  ;;  %2712 = vrot.lane.b32.xlu0 %v7309_v57, %s7142_s25  ;;  %v2362_v4 = vpop.permute.xlu1 %2361 }
 0x429   : > { %6250 = vmatprep.mubr.msk.f32.mxu1 %vm744_vm2, %v1304_v56  ;;  %6338 = vmatpush3.msra.mxu1 %v7935_v38  ;;  %v1850_v6 = vmul.f32 1.442695, %v5360_v29  ;;  %v9147_v56 = vld [vmem:[#allocation25_spill] sm:$0xff]  ;;  %v9151_v29 = vld [vmem:[#allocation3_spill] sm:$0xff] }
 0x42a   : > { %6339 = vmatprep.subr.mxu1 %v7860_v1  ;;  %6422 = vmatpush3.xpose.msk.msra.mxu0 %vm744_vm2, %v7875_v26  ;;  %v8011_v54 = vpop.permute.xlu0 %3247 }
 0x42b   : > { %6340 = vmatpush3.msra.mxu1 %v7860_v1  ;;  %6529 = vmatprep.subr.msk.mxu0 %vm744_vm2, %v3252_v33  ;;  %v1846_v1 = vmul.f32 1.442695, %v5358_v55  ;;  %v8169_v55 = vld [vmem:[%s9058_s3 + $0x2] ss:$0 sm:$0xff] }
 0x42c   : > { %6251 = vmatmul.mubr.msk.f32.gmra.mxu1 %vm744_vm2, %v1306_v39  ;;  %v2366_v38 = vpop.permute.xlu1 %2365  ;;  %6365 = vmatprep.subr.mxu1 %v2143_v10 }
 0x42d   : > { %6341 = vmatprep.mubr.f32.mxu1 %v7900_v47  ;;  %6424 = vmatmul.mubr.msk.f32.vlgmr.msra.gmra.mxu0 %vm744_vm2, %v7884_v61  ;;  %v1848_v47 = vmul.f32 1.442695, %v5359_v14  ;;  %v5361_v61 = vclamps-f32 %v6308_v12, 5.0  ;;  %6940 = vpow2.f32 %v1846_v1  ;;  %v9149_v12 = vld [vmem:[#allocation27_spill] sm:$0xff]  ;;  %v661_v14 = vmul.f32 %v8169_v55, %v9151_v29  ;;  %v8178_v1 = vld [vmem:[%s9058_s3 + $0x1] ss:$0 sm:$0xff] }
 0x42e   : > { %6426 = vmatprep.mubr.msk.f32.mxu0 %vm744_vm2, %v2358_v21  ;;  %6530 = vmatpush3.xpose.msk.msra.mxu0 %vm744_vm2, %v3252_v33  ;;  %v8022_v26 = vpop.permute.xlu0 %3243  ;;  %6942 = vpow2.f32 %v1850_v6  ;;  %v9145_v21 = vld [vmem:[#allocation30_spill] sm:$0xff]  ;;  %v9150_v33 = vld [vmem:[#allocation31_spill] sm:$0xff]  ;;  %v9152_v6 = vld [vmem:[#allocation5_spill] sm:$0xff] }
 0x42f   : > { %6944 = vpow2.f32 %v1848_v47  ;;  %v663_v47 = vmul.f32 %v8169_v55, %v9152_v6 }
 0x430   : > { %6342 = vmatmul.mubr.f32.vlgmr.msra.gmra.mxu1 %v7863_v59  ;;  %v2370_v9 = vpop.permute.xlu1 %2369  ;;  %v1852_v59 = vmul.f32 1.442695, %v5361_v61 }
 0x431   : > { %6344 = vmatprep.mubr.f32.mxu1 %v7871_v52  ;;  %6427 = vmatmul.mubr.msk.f32.gmra.mxu0 %vm744_vm2, %v7897_v2 }
 0x432   : > { %6429 = vmatprep.mubr.msk.f32.mxu0 %vm744_vm2, %v2362_v4  ;;  %v8029_v8 = vpop.permute.xlu0 %2734  ;;  %6366 = vmatpush3.msra.mxu1 %v2143_v10  ;;  %6946 = vpow2.f32 %v1852_v59 }
 0x434   : > { %6345 = vmatmul.mubr.f32.gmra.mxu1 %v7918_v7  ;;  %v2374_v23 = vpop.permute.xlu1 %2373 }
 0x435   : > { %6347 = vmatprep.mubr.f32.mxu1 %v7880_v62  ;;  %6430 = vmatmul.mubr.msk.f32.gmra.mxu0 %vm744_vm2, %v7915_v37 }
 0x436   : > { %6432 = vmatprep.mubr.msk.f32.mxu0 %vm744_vm2, %v2366_v38  ;;  %v3242_v52 = vpop.permute.xlu0 %3241 }
 0x438   : > { %6348 = vmatmul.mubr.f32.gmra.mxu1 %v7930_v27  ;;  %2710 = vrot.lane.b32.xlu1 %v7311_v58, %s7142_s25  ;;  %v2378_v2 = vpop.permute.xlu1 %2377 }
 0x439   : > { %6350 = vmatprep.mubr.f32.mxu1 %v7892_v50  ;;  %6433 = vmatmul.mubr.msk.f32.gmra.mxu0 %vm744_vm2, %v7927_v24 }
 0x43a   : > { %6435 = vmatprep.mubr.msk.f32.mxu0 %vm744_vm2, %v2370_v9  ;;  %v8043_v62 = vpop.permute.xlu0 %2732  ;;  %v6941_v7 = vpop.eup %6940 }
 0x43b   : > { %v6943_v27 = vpop.eup %6942 }
 0x43c   : > { %6351 = vmatmul.mubr.f32.gmra.mxu1 %v7945_v31  ;;  %v2382_v37 = vpop.permute.xlu1 %2381  ;;  %v6945_v31 = vpop.eup %6944 }
 0x43d   : > { %6353 = vmatprep.mubr.f32.mxu1 %v7978_v63  ;;  %6436 = vmatmul.mubr.msk.f32.gmra.mxu0 %vm744_vm2, %v7942_v13  ;;  %v1866_v13 = vmul.f32 %v6941_v7, %v7736_v16  ;;  %v1867_v28 = vmul.f32 %v6945_v31, %v7739_v43  ;;  %v9154_v7 = vld [vmem:[#allocation7_spill] sm:$0xff] }
 0x43e   : > { %6438 = vmatprep.mubr.msk.f32.mxu0 %vm744_vm2, %v2374_v23  ;;  %v8054_v24 = vpop.permute.xlu0 %2730 }
 0x43f   : > { %v6947_v46 = vpop.eup %6946 }
 0x440   : > { %6354 = vmatmul.mubr.f32.gmra.mxu1 %v7961_v44  ;;  %v3250_v50 = vpop.permute.xlu1 %3249 }
 0x441   : > { %6356 = vmatprep.mubr.f32.mxu1 %v7907_v20  ;;  %6439 = vmatmul.mubr.msk.f32.gmra.mxu0 %vm744_vm2, %v7954_v19  ;;  %v1868_v19 = vmul.f32 %v6943_v27, %v7744_v49  ;;  %v9136_v49 = vld [vmem:[#allocation32_spill] sm:$0xff] }
 0x442   : > { %6441 = vmatprep.mubr.msk.f32.mxu0 %vm744_vm2, %v2378_v2  ;;  %6531 = vmatprep.subr.msk.mxu0 %vm744_vm2, %v3250_v50  ;;  %v8068_v16 = vpop.permute.xlu0 %2728  ;;  %v1869_v44 = vmul.f32 %v6947_v46, %v9136_v49 }
 0x443   : > { %6532 = vmatpush3.xpose.msk.msra.mxu0 %vm744_vm2, %v3250_v50  ;;  %v665_v50 = vmul.f32 %v8169_v55, %v9154_v7 }
 0x444   : > { %6357 = vmatmul.mubr.f32.gmra.mxu1 %v7993_v60  ;;  %6533 = vmatprep.subr.msk.mxu0 %vm744_vm2, %v8011_v54  ;;  %v3246_v20 = vpop.permute.xlu1 %3245  ;;  %v9148_v60 = vld [vmem:[#allocation29_spill] sm:$0xff] }
 0x445   : > { %6359 = vmatprep.mubr.f32.mxu1 %v1866_v13  ;;  %6442 = vmatmul.mubr.msk.f32.gmra.mxu0 %vm744_vm2, %v7970_v3  ;;  %v685_v49 = vadd.f32 %v8178_v1, %v665_v50 }
 0x446   : > { %6444 = vmatprep.mubr.msk.f32.mxu0 %vm744_vm2, %v2382_v37  ;;  %v3238_v41 = vpop.permute.xlu0 %3237  ;;  %v683_v37 = vadd.f32 %v8178_v1, %v663_v47 }
 0x447   : > { %2091 = vadd.xlane.f32.xlu0 %v1868_v19  ;;  %6534 = vmatpush3.xpose.msk.msra.mxu0 %vm744_vm2, %v8011_v54 }
 0x448   : > { %6360 = vmatmul.mubr.f32.gmra.mxu1 %v1867_v28  ;;  %6535 = vmatprep.subr.msk.mxu0 %vm744_vm2, %v3246_v20  ;;  %v8073_v17 = vpop.permute.xlu1 %2736 }
 0x449   : > { %6362 = vmatprep.mubr.f32.mxu1 %v1868_v19  ;;  %6445 = vmatmul.mubr.msk.f32.gmra.mxu0 %vm744_vm2, %v7984_v42  ;;  %v9142_v42 = vld [vmem:[#allocation24_spill] sm:$0xff] }
 0x44a   : > { %6447 = vmatprep.subr.mxu1 %v8073_v17  ;;  %v8087_v5 = vpop.permute.xlu0 %2722 }
 0x44b   : > { %6536 = vmatpush3.xpose.msk.msra.mxu0 %vm744_vm2, %v3246_v20 }
 0x44c   : > { %6363 = vmatmul.mubr.f32.gmra.mxu1 %v1869_v44  ;;  %6537 = vmatprep.subr.msk.mxu0 %vm744_vm2, %v8022_v26  ;;  %v3240_v43 = vpop.permute.xlu1 %3239 }
 0x44e   : > { %v8095_v3 = vpop.permute.xlu0 %2720 }
 0x44f   : > { %6538 = vmatpush3.xpose.msk.msra.mxu0 %vm744_vm2, %v8022_v26 }
 0x450   : > { %6539 = vmatprep.subr.msk.mxu0 %vm744_vm2, %v3242_v52  ;;  %v8085_v0 = vpop.permute.xlu1 %2726 }
 0x452   : > { %v3234_v30 = vpop.permute.xlu0 %3233 }
 0x453   : > { %6540 = vmatpush3.xpose.msk.msra.mxu0 %vm744_vm2, %v3242_v52 }
 0x454   : > { %6541 = vmatprep.subr.msk.mxu0 %vm744_vm2, %v3240_v43  ;;  %v8091_v18 = vpop.permute.xlu1 %2724 }
 0x456   : > { %v8156_v22 = vpop.permute.xlu0 %2714 }
 0x457   : > { %6542 = vmatpush3.xpose.msk.msra.mxu0 %vm744_vm2, %v3240_v43 }
 0x458   : > { %6543 = vmatprep.subr.msk.mxu0 %vm744_vm2, %v3238_v41  ;;  %v3236_v25 = vpop.permute.xlu1 %3235 }
 0x45b   : > { %6544 = vmatpush3.xpose.msk.msra.mxu0 %vm744_vm2, %v3238_v41 }
 0x45c   : > { %2089 = vadd.xlane.f32.xlu1 %v1867_v28  ;;  %6545 = vmatprep.subr.msk.mxu0 %vm744_vm2, %v3236_v25  ;;  %v8099_v45 = vpop.permute.xlu1 %2718  ;;  %v9156_v28 = vld [vmem:[#allocation9_spill] sm:$0xff] }
 0x45d   : > { %3229 = vrot.lane.b32.xlu0 %v9137_v48, %s7141_s23  ;;  %v667_v46 = vmul.f32 %v8169_v55, %v9156_v28 }
 0x45f   : > { %6546 = vmatpush3.xpose.msk.msra.mxu0 %vm744_vm2, %v3236_v25 }
 0x460   : > { %2087 = vadd.xlane.f32.xlu1 %v1866_v13  ;;  %6547 = vmatprep.subr.msk.mxu0 %vm744_vm2, %v3234_v30  ;;  %v8105_v11 = vpop.permute.xlu1 %2716 }
 0x461   : > { %2706 = vrot.lane.b32.xlu0 %v9138_v32, %s7142_s25 }
 0x463   : > { %6548 = vmatpush3.xpose.msk.msra.mxu0 %vm744_vm2, %v3234_v30 }
 0x464   : > { %2093 = vadd.xlane.f32.xlu1 %v1869_v44  ;;  %v3232_v63 = vpop.permute.xlu1 %3231 }
 0x465   : > { %3225 = vrot.lane.b32.xlu0 %v7311_v58, %s7141_s23  ;;  %6549 = vmatprep.subr.msk.mxu0 %vm744_vm2, %v3232_v63 }
 0x467   : > { %6550 = vmatpush3.xpose.msk.msra.mxu0 %vm744_vm2, %v3232_v63 }
 0x469   : > { %3221 = vrot.lane.b32.xlu0 %v9138_v32, %s7141_s23 }
 0x46d   : > { %3191 = vrot.lane.b32.xlu0 %v9139_v40, %s7143_s28 }
 0x471   : > { %3195 = vrot.lane.b32.xlu0 %v7309_v57, %s7143_s28 }
 0x475   : > { %2708 = vrot.lane.b32.xlu1 %v9139_v40, %s7142_s25  ;;  %3199 = vrot.lane.b32.xlu0 %v9140_v34, %s7143_s28 }
 0x479   : > { %3227 = vrot.lane.b32.xlu1 %v7309_v57, %s7141_s23  ;;  %3203 = vrot.lane.b32.xlu0 %v9141_v35, %s7143_s28 }
 0x47d   : > { %3223 = vrot.lane.b32.xlu1 %v9139_v40, %s7141_s23  ;;  %3207 = vrot.lane.b32.xlu0 %v9142_v42, %s7143_s28 }
 0x481   : > { %3189 = vrot.lane.b32.xlu1 %v9138_v32, %s7143_s28  ;;  %3211 = vrot.lane.b32.xlu0 %v9143_v53, %s7143_s28 }
 0x485   : > { %3193 = vrot.lane.b32.xlu1 %v7311_v58, %s7143_s28  ;;  %3215 = vrot.lane.b32.xlu0 %v9144_v36, %s7143_s28 }
 0x487   : > { %v2066_v4 = vpop.xlane.xlu0 %2065 }
 0x488   : > { %v2096_v7 = vadd.f32 1e-06, %v2066_v4 }
 0x489   : > { %3197 = vrot.lane.b32.xlu1 %v9137_v48, %s7143_s28  ;;  %3219 = vrot.lane.b32.xlu0 %v9145_v21, %s7143_s28 }
 0x48b   : > { %v2068_v10 = vpop.xlane.xlu0 %2067 }
 0x48d   : > { %3201 = vrot.lane.b32.xlu1 %v9146_v15, %s7143_s28  ;;  %3572 = vrot.lane.b32.xlu0 %v9145_v21, %s7144_s29 }
 0x48f   : > { %v2072_v39 = vpop.xlane.xlu0 %2071 }
 0x491   : > { %3205 = vrot.lane.b32.xlu1 %v9147_v56, %s7143_s28  ;;  %3566 = vrot.lane.b32.xlu0 %v9148_v60, %s7144_s29 }
 0x493   : > { %v8171_v38 = vpop.xlane.xlu0 %2075 }
 0x495   : > { %3209 = vrot.lane.b32.xlu1 %v9149_v12, %s7143_s28  ;;  %3562 = vrot.lane.b32.xlu0 %v9149_v12, %s7144_s29  ;;  %v2064_v51 = vpop.xlane.xlu1 %2063  ;;  %v9159_v12 = vld [vmem:[#allocation13_spill] sm:$0xff] }
 0x497   : > { %v8180_v9 = vpop.xlane.xlu0 %2083 }
 0x499   : > { %3213 = vrot.lane.b32.xlu1 %v9148_v60, %s7143_s28  ;;  %3558 = vrot.lane.b32.xlu0 %v9147_v56, %s7144_s29  ;;  %v2070_v54 = vpop.xlane.xlu1 %2069 }
 0x49b   : > { %v8191_v2 = vpop.permute.xlu0 %2712 }
 0x49d   : > { %3217 = vrot.lane.b32.xlu1 %v9150_v33, %s7143_s28  ;;  %3554 = vrot.lane.b32.xlu0 %v9146_v15, %s7144_s29  ;;  %v2074_v26 = vpop.xlane.xlu1 %2073 }
 0x4a1   : > { %3570 = vrot.lane.b32.xlu1 %v9150_v33, %s7144_s29  ;;  %3550 = vrot.lane.b32.xlu0 %v9137_v48, %s7144_s29  ;;  %v8185_v23 = vpop.xlane.xlu1 %2077  ;;  %v9158_v48 = vld [vmem:[#allocation11_spill] sm:$0xff]  ;;  %v671_v33 = vmul.f32 %v8169_v55, %v9159_v12 }
 0x4a2   : > { %v669_v30 = vmul.f32 %v8169_v55, %v9158_v48  ;;  %v9161_v48 = vld [vmem:[#allocation17_spill] sm:$0xff] }
 0x4a3   : > { %v691_v47 = vadd.f32 %v8178_v1, %v671_v33 }
 0x4a5   : > { %3568 = vrot.lane.b32.xlu1 %v9144_v36, %s7144_s29  ;;  %v689_v36 = vadd.f32 %v8178_v1, %v669_v30  ;;  %v675_v30 = vmul.f32 %v8169_v55, %v9161_v48 }
 0x4a7   : > { %v8198_v13 = vpop.xlane.xlu1 %2081 }
 0x4a9   : > { %3564 = vrot.lane.b32.xlu1 %v9143_v53, %s7144_s29 }
 0x4ab   : > { %v2080_v63 = vpop.xlane.xlu1 %2079 }
 0x4ac   : > { %v2103_v48 = vadd.f32 1e-06, %v2080_v63 }
 0x4ad   : > { %3560 = vrot.lane.b32.xlu1 %v9142_v42, %s7144_s29 }
 0x4b0   : > { %v8223_v56 = vpop.xlane.xlu1 %2085 }
 0x4b1   : > { %3556 = vrot.lane.b32.xlu1 %v9141_v35, %s7144_s29 }
 0x4b4   : > { %v8233_v6 = vpop.permute.xlu1 %2710 }
 0x4b5   : > { %3552 = vrot.lane.b32.xlu1 %v9140_v34, %s7144_s29  ;;  %v687_v34 = vadd.f32 %v8178_v1, %v667_v46  ;;  %v2097_v46 = vadd.f32 1e-06, %v2068_v10 }
 0x4b9   : > { %3548 = vrot.lane.b32.xlu1 %v7309_v57, %s7144_s29  ;;  %v681_v57 = vadd.f32 %v8178_v1, %v661_v14 }
 0x4c8   : > { %v6231_v61 = vpop.f32.mrf.mxu1 }
 0x4c9   : > { %v8187_v59 = vadd.f32 %v6231_v61, %v681_v57  ;;  %v2095_v57 = vadd.f32 1e-06, %v2064_v51  ;;  %v9160_v61 = vld [vmem:[#allocation15_spill] sm:$0xff] }
 0x4ca   : > { %v8189_v52 = vpop.f32.mrf.mxu1 }
 0x4cb   : > { %9153 = vst [vmem:[#allocation32_spill] sm:$0xff] %v8189_v52  ;;  %6948 = vrcp.f32 %v2095_v57  ;;  %v2101_v57 = vadd.f32 1e-06, %v8171_v38  ;;  %v2105_v52 = vadd.f32 1e-06, %v8180_v9 }
 0x4cc   : > { %6950 = vrcp.f32 %v2096_v7 }
 0x4cd   : > { %v6234_v27 = vpop.f32.mrf.mxu1  ;;  %6952 = vrcp.f32 %v2097_v46 }
 0x4ce   : > { %v8196_v31 = vadd.f32 %v6234_v27, %v683_v37  ;;  %v673_v37 = vmul.f32 %v8169_v55, %v9160_v61 }
 0x4cf   : > { %v8200_v20 = vpop.f32.mrf.mxu1 }
 0x4d0   : > { %9155 = vst [vmem:[#allocation21_spill] sm:$0xff] %v8200_v20  ;;  %v8202_v19 = vpop.xlane.xlu0 %2091 }
 0x4d2   : > { %v6237_v44 = vpop.f32.mrf.mxu1 }
 0x4d3   : > { %v8207_v43 = vadd.f32 %v6237_v44, %v685_v49  ;;  %v2098_v44 = vadd.f32 1e-06, %v2070_v54  ;;  %v695_v54 = vadd.f32 %v8178_v1, %v675_v30 }
 0x4d4   : > { %v3230_v41 = vpop.permute.xlu0 %3229  ;;  %v8209_v25 = vpop.f32.mrf.mxu1 }
 0x4d5   : > { %9157 = vst [vmem:[#allocation19_spill] sm:$0xff] %v8209_v25  ;;  %6551 = vmatprep.subr.msk.mxu0 %vm744_vm2, %v3230_v41  ;;  %6954 = vrcp.f32 %v2098_v44 }
 0x4d6   : > { %6552 = vmatpush3.xpose.msk.msra.mxu0 %vm744_vm2, %v3230_v41  ;;  %v6240_v35 = vpop.f32.mrf.mxu1  ;;  %v693_v41 = vadd.f32 %v8178_v1, %v673_v37 }
 0x4d7   : > { %v8216_v42 = vadd.f32 %v6240_v35, %v687_v34  ;;  %v2099_v35 = vadd.f32 1e-06, %v2072_v39 }
 0x4d8   : > { %v8218_v53 = vpop.f32.mrf.mxu1  ;;  %v8221_v21 = vpop.permute.xlu0 %2706 }
 0x4d9   : > { %6956 = vrcp.f32 %v2099_v35  ;;  %v6949_v38 = vpop.eup %6948  ;;  %v2104_v35 = vadd.f32 1e-06, %v8198_v13 }
 0x4da   : > { %v6243_v15 = vpop.f32.mrf.mxu1  ;;  %v6951_v25 = vpop.eup %6950 }
 0x4db   : > { %v8225_v60 = vadd.f32 %v6243_v15, %v689_v36  ;;  %v2100_v15 = vadd.f32 1e-06, %v2074_v26 }
 0x4dc   : > { %v8229_v29 = vpop.permute.xlu0 %3225  ;;  %v8231_v14 = vpop.f32.mrf.mxu1 }
 0x4dd   : > { %6958 = vrcp.f32 %v2100_v15 }
 0x4de   : > { %6960 = vrcp.f32 %v2101_v57 }
 0x4e0   : > { %v8244_v51 = vpop.permute.xlu0 %3221 }
 0x4e2   : > { %v6246_v50 = vpop.f32.mrf.mxu1 }
 0x4e3   : > { %v8238_v27 = vadd.f32 %v6246_v50, %v691_v47  ;;  %v2102_v50 = vadd.f32 1e-06, %v8185_v23 }
 0x4e4   : > { %v8240_v28 = vpop.f32.mrf.mxu1  ;;  %v8256_v12 = vpop.permute.xlu0 %3191 }
 0x4e5   : > { %v8242_v49 = vpop.xlane.xlu1 %2089 }
 0x4e7   : > { %v6249_v34 = vpop.f32.mrf.mxu1 }
 0x4e8   : > { %v8249_v4 = vadd.f32 %v6249_v34, %v693_v41 }
 0x4e9   : > { %v8251_v36 = vpop.xlane.xlu1 %2087  ;;  %v8253_v10 = vpop.f32.mrf.mxu1 }
 0x4ec   : > { %v6252_v33 = vpop.f32.mrf.mxu1 }
 0x4ed   : > { %v8259_v47 = vadd.f32 %v6252_v33, %v695_v54  ;;  %v6425_v61 = vpop.f32.mrf.mxu0  ;;  %v8261_v37 = vpop.xlane.xlu1 %2093 }
 0x4ee   : > { %v5411_v39 = vclamps-f32 %v6425_v61, 5.0  ;;  %v8263_v7 = vpop.f32.mrf.mxu1  ;;  %v8269_v54 = vpop.permute.xlu0 %3195 }
 0x4ef   : > { %9162 = vst [vmem:[#allocation18_spill] sm:$0xff] %v8259_v47  ;;  %v2547_v26 = vpop.f32.mrf.mxu0 }
 0x4f0   : > { %v2660_v46 = vmul.f32 1.442695, %v5411_v39  ;;  %v5410_v44 = vclamps-f32 %v2547_v26, 5.0  ;;  %v6343_v41 = vpop.f32.mrf.mxu1 }
 0x4f1   : > { %v6428_v30 = vpop.f32.mrf.mxu0  ;;  %v8266_v34 = vpop.permute.xlu1 %2708  ;;  %v2114_v26 = vmul.f32 %v6951_v25, %v6343_v41 }
 0x4f2   : > { %6962 = vpow2.f32 %v2660_v46  ;;  %v2658_v15 = vmul.f32 1.442695, %v5410_v44  ;;  %v5413_v33 = vclamps-f32 %v6428_v30, 5.0  ;;  %v1984_v61 = vpop.f32.mrf.mxu1  ;;  %v6953_v46 = vpop.eup %6952  ;;  %v2106_v44 = vadd.f32 1e-06, %v8223_v56 }
 0x4f3   : > { %6964 = vrcp.f32 %v2102_v50  ;;  %v2112_v23 = vmul.f32 %v6949_v38, %v1984_v61  ;;  %v2557_v39 = vpop.f32.mrf.mxu0  ;;  %v6955_v25 = vpop.eup %6954 }
 0x4f4   : > { %6966 = vpow2.f32 %v2658_v15  ;;  %v2664_v57 = vmul.f32 1.442695, %v5413_v33  ;;  %v5412_v63 = vclamps-f32 %v2557_v39, 5.0  ;;  %v6346_v20 = vpop.f32.mrf.mxu1 }
 0x4f5   : > { %6968 = vrcp.f32 %v2103_v48  ;;  %6367 = vmatprep.mubr.msk.f32.mxu1 %vm744_vm2, %v2112_v23  ;;  %v6431_v13 = vpop.f32.mrf.mxu0  ;;  %v3228_v47 = vpop.permute.xlu1 %3227  ;;  %v2107_v23 = vadd.f32 1e-06, %v8251_v36 }
 0x4f6   : > { %6970 = vrcp.f32 %v2104_v35  ;;  %v2662_v30 = vmul.f32 1.442695, %v5412_v63  ;;  %v5415_v50 = vclamps-f32 %v6431_v13, 5.0  ;;  %v1994_v38 = vpop.f32.mrf.mxu1  ;;  %6368 = vmatmul.mubr.msk.f32.vlgmr.msra.gmra.mxu1 %vm744_vm2, %v2114_v26  ;;  %6553 = vmatprep.subr.msk.mxu0 %vm744_vm2, %v3228_v47  ;;  %v8278_v48 = vpop.permute.xlu0 %3199  ;;  %v2118_v35 = vmul.f32 %v6955_v25, %v6346_v20 }
 0x4f7   : > { %6972 = vpow2.f32 %v2664_v57  ;;  %v2116_v41 = vmul.f32 %v6953_v46, %v1994_v38  ;;  %6448 = vmatpush3.msra.mxu1 %v8073_v17  ;;  %v2567_v9 = vpop.f32.mrf.mxu0  ;;  %6554 = vmatpush3.xpose.msk.msra.mxu0 %vm744_vm2, %v3228_v47  ;;  %v6957_v47 = vpop.eup %6956 }
 0x4f8   : > { %6974 = vpow2.f32 %v2662_v30  ;;  %v2668_v56 = vmul.f32 1.442695, %v5415_v50  ;;  %v5414_v15 = vclamps-f32 %v2567_v9, 5.0  ;;  %6449 = vmatprep.subr.mxu1 %v8029_v8  ;;  %v6349_v33 = vpop.f32.mrf.mxu1  ;;  %6555 = vmatprep.subr.msk.mxu0 %vm744_vm2, %v8229_v29  ;;  %v6959_v57 = vpop.eup %6958  ;;  %v2109_v9 = vadd.f32 1e-06, %v8202_v19 }
 0x4f9   : > { %6976 = vrcp.f32 %v2105_v52  ;;  %6450 = vmatpush3.msra.mxu1 %v8029_v8  ;;  %6370 = vmatprep.mubr.msk.f32.mxu1 %vm744_vm2, %v2116_v41  ;;  %v6434_v17 = vpop.f32.mrf.mxu0  ;;  %v3224_v61 = vpop.permute.xlu1 %3223  ;;  %v2108_v52 = vadd.f32 1e-06, %v8242_v49  ;;  %v2122_v36 = vmul.f32 %v6959_v57, %v6349_v33 }
 0x4fa   : > { %6978 = vrcp.f32 %v2106_v44  ;;  %v2666_v20 = vmul.f32 1.442695, %v5414_v15  ;;  %v5417_v39 = vclamps-f32 %v6434_v17, 5.0  ;;  %6451 = vmatprep.subr.mxu1 %v8043_v62  ;;  %v2004_v26 = vpop.f32.mrf.mxu1  ;;  %6371 = vmatmul.mubr.msk.f32.gmra.mxu1 %vm744_vm2, %v2118_v35  ;;  %v8296_v50 = vpop.permute.xlu0 %3203  ;;  %v2110_v15 = vadd.f32 1e-06, %v8261_v37 }
 0x4fb   : > { %6980 = vpow2.f32 %v2668_v56  ;;  %v2120_v8 = vmul.f32 %v6957_v47, %v2004_v26  ;;  %6452 = vmatpush3.msra.mxu1 %v8043_v62  ;;  %v2577_v63 = vpop.f32.mrf.mxu0  ;;  %6556 = vmatpush3.xpose.msk.msra.mxu0 %vm744_vm2, %v8229_v29  ;;  %v6961_v62 = vpop.eup %6960  ;;  %v8307_v47 = vld [vmem:[%s7683_s21 + $0x8] sm:$0xff] }
 0x4fc   : > { %6982 = vpow2.f32 %v2666_v20  ;;  %v5416_v13 = vclamps-f32 %v2577_v63, 5.0  ;;  %6453 = vmatprep.subr.mxu1 %v8054_v24  ;;  %v6352_v46 = vpop.f32.mrf.mxu1  ;;  %6557 = vmatprep.subr.msk.mxu0 %vm744_vm2, %v3224_v61  ;;  %v2672_v44 = vmul.f32 1.442695, %v5417_v39 }
 0x4fd   : > { %6454 = vmatpush3.msra.mxu1 %v8054_v24  ;;  %6373 = vmatprep.mubr.msk.f32.mxu1 %vm744_vm2, %v2120_v8  ;;  %v6437_v49 = vpop.f32.mrf.mxu0  ;;  %v3190_v30 = vpop.permute.xlu1 %3189  ;;  %6984 = vrcp.f32 %v2107_v23 }
 0x4fe   : > { %v2670_v29 = vmul.f32 1.442695, %v5416_v13  ;;  %v5419_v38 = vclamps-f32 %v6437_v49, 5.0  ;;  %6455 = vmatprep.subr.mxu1 %v8068_v16  ;;  %v2014_v25 = vpop.f32.mrf.mxu1  ;;  %6374 = vmatmul.mubr.msk.f32.gmra.mxu1 %vm744_vm2, %v2122_v36  ;;  %6986 = vrcp.f32 %v2108_v52  ;;  %v8318_v52 = vld [vmem:[%s7683_s21] sm:$0xff] }
 0x4ff   : > { %v6963_v41 = vpop.eup %6962  ;;  %v2124_v24 = vmul.f32 %v6961_v62, %v2014_v25  ;;  %6456 = vmatpush3.msra.mxu1 %v8068_v16  ;;  %v2587_v35 = vpop.f32.mrf.mxu0  ;;  %6561 = vmatprep.mubr.msk.f32.mxu0 %vm744_vm2, %v3190_v30 }
 0x500   : > { %v6965_v56 = vpop.eup %6964  ;;  %6988 = vpow2.f32 %v2670_v29  ;;  %v5418_v33 = vclamps-f32 %v2587_v35, 5.0  ;;  %6457 = vmatprep.subr.mxu1 %v8085_v0  ;;  %v6355_v17 = vpop.f32.mrf.mxu1  ;;  %6558 = vmatpush3.xpose.msk.msra.mxu0 %vm744_vm2, %v3224_v61  ;;  %v8310_v19 = vmul.f32 %v8307_v47, %v6963_v41  ;;  %v2676_v39 = vmul.f32 1.442695, %v5419_v38 }
 0x501   : > { %v6967_v16 = vpop.eup %6966  ;;  %6990 = vpow2.f32 %v2672_v44  ;;  %v2126_v23 = vmul.f32 %v6965_v56, %v6352_v46  ;;  %6458 = vmatpush3.msra.mxu1 %v8085_v0  ;;  %6376 = vmatprep.mubr.msk.f32.mxu1 %vm744_vm2, %v2124_v24  ;;  %v6440_v37 = vpop.f32.mrf.mxu0 }
 0x502   : > { %v6969_v20 = vpop.eup %6968  ;;  %v2674_v26 = vmul.f32 1.442695, %v5418_v33  ;;  %6459 = vmatprep.subr.mxu1 %v8091_v18  ;;  %6559 = vmatprep.subr.msk.mxu0 %vm744_vm2, %v8244_v51  ;;  %v3194_v61 = vpop.permute.xlu1 %3193  ;;  %v8321_v8 = vmul.f32 %v8318_v52, %v6967_v16  ;;  %6992 = vrcp.f32 %v2109_v9  ;;  %v5421_v0 = vclamps-f32 %v6440_v37, 5.0  ;;  %v8335_v9 = vld [vmem:[%s7683_s21 + $0x10] sm:$0xff] }
 0x503   : > { %v2024_v57 = vpop.f32.mrf.mxu1  ;;  %v6971_v63 = vpop.eup %6970  ;;  %2901 = vadd.xlane.f32.xlu0 %v8310_v19  ;;  %6377 = vmatmul.mubr.msk.f32.gmra.mxu1 %vm744_vm2, %v2126_v23  ;;  %6994 = vrcp.f32 %v2110_v15 }
 0x504   : > { %v2128_v36 = vmul.f32 %v6969_v20, %v2024_v57  ;;  %v2597_v13 = vpop.f32.mrf.mxu0  ;;  %v6973_v46 = vpop.eup %6972  ;;  %6460 = vmatpush3.msra.mxu1 %v8091_v18  ;;  %2899 = vadd.xlane.f32.xlu1 %v8321_v8  ;;  %6996 = vpow2.f32 %v2674_v26  ;;  %v2130_v29 = vmul.f32 %v6971_v63, %v6355_v17  ;;  %v2680_v56 = vmul.f32 1.442695, %v5421_v0  ;;  %v8343_v17 = vld [vmem:[%s7683_s21 + $0x18] sm:$0xff] }
 0x505   : > { %v8325_v44 = vpop.permute.xlu0 %3207  ;;  %v5420_v49 = vclamps-f32 %v2597_v13, 5.0  ;;  %v6358_v30 = vpop.f32.mrf.mxu1  ;;  %6461 = vmatprep.subr.mxu1 %v8087_v5  ;;  %6560 = vmatpush3.xpose.msk.msra.mxu0 %vm744_vm2, %v8244_v51  ;;  %6998 = vpow2.f32 %v2676_v39 }
 0x506   : > { %v6975_v62 = vpop.eup %6974  ;;  %v6443_v38 = vpop.f32.mrf.mxu0  ;;  %6462 = vmatpush3.msra.mxu1 %v8087_v5  ;;  %6379 = vmatprep.mubr.msk.f32.mxu1 %vm744_vm2, %v2128_v36  ;;  %v8346_v5 = vmul.f32 %v8343_v17, %v6973_v46  ;;  %v8360_v46 = vld [vmem:[%s7683_s21 + $0x20] sm:$0xff] }
 0x507   : > { %v6977_v25 = vpop.eup %6976  ;;  %v2678_v41 = vmul.f32 1.442695, %v5420_v49  ;;  %v2034_v18 = vpop.f32.mrf.mxu1  ;;  %v8338_v24 = vmul.f32 %v8335_v9, %v6975_v62  ;;  %v5423_v15 = vclamps-f32 %v6443_v38, 5.0  ;;  %6463 = vmatprep.subr.mxu1 %v8095_v3  ;;  %6380 = vmatmul.mubr.msk.f32.gmra.mxu1 %vm744_vm2, %v2130_v29 }
 0x508   : > { %v6979_v35 = vpop.eup %6978  ;;  %v2132_v51 = vmul.f32 %v6977_v25, %v2034_v18  ;;  %v2607_v33 = vpop.f32.mrf.mxu0  ;;  %6464 = vmatpush3.msra.mxu1 %v8095_v3  ;;  %6562 = vmatmul.mubr.msk.f32.vlgmr.msra.gmra.mxu0 %vm744_vm2, %v8256_v12  ;;  %v8368_v25 = vld [vmem:[%s7683_s21 + $0x28] sm:$0xff] }
 0x509   : > { %v6981_v16 = vpop.eup %6980  ;;  %v3198_v23 = vpop.permute.xlu1 %3197  ;;  %v5422_v37 = vclamps-f32 %v2607_v33, 5.0  ;;  %6465 = vmatprep.subr.mxu1 %v8099_v45  ;;  %2905 = vadd.xlane.f32.xlu1 %v8346_v5  ;;  %7000 = vpow2.f32 %v2678_v41  ;;  %v2134_v63 = vmul.f32 %v6979_v35, %v6358_v30  ;;  %v2684_v36 = vmul.f32 1.442695, %v5423_v15 }
 0x50a   : > { %v6361_v20 = vpop.f32.mrf.mxu1  ;;  %v6983_v39 = vpop.eup %6982  ;;  %2903 = vadd.xlane.f32.xlu0 %v8338_v24  ;;  %6466 = vmatpush3.msra.mxu1 %v8099_v45  ;;  %7002 = vpow2.f32 %v2680_v56 }
 0x50b   : > { %v6446_v26 = vpop.f32.mrf.mxu0  ;;  %v8353_v57 = vpop.permute.xlu0 %3211  ;;  %v2682_v0 = vmul.f32 1.442695, %v5422_v37  ;;  %6564 = vmatprep.mubr.msk.f32.mxu0 %vm744_vm2, %v3194_v61  ;;  %6382 = vmatprep.mubr.msk.f32.mxu1 %vm744_vm2, %v2132_v51  ;;  %v8363_v49 = vmul.f32 %v8360_v46, %v6983_v39  ;;  %v8371_v61 = vmul.f32 %v8368_v25, %v6981_v16  ;;  %v8385_v16 = vld [vmem:[%s7683_s21 + $0x30] sm:$0xff] }
 0x50c   : > { %v2044_v3 = vpop.f32.mrf.mxu1  ;;  %v6985_v12 = vpop.eup %6984  ;;  %v5425_v62 = vclamps-f32 %v6446_v26, 5.0  ;;  %6467 = vmatprep.subr.mxu1 %v8105_v11  ;;  %6383 = vmatmul.mubr.msk.f32.gmra.mxu1 %vm744_vm2, %v2134_v63 }
 0x50d   : > { %v2617_v13 = vpop.f32.mrf.mxu0  ;;  %v6987_v30 = vpop.eup %6986  ;;  %v2136_v45 = vmul.f32 %v6985_v12, %v2044_v3  ;;  %6468 = vmatpush3.msra.mxu1 %v8105_v11  ;;  %6565 = vmatmul.mubr.msk.f32.gmra.mxu0 %vm744_vm2, %v8269_v54  ;;  %7004 = vpow2.f32 %v2682_v0 }
 0x50e   : > { %v5424_v29 = vclamps-f32 %v2617_v13, 5.0  ;;  %v6364_v38 = vpop.f32.mrf.mxu1  ;;  %v6989_v41 = vpop.eup %6988  ;;  %6469 = vmatprep.subr.mxu1 %v8156_v22  ;;  %2909 = vadd.xlane.f32.xlu1 %v8371_v61  ;;  %v2138_v51 = vmul.f32 %v6987_v30, %v6361_v20  ;;  %7006 = vpow2.f32 %v2684_v36  ;;  %v2688_v54 = vmul.f32 1.442695, %v5425_v62  ;;  %v2979_v62 = vld [vmem:[%s9057_s2 + $0x40] sm:$0xff] }
 0x50f   : > { %v6991_v18 = vpop.eup %6990  ;;  %v3202_v35 = vpop.permute.xlu1 %3201  ;;  %2907 = vadd.xlane.f32.xlu0 %v8363_v49  ;;  %6470 = vmatpush3.msra.mxu1 %v8156_v22  ;;  %v8388_v37 = vmul.f32 %v8385_v16, %v6989_v41  ;;  %v8393_v22 = vld [vmem:[%s7683_s21 + $0x38] sm:$0xff] }
 0x510   : > { %v2686_v56 = vmul.f32 1.442695, %v5424_v29  ;;  %v2054_v15 = vpop.f32.mrf.mxu1  ;;  %v6993_v11 = vpop.eup %6992  ;;  %6567 = vmatprep.mubr.msk.f32.mxu0 %vm744_vm2, %v3198_v23  ;;  %6385 = vmatprep.mubr.msk.f32.mxu1 %vm744_vm2, %v2136_v45  ;;  %v8396_v26 = vmul.f32 %v8393_v22, %v6991_v18 }
 0x511   : > { %v8380_v33 = vpop.permute.xlu0 %3215  ;;  %v6995_v39 = vpop.eup %6994  ;;  %6471 = vmatprep.subr.mxu1 %v8191_v2  ;;  %v2140_v20 = vmul.f32 %v6993_v11, %v2054_v15  ;;  %6386 = vmatmul.mubr.msk.f32.gmra.mxu1 %vm744_vm2, %v2138_v51  ;;  %v8456_v51 = vld [vmem:[%s7683_s21 + $0x70] sm:$0xff] }
 0x512   : > { %v6997_v23 = vpop.eup %6996  ;;  %7008 = vpow2.f32 %v2686_v56  ;;  %6472 = vmatpush3.msra.mxu1 %v8191_v2  ;;  %6568 = vmatmul.mubr.msk.f32.gmra.mxu0 %vm744_vm2, %v8278_v48  ;;  %v2142_v0 = vmul.f32 %v6995_v39, %v6364_v38  ;;  %v8408_v2 = vld [vmem:[%s7683_s21 + $0x40] sm:$0xff]  ;;  %v8436_v38 = vld [vmem:[%s7683_s21 + $0x58] sm:$0xff]  ;;  %v8450_v56 = vld [vmem:[%s7683_s21 + $0x68] sm:$0xff] }
 0x513   : > { %v6999_v63 = vpop.eup %6998  ;;  %6473 = vmatprep.subr.mxu1 %v8233_v6  ;;  %2913 = vadd.xlane.f32.xlu1 %v8396_v26  ;;  %7010 = vpow2.f32 %v2688_v54  ;;  %v3206_v3 = vpop.permute.xlu1 %3205  ;;  %v2698_v48 = vmul.f32 %v8408_v2, %v6997_v23 }
 0x514   : > { %2911 = vadd.xlane.f32.xlu0 %v8388_v37  ;;  %6474 = vmatpush3.msra.mxu1 %v8233_v6  ;;  %v8416_v6 = vld [vmem:[%s7683_s21 + $0x48] sm:$0xff] }
 0x515   : > { %6570 = vmatprep.mubr.msk.f32.mxu0 %vm744_vm2, %v3202_v35  ;;  %6388 = vmatprep.mubr.msk.f32.mxu1 %vm744_vm2, %v2140_v20  ;;  %v3220_v12 = vpop.permute.xlu0 %3219  ;;  %v2699_v13 = vmul.f32 %v8416_v6, %v6999_v63 }
 0x516   : > { %6475 = vmatprep.subr.mxu1 %v8266_v34  ;;  %6389 = vmatmul.mubr.msk.f32.gmra.mxu1 %vm744_vm2, %v2142_v0  ;;  %v7001_v36 = vpop.eup %7000 }
 0x517   : > { %6476 = vmatpush3.msra.mxu1 %v8266_v34  ;;  %6479 = vmatprep.mubr.f32.mxu1 %v8321_v8  ;;  %v7003_v30 = vpop.eup %7002  ;;  %v3210_v34 = vpop.permute.xlu1 %3209  ;;  %v8428_v8 = vld [vmem:[%s7683_s21 + $0x50] sm:$0xff] }
 0x518   : > { %6477 = vmatprep.subr.mxu1 %v8221_v21  ;;  %6571 = vmatmul.mubr.msk.f32.gmra.mxu0 %vm744_vm2, %v8296_v50  ;;  %v2700_v45 = vmul.f32 %v8428_v8, %v7001_v36 }
 0x519   : > { %2917 = vadd.xlane.f32.xlu1 %v2699_v13  ;;  %2915 = vadd.xlane.f32.xlu0 %v2698_v48  ;;  %v8432_v50 = vpop.permute.xlu0 %3572 }
 0x51a   : > { %6478 = vmatpush3.msra.mxu1 %v8221_v21  ;;  %6573 = vmatprep.mubr.msk.f32.mxu0 %vm744_vm2, %v3206_v3  ;;  %v7005_v29 = vpop.eup %7004  ;;  %v2701_v21 = vmul.f32 %v8436_v38, %v7003_v30 }
 0x51b   : > { %6503 = vmatprep.subr.mxu1 %v2979_v62  ;;  %6480 = vmatmul.mubr.f32.vlgmr.msra.gmra.mxu1 %v8310_v19  ;;  %v7007_v41 = vpop.eup %7006  ;;  %v8443_v19 = vld [vmem:[%s7683_s21 + $0x60] sm:$0xff] }
 0x51c   : > { %6504 = vmatpush3.msra.mxu1 %v2979_v62  ;;  %6482 = vmatprep.mubr.f32.mxu1 %v8338_v24  ;;  %v2702_v18 = vmul.f32 %v8443_v19, %v7005_v29  ;;  %v3214_v24 = vpop.permute.xlu1 %3213 }
 0x51d   : > { %6574 = vmatmul.mubr.msk.f32.gmra.mxu0 %vm744_vm2, %v8325_v44  ;;  %6585 = vmatprep.subr.mxu1 %v8432_v50  ;;  %v2703_v44 = vmul.f32 %v8450_v56, %v7007_v41  ;;  %v8481_v54 = vpop.permute.xlu0 %3566 }
 0x51e   : > { %2921 = vadd.xlane.f32.xlu1 %v2701_v21  ;;  %2919 = vadd.xlane.f32.xlu0 %v2700_v45 }
 0x51f   : > { %v7009_v35 = vpop.eup %7008  ;;  %6576 = vmatprep.mubr.msk.f32.mxu0 %vm744_vm2, %v3210_v34  ;;  %6483 = vmatmul.mubr.f32.gmra.mxu1 %v8346_v5  ;;  %v8463_v5 = vld [vmem:[%s7683_s21 + $0x78] sm:$0xff]  ;;  %v9164_v34 = vld [vmem:[#allocation8_spill] sm:$0xff]  ;;  %s9034_s21 = scalar_lea.vmem %s9059_s4, %s7187_s24 }
 0x520   : > { %6485 = vmatprep.mubr.f32.mxu1 %v8363_v49  ;;  %v7011_v15 = vpop.eup %7010  ;;  %v2704_v11 = vmul.f32 %v8456_v51, %v7009_v35 }
 0x521   : > { %6577 = vmatmul.mubr.msk.f32.gmra.mxu0 %vm744_vm2, %v8353_v57  ;;  %v2705_v49 = vmul.f32 %v8463_v5, %v7011_v15  ;;  %v3218_v57 = vpop.permute.xlu1 %3217  ;;  %v8485_v39 = vpop.permute.xlu0 %3562 }
 0x522   : > { %2925 = vadd.xlane.f32.xlu1 %v2703_v44  ;;  %2923 = vadd.xlane.f32.xlu0 %v2702_v18 }
 0x523   : > { %6579 = vmatprep.mubr.msk.f32.mxu0 %vm744_vm2, %v3214_v24  ;;  %6486 = vmatmul.mubr.f32.gmra.mxu1 %v8371_v61 }
 0x524   : > { %6488 = vmatprep.mubr.f32.mxu1 %v8388_v37 }
 0x525   : > { %6580 = vmatmul.mubr.msk.f32.gmra.mxu0 %vm744_vm2, %v8380_v33  ;;  %v8477_v61 = vpop.permute.xlu1 %3570 }
 0x526   : > { %2929 = vadd.xlane.f32.xlu1 %v2705_v49  ;;  %2927 = vadd.xlane.f32.xlu0 %v2704_v11 }
 0x527   : > { %6582 = vmatprep.mubr.msk.f32.mxu0 %vm744_vm2, %v3218_v57  ;;  %6489 = vmatmul.mubr.f32.gmra.mxu1 %v8396_v26 }
 0x528   : > { %6491 = vmatprep.mubr.f32.mxu1 %v2698_v48 }
 0x529   : > { %6583 = vmatmul.mubr.msk.f32.gmra.mxu0 %vm744_vm2, %v3220_v12  ;;  %v8479_v33 = vpop.permute.xlu1 %3568 }
 0x52b   : > { %6492 = vmatmul.mubr.f32.gmra.mxu1 %v2699_v13 }
 0x52c   : > { %6494 = vmatprep.mubr.f32.mxu1 %v2700_v45  ;;  %v666_v45 = vmul.f32 %v8169_v55, %v9164_v34 }
 0x52d   : > { %v8483_v37 = vpop.permute.xlu1 %3564 }
 0x52e   : > { %v686_v24 = vadd.f32 %v8178_v1, %v666_v45 }
 0x52f   : > { %6495 = vmatmul.mubr.f32.gmra.mxu1 %v2701_v21 }
 0x530   : > { %6497 = vmatprep.mubr.f32.mxu1 %v2702_v18  ;;  %v9167_v18 = vld [vmem:[#allocation10_spill] sm:$0xff]  ;;  %v1507_v15 = vadd.f32 %v8218_v53, %v686_v24 }
 0x531   : > { %v8487_v20 = vpop.permute.xlu1 %3560  ;;  %v668_v35 = vmul.f32 %v8169_v55, %v9167_v18 }
 0x533   : > { %6498 = vmatmul.mubr.f32.gmra.mxu1 %v2703_v44 }
 0x534   : > { %6500 = vmatprep.mubr.f32.mxu1 %v2704_v11 }
 0x535   : > { %v8491_v26 = vpop.permute.xlu1 %3556 }
 0x537   : > { %3544 = vrot.lane.b32.xlu1 %v9139_v40, %s7144_s29  ;;  %6501 = vmatmul.mubr.f32.gmra.mxu1 %v2705_v49  ;;  %v8489_v40 = vpop.permute.xlu0 %3558 }
 0x539   : > { %v8495_v23 = vpop.permute.xlu1 %3552 }
 0x53c   : > { %3546 = vrot.lane.b32.xlu0 %v7311_v58, %s7144_s29  ;;  %v8493_v58 = vpop.permute.xlu0 %3554 }
 0x53d   : > { %v8502_v3 = vpop.permute.xlu1 %3548 }
 0x540   : > { %3542 = vrot.lane.b32.xlu0 %v9138_v32, %s7144_s29  ;;  %v8497_v63 = vpop.permute.xlu0 %3550 }
 0x58c   : > { %v2902_v36 = vpop.xlane.xlu0 %2901 }
 0x58d   : > { %v2900_v30 = vpop.xlane.xlu1 %2899 }
 0x593   : > { %v2904_v21 = vpop.xlane.xlu0 %2903 }
 0x598   : > { %v2908_v49 = vpop.xlane.xlu0 %2907 }
 0x5b6   : > { %v6369_v32 = vpop.f32.mrf.mxu1 }
 0x5b7   : > { %v8500_v0 = vadd.f32 %v6369_v32, %v8187_v59  ;;  %v9169_v32 = vld [vmem:[#allocation12_spill] sm:$0xff] }
 0x5b8   : > { %v8504_v48 = vpop.f32.mrf.mxu1 }
 0x5ba   : > { %v6372_v12 = vpop.f32.mrf.mxu1 }
 0x5bb   : > { %v8507_v13 = vadd.f32 %v6372_v12, %v8196_v31  ;;  %v2906_v31 = vpop.xlane.xlu1 %2905  ;;  %v688_v12 = vadd.f32 %v8178_v1, %v668_v35 }
 0x5bc   : > { %v8509_v62 = vpop.f32.mrf.mxu1 }
 0x5bd   : > { %9163 = vst [vmem:[#allocation20_spill] sm:$0xff] %v8507_v13  ;;  %v1509_v18 = vadd.f32 %v8231_v14, %v688_v12  ;;  %v2931_v12 = vadd.f32 1e-06, %v2900_v30 }
 0x5be   : > { %v6375_v29 = vpop.f32.mrf.mxu1 }
 0x5bf   : > { %v8514_v59 = vadd.f32 %v6375_v29, %v8207_v43  ;;  %v670_v43 = vmul.f32 %v8169_v55, %v9169_v32  ;;  %v2910_v45 = vpop.xlane.xlu1 %2909  ;;  %v9173_v32 = vld [vmem:[#allocation14_spill] sm:$0xff] }
 0x5c0   : > { %v8516_v41 = vpop.f32.mrf.mxu1  ;;  %v672_v35 = vmul.f32 %v8169_v55, %v9173_v32  ;;  %v2933_v32 = vadd.f32 1e-06, %v2904_v21 }
 0x5c1   : > { %9165 = vst [vmem:[#allocation22_spill] sm:$0xff] %v8514_v59  ;;  %9166 = vst [vmem:[#allocation24_spill] sm:$0xff] %v8516_v41 }
 0x5c3   : > { %v6378_v44 = vpop.f32.mrf.mxu1 }
 0x5c4   : > { %v8523_v11 = vadd.f32 %v6378_v44, %v8216_v42  ;;  %v690_v44 = vadd.f32 %v8178_v1, %v670_v43 }
 0x5c5   : > { %v2288_v57 = vpop.f32.mrf.mxu1 }
 0x5c6   : > { %9168 = vst [vmem:[#allocation26_spill] sm:$0xff] %v8523_v11  ;;  %v8528_v34 = vadd.f32 %v2288_v57, %v1507_v15  ;;  %v2912_v15 = vpop.xlane.xlu0 %2911  ;;  %v1511_v14 = vadd.f32 %v8240_v28, %v690_v44  ;;  %v9174_v28 = vld [vmem:[#allocation16_spill] sm:$0xff] }
 0x5c7   : > { %v6381_v29 = vpop.f32.mrf.mxu1  ;;  %v674_v30 = vmul.f32 %v8169_v55, %v9174_v28 }
 0x5c8   : > { %9170 = vst [vmem:[#allocation28_spill] sm:$0xff] %v8528_v34  ;;  %v8532_v59 = vadd.f32 %v6381_v29, %v8225_v60  ;;  %v6563_v53 = vpop.f32.mrf.mxu0  ;;  %v2932_v60 = vadd.f32 1e-06, %v2902_v36 }
 0x5c9   : > { %v5475_v24 = vclamps-f32 %v6563_v53, 5.0  ;;  %v2298_v42 = vpop.f32.mrf.mxu1  ;;  %v694_v55 = vadd.f32 %v8178_v1, %v674_v30 }
 0x5ca   : > { %9171 = vst [vmem:[#allocation30_spill] sm:$0xff] %v8532_v59  ;;  %v8535_v11 = vadd.f32 %v2298_v42, %v1509_v18  ;;  %v3383_v41 = vpop.f32.mrf.mxu0  ;;  %v2914_v18 = vpop.xlane.xlu1 %2913  ;;  %v692_v59 = vadd.f32 %v8178_v1, %v672_v35  ;;  %v2937_v1 = vadd.f32 1e-06, %v2912_v15 }
 0x5cb   : > { %v3496_v57 = vmul.f32 1.442695, %v5475_v24  ;;  %v5474_v34 = vclamps-f32 %v3383_v41, 5.0  ;;  %v2916_v44 = vpop.xlane.xlu0 %2915 }
 0x5cc   : > { %9172 = vst [vmem:[#allocation23_spill] sm:$0xff] %v8535_v11  ;;  %v6384_v13 = vpop.f32.mrf.mxu1 }
 0x5cd   : > { %7012 = vpow2.f32 %v3496_v57  ;;  %v3494_v29 = vmul.f32 1.442695, %v5474_v34  ;;  %v8541_v53 = vadd.f32 %v6384_v13, %v8238_v27  ;;  %v6566_v43 = vpop.f32.mrf.mxu0  ;;  %v1513_v27 = vadd.f32 %v8253_v10, %v692_v59 }
 0x5ce   : > { %v5477_v42 = vclamps-f32 %v6566_v43, 5.0  ;;  %v2308_v11 = vpop.f32.mrf.mxu1  ;;  %v2934_v13 = vadd.f32 1e-06, %v2906_v31  ;;  %v2936_v43 = vadd.f32 1e-06, %v2910_v45 }
 0x5cf   : > { %7014 = vpow2.f32 %v3494_v29  ;;  %v8544_v24 = vadd.f32 %v2308_v11, %v1511_v14  ;;  %v3393_v41 = vpop.f32.mrf.mxu0  ;;  %v2920_v28 = vpop.xlane.xlu0 %2919 }
 0x5d0   : > { %7016 = vrcp.f32 %v2931_v12  ;;  %v3500_v36 = vmul.f32 1.442695, %v5477_v42  ;;  %v5476_v34 = vclamps-f32 %v3393_v41, 5.0  ;;  %v2935_v12 = vadd.f32 1e-06, %v2908_v49  ;;  %v2918_v42 = vpop.xlane.xlu1 %2917 }
 0x5d1   : > { %7018 = vrcp.f32 %v2932_v60  ;;  %v6387_v57 = vpop.f32.mrf.mxu1  ;;  %v1515_v60 = vadd.f32 %v8263_v7, %v694_v55  ;;  %v2938_v41 = vadd.f32 1e-06, %v2914_v18  ;;  %v2939_v55 = vadd.f32 1e-06, %v2916_v44 }
 0x5d2   : > { %7020 = vpow2.f32 %v3500_v36  ;;  %v3498_v35 = vmul.f32 1.442695, %v5476_v34  ;;  %v8550_v21 = vadd.f32 %v6387_v57, %v8249_v4  ;;  %v6569_v11 = vpop.f32.mrf.mxu0  ;;  %v9175_v36 = vld [vmem:[#allocation18_spill] sm:$0xff] }
 0x5d3   : > { %7022 = vrcp.f32 %v2933_v32  ;;  %v5479_v14 = vclamps-f32 %v6569_v11, 5.0  ;;  %v2318_v29 = vpop.f32.mrf.mxu1 }
 0x5d4   : > { %7024 = vpow2.f32 %v3498_v35  ;;  %v8553_v10 = vadd.f32 %v2318_v29, %v1513_v27  ;;  %v3403_v59 = vpop.f32.mrf.mxu0  ;;  %v2922_v35 = vpop.xlane.xlu1 %2921 }
 0x5d5   : > { %7026 = vrcp.f32 %v2934_v13  ;;  %v3504_v31 = vmul.f32 1.442695, %v5479_v14  ;;  %v5478_v45 = vclamps-f32 %v3403_v59, 5.0 }
 0x5d6   : > { %7028 = vrcp.f32 %v2936_v43  ;;  %v6390_v4 = vpop.f32.mrf.mxu1 }
 0x5d7   : > { %7030 = vpow2.f32 %v3504_v31  ;;  %v3502_v32 = vmul.f32 1.442695, %v5478_v45  ;;  %v8557_v34 = vadd.f32 %v6390_v4, %v9175_v36 }
 0x5d8   : > { %7032 = vrcp.f32 %v2935_v12  ;;  %v6572_v49 = vpop.f32.mrf.mxu0  ;;  %v2328_v30 = vpop.f32.mrf.mxu1  ;;  %v2940_v12 = vadd.f32 1e-06, %v2918_v42 }
 0x5d9   : > { %7034 = vpow2.f32 %v3502_v32  ;;  %v5481_v27 = vclamps-f32 %v6572_v49, 5.0  ;;  %v8559_v13 = vadd.f32 %v2328_v30, %v1515_v60  ;;  %v2941_v49 = vadd.f32 1e-06, %v2920_v28 }
 0x5da   : > { %v7013_v57 = vpop.eup %7012  ;;  %v3413_v7 = vpop.f32.mrf.mxu0  ;;  %7036 = vrcp.f32 %v2938_v41 }
 0x5db   : > { %v3508_v43 = vmul.f32 1.442695, %v5481_v27  ;;  %v5480_v18 = vclamps-f32 %v3413_v7, 5.0  ;;  %v6481_v11 = vpop.f32.mrf.mxu1  ;;  %v8562_v14 = vmul.f32 %v8307_v47, %v7013_v57  ;;  %7038 = vrcp.f32 %v2937_v1  ;;  %v2924_v41 = vpop.xlane.xlu0 %2923 }
 0x5dc   : > { %v7015_v29 = vpop.eup %7014  ;;  %v2926_v27 = vpop.xlane.xlu1 %2925 }
 0x5dd   : > { %v7017_v15 = vpop.eup %7016  ;;  %7040 = vpow2.f32 %v3508_v43  ;;  %v3506_v59 = vmul.f32 1.442695, %v5480_v18  ;;  %v6575_v31 = vpop.f32.mrf.mxu0  ;;  %3737 = vadd.xlane.f32.xlu0 %v8562_v14  ;;  %v8566_v60 = vmul.f32 %v8318_v52, %v7015_v29  ;;  %v2942_v43 = vadd.f32 1e-06, %v2922_v35 }
 0x5de   : > { %v2820_v45 = vpop.f32.mrf.mxu1  ;;  %v7019_v4 = vpop.eup %7018  ;;  %v5483_v32 = vclamps-f32 %v6575_v31, 5.0 }
 0x5df   : > { %v2948_v36 = vmul.f32 %v7017_v15, %v2820_v45  ;;  %v7021_v47 = vpop.eup %7020  ;;  %7042 = vpow2.f32 %v3506_v59  ;;  %v2950_v1 = vmul.f32 %v7019_v4, %v6481_v11  ;;  %v3423_v44 = vpop.f32.mrf.mxu0  ;;  %3735 = vadd.xlane.f32.xlu1 %v8566_v60  ;;  %v2943_v45 = vadd.f32 1e-06, %v2924_v41 }
 0x5e0   : > { %v6484_v30 = vpop.f32.mrf.mxu1  ;;  %v7023_v42 = vpop.eup %7022  ;;  %7044 = vrcp.f32 %v2939_v55  ;;  %v3512_v57 = vmul.f32 1.442695, %v5483_v32  ;;  %v5482_v7 = vclamps-f32 %v3423_v44, 5.0  ;;  %v8572_v28 = vmul.f32 %v8343_v17, %v7021_v47 }
 0x5e1   : > { %6505 = vmatprep.mubr.msk.f32.mxu1 %vm744_vm2, %v2948_v36  ;;  %v7025_v52 = vpop.eup %7024  ;;  %7046 = vrcp.f32 %v2940_v12  ;;  %v6578_v18 = vpop.f32.mrf.mxu0  ;;  %v2944_v41 = vadd.f32 1e-06, %v2926_v27 }
 0x5e2   : > { %v2830_v29 = vpop.f32.mrf.mxu1  ;;  %6506 = vmatmul.mubr.msk.f32.vlgmr.msra.gmra.mxu1 %vm744_vm2, %v2950_v1  ;;  %v7027_v11 = vpop.eup %7026  ;;  %7048 = vpow2.f32 %v3512_v57  ;;  %v3510_v15 = vmul.f32 1.442695, %v5482_v7  ;;  %v5485_v59 = vclamps-f32 %v6578_v18, 5.0  ;;  %v8578_v17 = vmul.f32 %v8335_v9, %v7025_v52 }
 0x5e3   : > { %v2952_v55 = vmul.f32 %v7023_v42, %v2830_v29  ;;  %6586 = vmatpush3.msra.mxu1 %v8432_v50  ;;  %v7029_v31 = vpop.eup %7028  ;;  %7050 = vrcp.f32 %v2941_v49  ;;  %v2954_v4 = vmul.f32 %v7027_v11, %v6484_v30  ;;  %v3433_v12 = vpop.f32.mrf.mxu0  ;;  %3741 = vadd.xlane.f32.xlu1 %v8572_v28 }
 0x5e4   : > { %6587 = vmatprep.subr.mxu1 %v8477_v61  ;;  %v6487_v35 = vpop.f32.mrf.mxu1  ;;  %v7031_v32 = vpop.eup %7030  ;;  %7052 = vpow2.f32 %v3510_v15  ;;  %v3516_v47 = vmul.f32 1.442695, %v5485_v59  ;;  %v5484_v1 = vclamps-f32 %v3433_v12, 5.0  ;;  %3739 = vadd.xlane.f32.xlu0 %v8578_v17 }
 0x5e5   : > { %v2928_v36 = vpop.xlane.xlu0 %2927  ;;  %6588 = vmatpush3.msra.mxu1 %v8477_v61  ;;  %6508 = vmatprep.mubr.msk.f32.mxu1 %vm744_vm2, %v2952_v55  ;;  %v7033_v50 = vpop.eup %7032  ;;  %7054 = vrcp.f32 %v2942_v43  ;;  %v8585_v9 = vmul.f32 %v8368_v25, %v7031_v32  ;;  %v2958_v52 = vmul.f32 %v7029_v31, %v6487_v35 }
 0x5e6   : > { %v6581_v49 = vpop.f32.mrf.mxu0  ;;  %6589 = vmatprep.subr.mxu1 %v8479_v33  ;;  %v2840_v44 = vpop.f32.mrf.mxu1  ;;  %6509 = vmatmul.mubr.msk.f32.gmra.mxu1 %vm744_vm2, %v2954_v4  ;;  %7056 = vpow2.f32 %v3516_v47  ;;  %v3514_v57 = vmul.f32 1.442695, %v5484_v1  ;;  %v2945_v27 = vadd.f32 1e-06, %v2928_v36 }
 0x5e7   : > { %v7035_v30 = vpop.eup %7034  ;;  %v2930_v42 = vpop.xlane.xlu1 %2929  ;;  %v5487_v7 = vclamps-f32 %v6581_v49, 5.0  ;;  %v2956_v61 = vmul.f32 %v7033_v50, %v2840_v44  ;;  %6590 = vmatpush3.msra.mxu1 %v8479_v33  ;;  %7058 = vrcp.f32 %v2943_v45  ;;  %3745 = vadd.xlane.f32.xlu1 %v8585_v9 }
 0x5e8   : > { %v3443_v43 = vpop.f32.mrf.mxu0  ;;  %6591 = vmatprep.subr.mxu1 %v8481_v54  ;;  %v6490_v18 = vpop.f32.mrf.mxu1  ;;  %v8592_v25 = vmul.f32 %v8360_v46, %v7035_v30  ;;  %7060 = vpow2.f32 %v3514_v57  ;;  %v2946_v59 = vadd.f32 1e-06, %v2930_v42 }
 0x5e9   : > { %v7037_v29 = vpop.eup %7036  ;;  %v3520_v11 = vmul.f32 1.442695, %v5487_v7  ;;  %v5486_v15 = vclamps-f32 %v3443_v43, 5.0  ;;  %6592 = vmatpush3.msra.mxu1 %v8481_v54  ;;  %6511 = vmatprep.mubr.msk.f32.mxu1 %vm744_vm2, %v2956_v61  ;;  %7062 = vrcp.f32 %v2944_v41 }
 0x5ea   : > { %v7039_v33 = vpop.eup %7038  ;;  %v6584_v55 = vpop.f32.mrf.mxu0  ;;  %6593 = vmatprep.subr.mxu1 %v8483_v37  ;;  %6512 = vmatmul.mubr.msk.f32.gmra.mxu1 %vm744_vm2, %v2958_v52  ;;  %v2962_v54 = vmul.f32 %v7037_v29, %v6490_v18 }
 0x5eb   : > { %v2850_v31 = vpop.f32.mrf.mxu1  ;;  %v7041_v45 = vpop.eup %7040  ;;  %7064 = vpow2.f32 %v3520_v11  ;;  %v3518_v46 = vmul.f32 1.442695, %v5486_v15  ;;  %v5489_v4 = vclamps-f32 %v6584_v55, 5.0  ;;  %6594 = vmatpush3.msra.mxu1 %v8483_v37  ;;  %3743 = vadd.xlane.f32.xlu0 %v8592_v25 }
 0x5ec   : > { %v2960_v12 = vmul.f32 %v7039_v33, %v2850_v31  ;;  %7066 = vrcp.f32 %v2945_v27  ;;  %v3453_v35 = vpop.f32.mrf.mxu0  ;;  %6595 = vmatprep.subr.mxu1 %v8485_v39  ;;  %v7043_v36 = vpop.eup %7042  ;;  %v8604_v50 = vmul.f32 %v8393_v22, %v7041_v45 }
 0x5ed   : > { %v6493_v32 = vpop.f32.mrf.mxu1  ;;  %7068 = vpow2.f32 %v3518_v46  ;;  %v3524_v47 = vmul.f32 1.442695, %v5489_v4  ;;  %v5488_v1 = vclamps-f32 %v3453_v35, 5.0  ;;  %6596 = vmatpush3.msra.mxu1 %v8485_v39  ;;  %v7045_v37 = vpop.eup %7044  ;;  %v8609_v49 = vmul.f32 %v8385_v16, %v7043_v36 }
 0x5ee   : > { %6514 = vmatprep.mubr.msk.f32.mxu1 %vm744_vm2, %v2960_v12  ;;  %7070 = vrcp.f32 %v2946_v59  ;;  %6597 = vmatprep.subr.mxu1 %v8487_v20  ;;  %v7047_v44 = vpop.eup %7046  ;;  %v3547_v46 = vpop.permute.xlu0 %3546 }
 0x5ef   : > { %v2860_v41 = vpop.f32.mrf.mxu1  ;;  %6515 = vmatmul.mubr.msk.f32.gmra.mxu1 %vm744_vm2, %v2962_v54  ;;  %7072 = vpow2.f32 %v3524_v47  ;;  %v3522_v30 = vmul.f32 1.442695, %v5488_v1  ;;  %3749 = vadd.xlane.f32.xlu1 %v8604_v50  ;;  %v7049_v22 = vpop.eup %7048  ;;  %v2966_v39 = vmul.f32 %v7047_v44, %v6493_v32 }
 0x5f0   : > { %v2964_v42 = vmul.f32 %v7045_v37, %v2860_v41  ;;  %6598 = vmatpush3.msra.mxu1 %v8487_v20  ;;  %3747 = vadd.xlane.f32.xlu0 %v8609_v49  ;;  %v7051_v7 = vpop.eup %7050  ;;  %v8618_v16 = vmul.f32 %v8416_v6, %v7049_v22  ;;  %v3545_v36 = vpop.permute.xlu1 %3544  ;;  %v9178_v41 = vld [vmem:[#allocation32_spill] sm:$0xff] }
 0x5f1   : > { %6599 = vmatprep.subr.mxu1 %v8489_v40  ;;  %v6496_v57 = vpop.f32.mrf.mxu1  ;;  %7074 = vpow2.f32 %v3522_v30  ;;  %v7053_v61 = vpop.eup %7052  ;;  %v9179_v30 = vld [vmem:[#allocation6_spill] sm:$0xff] }
 0x5f2   : > { %6600 = vmatpush3.msra.mxu1 %v8489_v40  ;;  %6517 = vmatprep.mubr.msk.f32.mxu1 %vm744_vm2, %v2964_v42  ;;  %v7055_v27 = vpop.eup %7054  ;;  %v8625_v43 = vmul.f32 %v8408_v2, %v7053_v61  ;;  %v9180_v61 = vld [vmem:[#allocation21_spill] sm:$0xff] }
 0x5f3   : > { %6601 = vmatprep.subr.mxu1 %v8491_v26  ;;  %v2870_v20 = vpop.f32.mrf.mxu1  ;;  %6518 = vmatmul.mubr.msk.f32.gmra.mxu1 %vm744_vm2, %v2966_v39  ;;  %v7057_v40 = vpop.eup %7056  ;;  %v2970_v29 = vmul.f32 %v7055_v27, %v6496_v57 }
 0x5f4   : > { %v2968_v52 = vmul.f32 %v7051_v7, %v2870_v20  ;;  %6602 = vmatpush3.msra.mxu1 %v8491_v26  ;;  %3753 = vadd.xlane.f32.xlu1 %v8618_v16  ;;  %v7059_v18 = vpop.eup %7058  ;;  %v3537_v11 = vmul.f32 %v8436_v38, %v7057_v40 }
 0x5f5   : > { %6603 = vmatprep.subr.mxu1 %v8493_v58  ;;  %v6499_v6 = vpop.f32.mrf.mxu1  ;;  %3751 = vadd.xlane.f32.xlu0 %v8625_v43  ;;  %v7061_v15 = vpop.eup %7060 }
 0x5f6   : > { %6604 = vmatpush3.msra.mxu1 %v8493_v58  ;;  %6520 = vmatprep.mubr.msk.f32.mxu1 %vm744_vm2, %v2968_v52  ;;  %v7063_v2 = vpop.eup %7062  ;;  %v3536_v59 = vmul.f32 %v8428_v8, %v7061_v15  ;;  %v9182_v15 = vld [vmem:[#allocation19_spill] sm:$0xff] }
 0x5f7   : > { %6605 = vmatprep.subr.mxu1 %v8495_v23  ;;  %v2880_v26 = vpop.f32.mrf.mxu1  ;;  %6521 = vmatmul.mubr.msk.f32.gmra.mxu1 %vm744_vm2, %v2970_v29  ;;  %v2974_v45 = vmul.f32 %v7063_v2, %v6499_v6 }
 0x5f8   : > { %v2972_v33 = vmul.f32 %v7059_v18, %v2880_v26  ;;  %3757 = vadd.xlane.f32.xlu1 %v3537_v11  ;;  %v7065_v55 = vpop.eup %7064  ;;  %6606 = vmatpush3.msra.mxu1 %v8495_v23  ;;  %v9181_v18 = vld [vmem:[#allocation20_spill] sm:$0xff] }
 0x5f9   : > { %v6502_v31 = vpop.f32.mrf.mxu1  ;;  %v7067_v58 = vpop.eup %7066  ;;  %6607 = vmatprep.subr.mxu1 %v8497_v63  ;;  %3755 = vadd.xlane.f32.xlu0 %v3536_v59  ;;  %v3539_v12 = vmul.f32 %v8450_v56, %v7065_v55 }
 0x5fa   : > { %v7069_v38 = vpop.eup %7068  ;;  %6608 = vmatpush3.msra.mxu1 %v8497_v63  ;;  %6523 = vmatprep.mubr.msk.f32.mxu1 %vm744_vm2, %v2972_v33 }
 0x5fb   : > { %v2890_v4 = vpop.f32.mrf.mxu1  ;;  %v7071_v54 = vpop.eup %7070  ;;  %6609 = vmatprep.subr.mxu1 %v8502_v3  ;;  %6524 = vmatmul.mubr.msk.f32.gmra.mxu1 %vm744_vm2, %v2974_v45  ;;  %v3538_v23 = vmul.f32 %v8443_v19, %v7069_v38 }
 0x5fc   : > { %v2976_v8 = vmul.f32 %v7067_v58, %v2890_v4  ;;  %v7073_v35 = vpop.eup %7072  ;;  %6610 = vmatpush3.msra.mxu1 %v8502_v3  ;;  %3761 = vadd.xlane.f32.xlu1 %v3539_v12  ;;  %v2978_v32 = vmul.f32 %v7071_v54, %v6502_v31  ;;  %v3543_v19 = vpop.permute.xlu0 %3542  ;;  %v4027_v3 = vld [vmem:[%s9057_s2 + $0x60] sm:$0xff] }
 0x5fd   : > { %6611 = vmatprep.subr.mxu1 %v3547_v46  ;;  %3759 = vadd.xlane.f32.xlu0 %v3538_v23  ;;  %v3541_v56 = vmul.f32 %v8463_v5, %v7073_v35  ;;  %v4028_v5 = vld [vmem:[%s9057_s2 + $0x68] sm:$0xff]  ;;  %v9184_v31 = vld [vmem:[#allocation22_spill] sm:$0xff] }
 0x5fe   : > { %v7075_v63 = vpop.eup %7074  ;;  %6612 = vmatpush3.msra.mxu1 %v3547_v46  ;;  %6526 = vmatprep.mubr.msk.f32.mxu1 %vm744_vm2, %v2976_v8  ;;  %v9185_v4 = vld [vmem:[#allocation26_spill] sm:$0xff] }
 0x5ff   : > { %6613 = vmatprep.subr.mxu1 %v3545_v36  ;;  %6527 = vmatmul.mubr.msk.f32.gmra.mxu1 %vm744_vm2, %v2978_v32  ;;  %v3540_v47 = vmul.f32 %v8456_v51, %v7075_v63  ;;  %v3815_v51 = vld [vmem:[%s9057_s2 + $0x48] sm:$0xff]  ;;  %v9187_v63 = vld [vmem:[#allocation30_spill] sm:$0xff] }
 0x600   : > { %6614 = vmatpush3.msra.mxu1 %v3545_v36  ;;  %6617 = vmatprep.mubr.f32.mxu1 %v8566_v60  ;;  %v4025_v60 = vld [vmem:[%s9057_s2 + $0x50] sm:$0xff] }
 0x601   : > { %6615 = vmatprep.subr.mxu1 %v3543_v19  ;;  %3765 = vadd.xlane.f32.xlu1 %v3541_v56 }
 0x602   : > { %3763 = vadd.xlane.f32.xlu0 %v3540_v47  ;;  %6616 = vmatpush3.msra.mxu1 %v3543_v19 }
 0x603   : > { %6618 = vmatmul.mubr.f32.vlgmr.msra.gmra.mxu1 %v8562_v14  ;;  %6641 = vmatprep.subr.mxu1 %v3815_v51  ;;  %v4026_v14 = vld [vmem:[%s9057_s2 + $0x58] sm:$0xff] }
 0x604   : > { %6620 = vmatprep.mubr.f32.mxu1 %v8578_v17  ;;  %6642 = vmatpush3.msra.mxu1 %v3815_v51  ;;  %v9176_v17 = vld [vmem:[#allocation2_spill] sm:$0xff] }
 0x605   : > { %6667 = vmatprep.subr.mxu0 %v4028_v5 }
 0x606   : > { %6668 = vmatpush3.msra.mxu0 %v4028_v5  ;;  %v9188_v5 = vld [vmem:[#allocation23_spill] sm:$0xff] }
 0x607   : > { %6621 = vmatmul.mubr.f32.gmra.mxu1 %v8572_v28  ;;  %6669 = vmatprep.subr.mxu0 %v4027_v3  ;;  %v7124_v28 = vld [vmem:[%s9058_s3 + $0x2] ss:$0 sm:$0xff] }
 0x608   : > { %6623 = vmatprep.mubr.f32.mxu1 %v8592_v25  ;;  %6670 = vmatpush3.msra.mxu0 %v4027_v3  ;;  %v9177_v25 = vld [vmem:[#allocation4_spill] sm:$0xff]  ;;  %v664_v42 = vmul.f32 %v7124_v28, %v9179_v30 }
 0x609   : > { %6671 = vmatprep.subr.mxu0 %v4026_v14  ;;  %v662_v1 = vmul.f32 %v7124_v28, %v9177_v25 }
 0x60a   : > { %6672 = vmatpush3.msra.mxu0 %v4026_v14 }
 0x60b   : > { %6624 = vmatmul.mubr.f32.gmra.mxu1 %v8585_v9  ;;  %6673 = vmatprep.subr.mxu0 %v4025_v60  ;;  %v660_v9 = vmul.f32 %v7124_v28, %v9176_v17 }
 0x60c   : > { %6626 = vmatprep.mubr.f32.mxu1 %v8609_v49  ;;  %6674 = vmatpush3.msra.mxu0 %v4025_v60 }
 0x60f   : > { %6627 = vmatmul.mubr.f32.gmra.mxu1 %v8604_v50  ;;  %v7125_v50 = vld [vmem:[%s9058_s3 + $0x1] ss:$0 sm:$0xff] }
 0x610   : > { %6629 = vmatprep.mubr.f32.mxu1 %v8625_v43  ;;  %v680_v37 = vadd.f32 %v7125_v50, %v660_v9  ;;  %v682_v22 = vadd.f32 %v7125_v50, %v662_v1  ;;  %v684_v40 = vadd.f32 %v7125_v50, %v664_v42 }
 0x612   : > { %v1501_v49 = vadd.f32 %v9178_v41, %v680_v37  ;;  %v1503_v20 = vadd.f32 %v9180_v61, %v682_v22 }
 0x613   : > { %6630 = vmatmul.mubr.f32.gmra.mxu1 %v8618_v16 }
 0x614   : > { %6632 = vmatprep.mubr.f32.mxu1 %v3536_v59  ;;  %v2337_v39 = vadd.f32 %v8504_v48, %v1501_v49  ;;  %v2339_v6 = vadd.f32 %v8509_v62, %v1503_v20  ;;  %v1505_v48 = vadd.f32 %v9182_v15, %v684_v40  ;;  %v9183_v59 = vld [vmem:[#allocation24_spill] sm:$0xff] }
 0x616   : > { %v2341_v55 = vadd.f32 %v9183_v59, %v1505_v48 }
 0x617   : > { %6633 = vmatmul.mubr.f32.gmra.mxu1 %v3537_v11 }
 0x618   : > { %6635 = vmatprep.mubr.f32.mxu1 %v3538_v23  ;;  %v9186_v23 = vld [vmem:[#allocation28_spill] sm:$0xff] }
 0x61b   : > { %6636 = vmatmul.mubr.f32.gmra.mxu1 %v3539_v12 }
 0x61c   : > { %6638 = vmatprep.mubr.f32.mxu1 %v3540_v47 }
 0x61f   : > { %6639 = vmatmul.mubr.f32.gmra.mxu1 %v3541_v56 }
 0x666   : > { %v3738_v27 = vpop.xlane.xlu0 %3737 }
 0x667   : > { %v3768_v19 = vadd.f32 1e-06, %v3738_v27 }
 0x668   : > { %v3736_v7 = vpop.xlane.xlu1 %3735 }
 0x669   : > { %v3767_v56 = vadd.f32 1e-06, %v3736_v7 }
 0x66b   : > { %7076 = vrcp.f32 %v3767_v56 }
 0x66c   : > { %v3742_v2 = vpop.xlane.xlu1 %3741  ;;  %7078 = vrcp.f32 %v3768_v19 }
 0x66d   : > { %v3740_v26 = vpop.xlane.xlu0 %3739  ;;  %v3770_v9 = vadd.f32 1e-06, %v3742_v2 }
 0x66e   : > { %v3769_v28 = vadd.f32 1e-06, %v3740_v26 }
 0x670   : > { %v3746_v54 = vpop.xlane.xlu1 %3745  ;;  %7080 = vrcp.f32 %v3769_v28 }
 0x671   : > { %7082 = vrcp.f32 %v3770_v9  ;;  %v3772_v30 = vadd.f32 1e-06, %v3746_v54 }
 0x674   : > { %v3744_v46 = vpop.xlane.xlu0 %3743 }
 0x675   : > { %v3771_v41 = vadd.f32 1e-06, %v3744_v46 }
 0x677   : > { %7084 = vrcp.f32 %v3771_v41 }
 0x678   : > { %v3750_v14 = vpop.xlane.xlu1 %3749  ;;  %7086 = vrcp.f32 %v3772_v30  ;;  %v7077_v40 = vpop.eup %7076 }
 0x679   : > { %v3748_v51 = vpop.xlane.xlu0 %3747  ;;  %v3774_v7 = vadd.f32 1e-06, %v3750_v14 }
 0x67d   : > { %v3754_v49 = vpop.xlane.xlu1 %3753 }
 0x67e   : > { %v3752_v50 = vpop.xlane.xlu0 %3751 }
 0x681   : > { %v3758_v20 = vpop.xlane.xlu1 %3757 }
 0x685   : > { %v3762_v2 = vpop.xlane.xlu1 %3761 }
 0x686   : > { %v3780_v54 = vadd.f32 1e-06, %v3762_v2 }
 0x6a2   : > { %v6507_v44 = vpop.f32.mrf.mxu1 }
 0x6a3   : > { %v8685_v57 = vadd.f32 %v6507_v44, %v8500_v0 }
 0x6a4   : > { %v3094_v16 = vpop.f32.mrf.mxu1 }
 0x6a5   : > { %v8688_v52 = vadd.f32 %v3094_v16, %v2337_v39  ;;  %v3773_v39 = vadd.f32 1e-06, %v3748_v51  ;;  %v3756_v16 = vpop.xlane.xlu0 %3755 }
 0x6a6   : > { %v6510_v43 = vpop.f32.mrf.mxu1  ;;  %v3777_v26 = vadd.f32 1e-06, %v3756_v16 }
 0x6a7   : > { %v8692_v29 = vadd.f32 %v6510_v43, %v9181_v18  ;;  %7088 = vrcp.f32 %v3773_v39  ;;  %v3775_v43 = vadd.f32 1e-06, %v3752_v50  ;;  %v7079_v18 = vpop.eup %7078 }
 0x6a8   : > { %v3104_v11 = vpop.f32.mrf.mxu1  ;;  %7090 = vrcp.f32 %v3774_v7 }
 0x6a9   : > { %v8695_v0 = vadd.f32 %v3104_v11, %v2339_v6  ;;  %v3760_v15 = vpop.xlane.xlu0 %3759  ;;  %7092 = vrcp.f32 %v3775_v43 }
 0x6aa   : > { %v6513_v33 = vpop.f32.mrf.mxu1  ;;  %v3779_v46 = vadd.f32 1e-06, %v3760_v15 }
 0x6ab   : > { %v8699_v58 = vadd.f32 %v6513_v33, %v9184_v31  ;;  %v7081_v33 = vpop.eup %7080 }
 0x6ac   : > { %v3114_v45 = vpop.f32.mrf.mxu1 }
 0x6ad   : > { %v8701_v38 = vadd.f32 %v3114_v45, %v2341_v55  ;;  %v7083_v55 = vpop.eup %7082 }
 0x6af   : > { %v6516_v62 = vpop.f32.mrf.mxu1 }
 0x6b0   : > { %v8704_v12 = vadd.f32 %v6516_v62, %v9185_v4  ;;  %v7085_v4 = vpop.eup %7084 }
 0x6b1   : > { %v3124_v8 = vpop.f32.mrf.mxu1 }
 0x6b2   : > { %v8707_v35 = vadd.f32 %v3124_v8, %v9186_v23  ;;  %v3764_v8 = vpop.xlane.xlu0 %3763 }
 0x6b3   : > { %v6519_v32 = vpop.f32.mrf.mxu1  ;;  %v3781_v51 = vadd.f32 1e-06, %v3764_v8 }
 0x6b4   : > { %v8710_v36 = vadd.f32 %v6519_v32, %v9187_v63  ;;  %v7087_v32 = vpop.eup %7086  ;;  %v3766_v63 = vpop.xlane.xlu1 %3765 }
 0x6b5   : > { %v3134_v47 = vpop.f32.mrf.mxu1  ;;  %v3782_v14 = vadd.f32 1e-06, %v3766_v63 }
 0x6b6   : > { %v8713_v3 = vadd.f32 %v3134_v47, %v9188_v5  ;;  %v7089_v5 = vpop.eup %7088 }
 0x6b7   : > { %v6522_v60 = vpop.f32.mrf.mxu1  ;;  %v7091_v28 = vpop.eup %7090 }
 0x6b8   : > { %v8716_v17 = vadd.f32 %v6522_v60, %v8541_v53 }
 0x6b9   : > { %v3144_v25 = vpop.f32.mrf.mxu1 }
 0x6ba   : > { %v8719_v1 = vadd.f32 %v3144_v25, %v8544_v24 }
 0x6bb   : > { %v6525_v37 = vpop.f32.mrf.mxu1 }
 0x6bc   : > { %v8722_v44 = vadd.f32 %v6525_v37, %v8550_v21  ;;  %v7093_v37 = vpop.eup %7092 }
 0x6bd   : > { %v3154_v42 = vpop.f32.mrf.mxu1 }
 0x6be   : > { %v8725_v53 = vadd.f32 %v3154_v42, %v8553_v10  ;;  %v3776_v10 = vadd.f32 1e-06, %v3754_v49 }
 0x6bf   : > { %v6528_v22 = vpop.f32.mrf.mxu1 }
 0x6c0   : > { %v8728_v24 = vadd.f32 %v6528_v22, %v8557_v34  ;;  %7094 = vrcp.f32 %v3776_v10 }
 0x6c1   : > { %v3164_v61 = vpop.f32.mrf.mxu1  ;;  %7096 = vrcp.f32 %v3777_v26 }
 0x6c2   : > { %v8731_v21 = vadd.f32 %v3164_v61, %v8559_v13  ;;  %v3778_v13 = vadd.f32 1e-06, %v3758_v20 }
 0x6c3   : > { %v6619_v27 = vpop.f32.mrf.mxu1 }
 0x6c4   : > { %v3786_v34 = vmul.f32 %v7079_v18, %v6619_v27  ;;  %7098 = vrcp.f32 %v3778_v13  ;;  %v4249_v13 = vld [vmem:[%s9057_s2 + $0xa0] sm:$0xff] }
 0x6c5   : > { %v3656_v6 = vpop.f32.mrf.mxu1  ;;  %7100 = vrcp.f32 %v3779_v46 }
 0x6c6   : > { %v3784_v11 = vmul.f32 %v7077_v40, %v3656_v6  ;;  %7102 = vrcp.f32 %v3780_v54 }
 0x6c7   : > { %v6622_v48 = vpop.f32.mrf.mxu1  ;;  %7104 = vrcp.f32 %v3781_v51 }
 0x6c8   : > { %6643 = vmatprep.mubr.msk.f32.mxu1 %vm744_vm2, %v3784_v11  ;;  %v3790_v45 = vmul.f32 %v7083_v55, %v6622_v48  ;;  %7106 = vrcp.f32 %v3782_v14  ;;  %v4247_v55 = vld [vmem:[%s9057_s2 + $0x90] sm:$0xff] }
 0x6c9   : > { %v3666_v59 = vpop.f32.mrf.mxu1  ;;  %6644 = vmatmul.mubr.msk.f32.vlgmr.msra.gmra.mxu1 %vm744_vm2, %v3786_v34 }
 0x6ca   : > { %v3788_v31 = vmul.f32 %v7081_v33, %v3666_v59  ;;  %v4250_v33 = vld [vmem:[%s9057_s2 + $0xa8] sm:$0xff]  ;;  %v4248_v59 = vld [vmem:[%s9057_s2 + $0x98] sm:$0xff] }
 0x6cb   : > { %v6625_v62 = vpop.f32.mrf.mxu1  ;;  %6699 = vmatprep.subr.mxu1 %v4250_v33 }
 0x6cc   : > { %6646 = vmatprep.mubr.msk.f32.mxu1 %vm744_vm2, %v3788_v31  ;;  %v3794_v47 = vmul.f32 %v7087_v32, %v6625_v62  ;;  %6700 = vmatpush3.msra.mxu1 %v4250_v33  ;;  %v4246_v31 = vld [vmem:[%s9057_s2 + $0x88] sm:$0xff]  ;;  %v4244_v62 = vld [vmem:[%s9057_s2 + $0x78] sm:$0xff] }
 0x6cd   : > { %v3676_v23 = vpop.f32.mrf.mxu1  ;;  %6647 = vmatmul.mubr.msk.f32.gmra.mxu1 %vm744_vm2, %v3790_v45  ;;  %v7095_v49 = vpop.eup %7094  ;;  %6701 = vmatprep.subr.mxu1 %v4249_v13  ;;  %v4245_v45 = vld [vmem:[%s9057_s2 + $0x80] sm:$0xff] }
 0x6ce   : > { %v3792_v56 = vmul.f32 %v7085_v4, %v3676_v23  ;;  %v7097_v39 = vpop.eup %7096  ;;  %6702 = vmatpush3.msra.mxu1 %v4249_v13 }
 0x6cf   : > { %v6628_v19 = vpop.f32.mrf.mxu1  ;;  %6703 = vmatprep.subr.mxu1 %v4248_v59 }
 0x6d0   : > { %6649 = vmatprep.mubr.msk.f32.mxu1 %vm744_vm2, %v3792_v56  ;;  %v3798_v25 = vmul.f32 %v7091_v28, %v6628_v19  ;;  %6704 = vmatpush3.msra.mxu1 %v4248_v59 }
 0x6d1   : > { %v3686_v60 = vpop.f32.mrf.mxu1  ;;  %6650 = vmatmul.mubr.msk.f32.gmra.mxu1 %vm744_vm2, %v3794_v47  ;;  %v7099_v16 = vpop.eup %7098  ;;  %6705 = vmatprep.subr.mxu1 %v4247_v55 }
 0x6d2   : > { %v3796_v9 = vmul.f32 %v7089_v5, %v3686_v60  ;;  %v7101_v43 = vpop.eup %7100  ;;  %6706 = vmatpush3.msra.mxu1 %v4247_v55 }
 0x6d3   : > { %v6631_v50 = vpop.f32.mrf.mxu1  ;;  %v7103_v10 = vpop.eup %7102  ;;  %6707 = vmatprep.subr.mxu1 %v4246_v31 }
 0x6d4   : > { %6652 = vmatprep.mubr.msk.f32.mxu1 %vm744_vm2, %v3796_v9  ;;  %v3802_v42 = vmul.f32 %v7095_v49, %v6631_v50  ;;  %v7105_v15 = vpop.eup %7104  ;;  %6708 = vmatpush3.msra.mxu1 %v4246_v31  ;;  %v4487_v49 = vld [vmem:[%s9057_s2 + $0xb0] sm:$0xff] }
 0x6d5   : > { %v3696_v41 = vpop.f32.mrf.mxu1  ;;  %6653 = vmatmul.mubr.msk.f32.gmra.mxu1 %vm744_vm2, %v3798_v25  ;;  %v7107_v48 = vpop.eup %7106  ;;  %6709 = vmatprep.subr.mxu1 %v4245_v45 }
 0x6d6   : > { %v3800_v30 = vmul.f32 %v7093_v37, %v3696_v41  ;;  %6710 = vmatpush3.msra.mxu1 %v4245_v45 }
 0x6d7   : > { %v6634_v22 = vpop.f32.mrf.mxu1  ;;  %6711 = vmatprep.subr.mxu1 %v4244_v62 }
 0x6d8   : > { %6655 = vmatprep.mubr.msk.f32.mxu1 %vm744_vm2, %v3800_v30  ;;  %v3806_v20 = vmul.f32 %v7099_v16, %v6634_v22  ;;  %6712 = vmatpush3.msra.mxu1 %v4244_v62  ;;  %v8868_v30 = vld [vmem:[%s9058_s3 + $0x3] ss:$0 sm:$0xff] }
 0x6d9   : > { %v3706_v7 = vpop.f32.mrf.mxu1  ;;  %6656 = vmatmul.mubr.msk.f32.gmra.mxu1 %vm744_vm2, %v3802_v42 }
 0x6da   : > { %v3804_v61 = vmul.f32 %v7097_v39, %v3706_v7 }
 0x6db   : > { %v6637_v27 = vpop.f32.mrf.mxu1 }
 0x6dc   : > { %6658 = vmatprep.mubr.msk.f32.mxu1 %vm744_vm2, %v3804_v61  ;;  %v3810_v18 = vmul.f32 %v7103_v10, %v6637_v27 }
 0x6dd   : > { %v3716_v40 = vpop.f32.mrf.mxu1  ;;  %6659 = vmatmul.mubr.msk.f32.gmra.mxu1 %vm744_vm2, %v3806_v20 }
 0x6de   : > { %v3808_v6 = vmul.f32 %v7101_v43, %v3716_v40 }
 0x6df   : > { %v6640_v11 = vpop.f32.mrf.mxu1 }
 0x6e0   : > { %6661 = vmatprep.mubr.msk.f32.mxu1 %vm744_vm2, %v3808_v6  ;;  %v3814_v2 = vmul.f32 %v7107_v48, %v6640_v11 }
 0x6e1   : > { %v3726_v34 = vpop.f32.mrf.mxu1  ;;  %6662 = vmatmul.mubr.msk.f32.gmra.mxu1 %vm744_vm2, %v3810_v18 }
 0x6e2   : > { %v3812_v26 = vmul.f32 %v7105_v15, %v3726_v34 }
 0x6e4   : > { %6664 = vmatprep.mubr.msk.f32.mxu1 %vm744_vm2, %v3812_v26 }
 0x6e5   : > { %6665 = vmatmul.mubr.msk.f32.gmra.mxu1 %vm744_vm2, %v3814_v2 }
 0x789   : > { %v6645_v46 = vpop.f32.mrf.mxu1 }
 0x78a   : > { %v8774_v8 = vadd.f32 %v6645_v46, %v8685_v57 }
 0x78b   : > { %v3930_v4 = vpop.f32.mrf.mxu1 }
 0x78c   : > { %v8771_v54 = vadd.f32 %v3930_v4, %v8688_v52 }
 0x78d   : > { %v6648_v23 = vpop.f32.mrf.mxu1 }
 0x78e   : > { %6675 = vmatprep.mubr.msk.f32.mxu0 %vm460_vm1, %v8771_v54  ;;  %v8784_v56 = vadd.f32 %v6648_v23, %v8692_v29 }
 0x78f   : > { %v3940_v32 = vpop.f32.mrf.mxu1  ;;  %6676 = vmatmul.mubr.msk.f32.vlgmr.msra.gmra.mxu0 %vm460_vm1, %v8774_v8 }
 0x790   : > { %v8781_v63 = vadd.f32 %v3940_v32, %v8695_v0 }
 0x791   : > { %v6651_v47 = vpop.f32.mrf.mxu1 }
 0x792   : > { %6678 = vmatprep.mubr.msk.f32.mxu0 %vm460_vm1, %v8781_v63  ;;  %v8794_v19 = vadd.f32 %v6651_v47, %v8699_v58 }
 0x793   : > { %v3950_v57 = vpop.f32.mrf.mxu1  ;;  %6679 = vmatmul.mubr.msk.f32.gmra.mxu0 %vm460_vm1, %v8784_v56 }
 0x794   : > { %v8791_v52 = vadd.f32 %v3950_v57, %v8701_v38 }
 0x795   : > { %v6654_v51 = vpop.f32.mrf.mxu1 }
 0x796   : > { %6681 = vmatprep.mubr.msk.f32.mxu0 %vm460_vm1, %v8791_v52  ;;  %v8804_v5 = vadd.f32 %v6654_v51, %v8704_v12 }
 0x797   : > { %v3960_v29 = vpop.f32.mrf.mxu1  ;;  %6682 = vmatmul.mubr.msk.f32.gmra.mxu0 %vm460_vm1, %v8794_v19 }
 0x798   : > { %v8801_v0 = vadd.f32 %v3960_v29, %v8707_v35 }
 0x799   : > { %v6657_v14 = vpop.f32.mrf.mxu1 }
 0x79a   : > { %6684 = vmatprep.mubr.msk.f32.mxu0 %vm460_vm1, %v8801_v0  ;;  %v8814_v60 = vadd.f32 %v6657_v14, %v8710_v36 }
 0x79b   : > { %v3970_v58 = vpop.f32.mrf.mxu1  ;;  %6685 = vmatmul.mubr.msk.f32.gmra.mxu0 %vm460_vm1, %v8804_v5 }
 0x79c   : > { %v8811_v38 = vadd.f32 %v3970_v58, %v8713_v3 }
 0x79d   : > { %v6660_v28 = vpop.f32.mrf.mxu1 }
 0x79e   : > { %6687 = vmatprep.mubr.msk.f32.mxu0 %vm460_vm1, %v8811_v38  ;;  %v8824_v9 = vadd.f32 %v6660_v28, %v8716_v17 }
 0x79f   : > { %v3980_v12 = vpop.f32.mrf.mxu1  ;;  %6688 = vmatmul.mubr.msk.f32.gmra.mxu0 %vm460_vm1, %v8814_v60 }
 0x7a0   : > { %v8821_v35 = vadd.f32 %v3980_v12, %v8719_v1 }
 0x7a1   : > { %v6663_v25 = vpop.f32.mrf.mxu1 }
 0x7a2   : > { %6690 = vmatprep.mubr.msk.f32.mxu0 %vm460_vm1, %v8821_v35  ;;  %v8834_v50 = vadd.f32 %v6663_v25, %v8722_v44  ;;  %v4243_v44 = vld [vmem:[%s9057_s2 + $0x70] sm:$0xff] }
 0x7a3   : > { %v3990_v36 = vpop.f32.mrf.mxu1  ;;  %6691 = vmatmul.mubr.msk.f32.gmra.mxu0 %vm460_vm1, %v8824_v9  ;;  %6713 = vmatprep.subr.mxu1 %v4243_v44 }
 0x7a4   : > { %v8831_v3 = vadd.f32 %v3990_v36, %v8725_v53  ;;  %6714 = vmatpush3.msra.mxu1 %v4243_v44  ;;  %v4490_v53 = vld [vmem:[%s9057_s2 + $0xc8] sm:$0xff] }
 0x7a5   : > { %v6666_v37 = vpop.f32.mrf.mxu1  ;;  %6739 = vmatprep.subr.mxu0 %v4490_v53  ;;  %6825 = vmatprep.subr.mxu1 %v4490_v53 }
 0x7a6   : > { %6693 = vmatprep.mubr.msk.f32.mxu0 %vm460_vm1, %v8831_v3  ;;  %v8844_v41 = vadd.f32 %v6666_v37, %v8728_v24  ;;  %v4489_v24 = vld [vmem:[%s9057_s2 + $0xc0] sm:$0xff]  ;;  %6740 = vmatpush3.msra.mxu0 %v4490_v53 }
 0x7a7   : > { %v4000_v17 = vpop.f32.mrf.mxu1  ;;  %6694 = vmatmul.mubr.msk.f32.gmra.mxu0 %vm460_vm1, %v8834_v50  ;;  %6741 = vmatprep.subr.mxu0 %v4489_v24 }
 0x7a8   : > { %v8841_v1 = vadd.f32 %v4000_v17, %v8731_v21  ;;  %v4488_v21 = vld [vmem:[%s9057_s2 + $0xb8] sm:$0xff]  ;;  %6742 = vmatpush3.msra.mxu0 %v4489_v24 }
 0x7a9   : > { %6743 = vmatprep.subr.mxu0 %v4488_v21 }
 0x7aa   : > { %6696 = vmatprep.mubr.msk.f32.mxu0 %vm460_vm1, %v8841_v1  ;;  %6744 = vmatpush3.msra.mxu0 %v4488_v21 }
 0x7ab   : > { %6697 = vmatmul.mubr.msk.f32.gmra.mxu0 %vm460_vm1, %v8844_v41  ;;  %6745 = vmatprep.subr.mxu0 %v4487_v49 }
 0x7ac   : > { %6746 = vmatpush3.msra.mxu0 %v4487_v49 }
 0x84f   : > { %v6677_v42 = vpop.f32.mrf.mxu0 }
 0x850   : > { %v4154_v22 = vadd.f32 %v6677_v42, %v8868_v30 }
 0x851   : > { %v4148_v39 = vpop.f32.mrf.mxu0 }
 0x852   : > { %v4149_v7 = vadd.f32 %v8868_v30, %v4148_v39  ;;  %v4228_v20 = vmax.f32 %v4154_v22, 0.0  ;;  %v8905_v22 = vld [vmem:[%s9057_s2 + $0xd8] sm:$0xff] }
 0x853   : > { %v6680_v16 = vpop.f32.mrf.mxu0 }
 0x854   : > { %v4227_v61 = vmax.f32 %v4149_v7, 0.0  ;;  %v4164_v27 = vadd.f32 %v6680_v16, %v8868_v30  ;;  %v8916_v7 = vld [vmem:[%s9058_s3 + $0x5] ss:$0 sm:$0xff] }
 0x855   : > { %v4158_v43 = vpop.f32.mrf.mxu0 }
 0x856   : > { %v4159_v40 = vadd.f32 %v8868_v30, %v4158_v43  ;;  %6715 = vmatprep.mubr.msk.f32.mxu1 %vm4256_vm3, %v4227_v61  ;;  %v4230_v18 = vmax.f32 %v4164_v27, 0.0  ;;  %v4456_v43 = vmul.f32 %v8916_v7, %v8774_v8 }
 0x857   : > { %v6683_v10 = vpop.f32.mrf.mxu0  ;;  %6716 = vmatmul.mubr.msk.f32.vlgmr.msra.gmra.mxu1 %vm4256_vm3, %v4228_v20  ;;  %v4455_v20 = vmul.f32 %v8916_v7, %v8771_v54  ;;  %v4458_v54 = vmul.f32 %v8916_v7, %v8784_v56 }
 0x858   : > { %v4229_v6 = vmax.f32 %v4159_v40, 0.0  ;;  %6829 = vmatpush3.msra.mxu1 %v4490_v53  ;;  %v4174_v11 = vadd.f32 %v6683_v10, %v8868_v30 }
 0x859   : > { %v4168_v15 = vpop.f32.mrf.mxu0  ;;  %6826 = vmatprep.subr.mxu1 %v4489_v24 }
 0x85a   : > { %v4169_v34 = vadd.f32 %v8868_v30, %v4168_v15  ;;  %6718 = vmatprep.mubr.msk.f32.mxu1 %vm4256_vm3, %v4229_v6  ;;  %6830 = vmatpush3.msra.mxu1 %v4489_v24  ;;  %v4232_v2 = vmax.f32 %v4174_v11, 0.0  ;;  %v4457_v15 = vmul.f32 %v8916_v7, %v8781_v63 }
 0x85b   : > { %v6686_v48 = vpop.f32.mrf.mxu0  ;;  %6719 = vmatmul.mubr.msk.f32.gmra.mxu1 %vm4256_vm3, %v4230_v18  ;;  %6827 = vmatprep.subr.mxu1 %v4488_v21 }
 0x85c   : > { %v4231_v26 = vmax.f32 %v4169_v34, 0.0  ;;  %6831 = vmatpush3.msra.mxu1 %v4488_v21  ;;  %v4184_v33 = vadd.f32 %v6686_v48, %v8868_v30 }
 0x85d   : > { %v4178_v13 = vpop.f32.mrf.mxu0  ;;  %6828 = vmatprep.subr.mxu1 %v4487_v49 }
 0x85e   : > { %v4179_v59 = vadd.f32 %v8868_v30, %v4178_v13  ;;  %6721 = vmatprep.mubr.msk.f32.mxu1 %vm4256_vm3, %v4231_v26  ;;  %6832 = vmatpush3.msra.mxu1 %v4487_v49  ;;  %v4234_v45 = vmax.f32 %v4184_v33, 0.0  ;;  %v4459_v13 = vmul.f32 %v8916_v7, %v8791_v52 }
 0x85f   : > { %v6689_v55 = vpop.f32.mrf.mxu0  ;;  %6722 = vmatmul.mubr.msk.f32.gmra.mxu1 %vm4256_vm3, %v4232_v2  ;;  %6771 = vmatprep.subr.mxu1 %v8905_v22 }
 0x860   : > { %v4233_v31 = vmax.f32 %v4179_v59, 0.0  ;;  %v4194_v62 = vadd.f32 %v6689_v55, %v8868_v30  ;;  %v4460_v59 = vmul.f32 %v8916_v7, %v8794_v19 }
 0x861   : > { %v4188_v46 = vpop.f32.mrf.mxu0 }
 0x862   : > { %v4189_v4 = vadd.f32 %v8868_v30, %v4188_v46  ;;  %6724 = vmatprep.mubr.msk.f32.mxu1 %vm4256_vm3, %v4233_v31  ;;  %v4236_v47 = vmax.f32 %v4194_v62, 0.0  ;;  %v4461_v46 = vmul.f32 %v8916_v7, %v8801_v0 }
 0x863   : > { %v6692_v23 = vpop.f32.mrf.mxu0  ;;  %6725 = vmatmul.mubr.msk.f32.gmra.mxu1 %vm4256_vm3, %v4234_v45 }
 0x864   : > { %v4235_v32 = vmax.f32 %v4189_v4, 0.0  ;;  %v4204_v57 = vadd.f32 %v6692_v23, %v8868_v30  ;;  %v4462_v4 = vmul.f32 %v8916_v7, %v8804_v5 }
 0x865   : > { %v4198_v51 = vpop.f32.mrf.mxu0 }
 0x866   : > { %v4199_v29 = vadd.f32 %v8868_v30, %v4198_v51  ;;  %6727 = vmatprep.mubr.msk.f32.mxu1 %vm4256_vm3, %v4235_v32  ;;  %v4238_v28 = vmax.f32 %v4204_v57, 0.0  ;;  %v4463_v51 = vmul.f32 %v8916_v7, %v8811_v38 }
 0x867   : > { %v6695_v14 = vpop.f32.mrf.mxu0  ;;  %6728 = vmatmul.mubr.msk.f32.gmra.mxu1 %vm4256_vm3, %v4236_v47 }
 0x868   : > { %v4237_v58 = vmax.f32 %v4199_v29, 0.0  ;;  %v4214_v12 = vadd.f32 %v6695_v14, %v8868_v30  ;;  %v4464_v29 = vmul.f32 %v8916_v7, %v8814_v60 }
 0x869   : > { %v4208_v25 = vpop.f32.mrf.mxu0 }
 0x86a   : > { %v4209_v36 = vadd.f32 %v8868_v30, %v4208_v25  ;;  %6730 = vmatprep.mubr.msk.f32.mxu1 %vm4256_vm3, %v4237_v58  ;;  %v4240_v44 = vmax.f32 %v4214_v12, 0.0  ;;  %v4465_v25 = vmul.f32 %v8916_v7, %v8821_v35 }
 0x86b   : > { %v6698_v37 = vpop.f32.mrf.mxu0  ;;  %6731 = vmatmul.mubr.msk.f32.gmra.mxu1 %vm4256_vm3, %v4238_v28 }
 0x86c   : > { %v4239_v17 = vmax.f32 %v4209_v36, 0.0  ;;  %v4224_v53 = vadd.f32 %v6698_v37, %v8868_v30  ;;  %v4466_v36 = vmul.f32 %v8916_v7, %v8824_v9 }
 0x86d   : > { %v4218_v24 = vpop.f32.mrf.mxu0 }
 0x86e   : > { %v4219_v21 = vadd.f32 %v8868_v30, %v4218_v24  ;;  %6733 = vmatprep.mubr.msk.f32.mxu1 %vm4256_vm3, %v4239_v17  ;;  %v4242_v42 = vmax.f32 %v4224_v53, 0.0  ;;  %v8911_v30 = vld [vmem:[%s9058_s3 + $0x4] ss:$0 sm:$0xff]  ;;  %v4467_v24 = vmul.f32 %v8916_v7, %v8831_v3  ;;  %v4469_v3 = vmul.f32 %v8916_v7, %v8841_v1 }
 0x86f   : > { %6734 = vmatmul.mubr.msk.f32.gmra.mxu1 %vm4256_vm3, %v4240_v44  ;;  %v4921_v1 = vld [vmem:[%s9057_s2 + $0xe0] sm:$0xff] }
 0x870   : > { %v4241_v49 = vmax.f32 %v4219_v21, 0.0  ;;  %v4468_v21 = vmul.f32 %v8916_v7, %v8834_v50  ;;  %v4470_v50 = vmul.f32 %v8916_v7, %v8844_v41  ;;  %6799 = vmatprep.subr.mxu0 %v4921_v1  ;;  %v5541_v41 = vld [vmem:[%s9058_s3 + $0x6] ss:$0 sm:$0xff] }
 0x872   : > { %6736 = vmatprep.mubr.msk.f32.mxu1 %vm4256_vm3, %v4241_v49 }
 0x873   : > { %6737 = vmatmul.mubr.msk.f32.gmra.mxu1 %vm4256_vm3, %v4242_v42 }
 0x917   : > { %v6717_v39 = vpop.f32.mrf.mxu1 }
 0x918   : > { %v4377_v16 = vadd.f32 %v6717_v39, %v8911_v30 }
 0x919   : > { %v4371_v61 = vpop.f32.mrf.mxu1 }
 0x91a   : > { %v4372_v27 = vadd.f32 %v8911_v30, %v4371_v61  ;;  %v4472_v6 = vadd.f32 %v4456_v43, %v4377_v16 }
 0x91b   : > { %v6720_v40 = vpop.f32.mrf.mxu1 }
 0x91c   : > { %v4471_v10 = vadd.f32 %v4455_v20, %v4372_v27  ;;  %v4387_v18 = vadd.f32 %v6720_v40, %v8911_v30 }
 0x91d   : > { %v4381_v11 = vpop.f32.mrf.mxu1 }
 0x91e   : > { %v4382_v34 = vadd.f32 %v8911_v30, %v4381_v11  ;;  %6747 = vmatprep.mubr.msk.f32.mxu0 %vm460_vm1, %v4471_v10  ;;  %v4474_v26 = vadd.f32 %v4458_v54, %v4387_v18 }
 0x91f   : > { %v6723_v48 = vpop.f32.mrf.mxu1  ;;  %6748 = vmatmul.mubr.msk.f32.vlgmr.msra.gmra.mxu0 %vm460_vm1, %v4472_v6 }
 0x920   : > { %v4473_v8 = vadd.f32 %v4457_v15, %v4382_v34  ;;  %v4397_v2 = vadd.f32 %v6723_v48, %v8911_v30  ;;  %6800 = vmatpush3.msra.mxu0 %v4921_v1 }
 0x921   : > { %v4391_v33 = vpop.f32.mrf.mxu1 }
 0x922   : > { %v4392_v63 = vadd.f32 %v8911_v30, %v4391_v33  ;;  %6750 = vmatprep.mubr.msk.f32.mxu0 %vm460_vm1, %v4473_v8  ;;  %v4476_v31 = vadd.f32 %v4460_v59, %v4397_v2 }
 0x923   : > { %v6726_v55 = vpop.f32.mrf.mxu1  ;;  %6751 = vmatmul.mubr.msk.f32.gmra.mxu0 %vm460_vm1, %v4474_v26 }
 0x924   : > { %v4475_v56 = vadd.f32 %v4459_v13, %v4392_v63  ;;  %v4407_v45 = vadd.f32 %v6726_v55, %v8911_v30 }
 0x925   : > { %v4401_v62 = vpop.f32.mrf.mxu1 }
 0x926   : > { %v4402_v52 = vadd.f32 %v8911_v30, %v4401_v62  ;;  %6753 = vmatprep.mubr.msk.f32.mxu0 %vm460_vm1, %v4475_v56  ;;  %v4478_v32 = vadd.f32 %v4462_v4, %v4407_v45 }
 0x927   : > { %v6729_v23 = vpop.f32.mrf.mxu1  ;;  %6754 = vmatmul.mubr.msk.f32.gmra.mxu0 %vm460_vm1, %v4476_v31 }
 0x928   : > { %v4477_v19 = vadd.f32 %v4461_v46, %v4402_v52  ;;  %v4417_v47 = vadd.f32 %v6729_v23, %v8911_v30 }
 0x929   : > { %v4411_v57 = vpop.f32.mrf.mxu1 }
 0x92a   : > { %v4412_v0 = vadd.f32 %v8911_v30, %v4411_v57  ;;  %6756 = vmatprep.mubr.msk.f32.mxu0 %vm460_vm1, %v4477_v19  ;;  %v4480_v58 = vadd.f32 %v4464_v29, %v4417_v47 }
 0x92b   : > { %v6732_v14 = vpop.f32.mrf.mxu1  ;;  %6757 = vmatmul.mubr.msk.f32.gmra.mxu0 %vm460_vm1, %v4478_v32 }
 0x92c   : > { %v4479_v5 = vadd.f32 %v4463_v51, %v4412_v0  ;;  %v4427_v28 = vadd.f32 %v6732_v14, %v8911_v30 }
 0x92d   : > { %v4421_v12 = vpop.f32.mrf.mxu1 }
 0x92e   : > { %v4422_v38 = vadd.f32 %v8911_v30, %v4421_v12  ;;  %6759 = vmatprep.mubr.msk.f32.mxu0 %vm460_vm1, %v4479_v5  ;;  %v4482_v17 = vadd.f32 %v4466_v36, %v4427_v28 }
 0x92f   : > { %v6735_v37 = vpop.f32.mrf.mxu1  ;;  %6760 = vmatmul.mubr.msk.f32.gmra.mxu0 %vm460_vm1, %v4480_v58 }
 0x930   : > { %v4481_v60 = vadd.f32 %v4465_v25, %v4422_v38  ;;  %v4437_v44 = vadd.f32 %v6735_v37, %v8911_v30 }
 0x931   : > { %v4431_v53 = vpop.f32.mrf.mxu1 }
 0x932   : > { %v4432_v35 = vadd.f32 %v8911_v30, %v4431_v53  ;;  %6762 = vmatprep.mubr.msk.f32.mxu1 %vm460_vm1, %v4481_v60  ;;  %v4484_v42 = vadd.f32 %v4468_v21, %v4437_v44 }
 0x933   : > { %v6738_v49 = vpop.f32.mrf.mxu1  ;;  %6763 = vmatmul.mubr.msk.f32.vlgmr.msra.gmra.mxu1 %vm460_vm1, %v4482_v17 }
 0x934   : > { %v4483_v9 = vadd.f32 %v4467_v24, %v4432_v35  ;;  %6772 = vmatpush3.msra.mxu1 %v8905_v22  ;;  %v4447_v39 = vadd.f32 %v6738_v49, %v8911_v30  ;;  %v4705_v22 = vld [vmem:[%s9057_s2 + $0xd0] sm:$0xff]  ;;  %v5558_v24 = vld [vmem:[%s9058_s3 + $0x7] ss:$0 sm:$0xff] }
 0x935   : > { %v4441_v16 = vpop.f32.mrf.mxu1  ;;  %6773 = vmatprep.subr.mxu1 %v4705_v22 }
 0x936   : > { %v4442_v61 = vadd.f32 %v8911_v30, %v4441_v16  ;;  %6765 = vmatprep.mubr.msk.f32.mxu1 %vm460_vm1, %v4483_v9  ;;  %v4486_v27 = vadd.f32 %v4470_v50, %v4447_v39  ;;  %6774 = vmatpush3.msra.mxu1 %v4705_v22 }
 0x937   : > { %6766 = vmatmul.mubr.msk.f32.gmra.mxu1 %vm460_vm1, %v4484_v42 }
 0x938   : > { %v4485_v20 = vadd.f32 %v4469_v3, %v4442_v61 }
 0x93a   : > { %6768 = vmatprep.mubr.msk.f32.mxu1 %vm460_vm1, %v4485_v20 }
 0x93b   : > { %6769 = vmatmul.mubr.msk.f32.gmra.mxu1 %vm460_vm1, %v4486_v27 }
 0x9df   : > { %v6749_v30 = vpop.f32.mrf.mxu0 }
 0x9e0   : > { %v4616_v7 = vadd.f32 %v6749_v30, %v5541_v41 }
 0x9e1   : > { %v4610_v43 = vpop.f32.mrf.mxu0 }
 0x9e2   : > { %v4611_v40 = vadd.f32 %v5541_v41, %v4610_v43  ;;  %v4690_v18 = vmax.f32 %v4616_v7, 0.0 }
 0x9e3   : > { %v6752_v10 = vpop.f32.mrf.mxu0 }
 0x9e4   : > { %v4689_v6 = vmax.f32 %v4611_v40, 0.0  ;;  %v4626_v11 = vadd.f32 %v6752_v10, %v5541_v41 }
 0x9e5   : > { %v4620_v15 = vpop.f32.mrf.mxu0 }
 0x9e6   : > { %v4621_v34 = vadd.f32 %v5541_v41, %v4620_v15  ;;  %6775 = vmatprep.mubr.msk.f32.mxu1 %vm262_vm0, %v4689_v6  ;;  %v4692_v8 = vmax.f32 %v4626_v11, 0.0 }
 0x9e7   : > { %v6755_v54 = vpop.f32.mrf.mxu0  ;;  %6776 = vmatmul.mubr.msk.f32.vlgmr.msra.gmra.mxu1 %vm262_vm0, %v4690_v18 }
 0x9e8   : > { %v4691_v48 = vmax.f32 %v4621_v34, 0.0  ;;  %v4636_v26 = vadd.f32 %v6755_v54, %v5541_v41 }
 0x9e9   : > { %v4630_v2 = vpop.f32.mrf.mxu0 }
 0x9ea   : > { %v4631_v33 = vadd.f32 %v5541_v41, %v4630_v2  ;;  %6778 = vmatprep.mubr.msk.f32.mxu1 %vm262_vm0, %v4691_v48  ;;  %v4694_v59 = vmax.f32 %v4636_v26, 0.0 }
 0x9eb   : > { %v6758_v13 = vpop.f32.mrf.mxu0  ;;  %6779 = vmatmul.mubr.msk.f32.gmra.mxu1 %vm262_vm0, %v4692_v8 }
 0x9ec   : > { %v4693_v63 = vmax.f32 %v4631_v33, 0.0  ;;  %v4646_v55 = vadd.f32 %v6758_v13, %v5541_v41 }
 0x9ed   : > { %v4640_v56 = vpop.f32.mrf.mxu0 }
 0x9ee   : > { %v4641_v31 = vadd.f32 %v5541_v41, %v4640_v56  ;;  %6781 = vmatprep.mubr.msk.f32.mxu1 %vm262_vm0, %v4693_v63  ;;  %v4696_v46 = vmax.f32 %v4646_v55, 0.0 }
 0x9ef   : > { %v6761_v45 = vpop.f32.mrf.mxu0  ;;  %6782 = vmatmul.mubr.msk.f32.gmra.mxu1 %vm262_vm0, %v4694_v59 }
 0x9f0   : > { %v4695_v62 = vmax.f32 %v4641_v31, 0.0  ;;  %v4656_v52 = vadd.f32 %v6761_v45, %v5541_v41 }
 0x9f1   : > { %v4650_v4 = vpop.f32.mrf.mxu0 }
 0x9f2   : > { %v4651_v23 = vadd.f32 %v5541_v41, %v4650_v4  ;;  %6784 = vmatprep.mubr.msk.f32.mxu1 %vm262_vm0, %v4695_v62  ;;  %v4698_v47 = vmax.f32 %v4656_v52, 0.0 }
 0x9f3   : > { %v6764_v19 = vpop.f32.mrf.mxu1  ;;  %6785 = vmatmul.mubr.msk.f32.gmra.mxu1 %vm262_vm0, %v4696_v46 }
 0x9f4   : > { %v4697_v32 = vmax.f32 %v4651_v23, 0.0  ;;  %v4666_v57 = vadd.f32 %v6764_v19, %v5541_v41 }
 0x9f5   : > { %v4660_v51 = vpop.f32.mrf.mxu1 }
 0x9f6   : > { %v4661_v0 = vadd.f32 %v5541_v41, %v4660_v51  ;;  %6787 = vmatprep.mubr.msk.f32.mxu1 %vm262_vm0, %v4697_v32  ;;  %v4700_v5 = vmax.f32 %v4666_v57, 0.0 }
 0x9f7   : > { %v6767_v29 = vpop.f32.mrf.mxu1  ;;  %6788 = vmatmul.mubr.msk.f32.gmra.mxu1 %vm262_vm0, %v4698_v47 }
 0x9f8   : > { %v4699_v14 = vmax.f32 %v4661_v0, 0.0  ;;  %v4676_v58 = vadd.f32 %v6767_v29, %v5541_v41  ;;  %v5575_v0 = vld [vmem:[%s9058_s3 + $0x8] ss:$0 sm:$0xff] }
 0x9f9   : > { %v4670_v28 = vpop.f32.mrf.mxu1 }
 0x9fa   : > { %v4671_v12 = vadd.f32 %v5541_v41, %v4670_v28  ;;  %6790 = vmatprep.mubr.msk.f32.mxu1 %vm262_vm0, %v4699_v14  ;;  %v4702_v36 = vmax.f32 %v4676_v58, 0.0 }
 0x9fb   : > { %v6770_v25 = vpop.f32.mrf.mxu1  ;;  %6791 = vmatmul.mubr.msk.f32.gmra.mxu1 %vm262_vm0, %v4700_v5 }
 0x9fc   : > { %v4701_v38 = vmax.f32 %v4671_v12, 0.0  ;;  %v4686_v37 = vadd.f32 %v6770_v25, %v5541_v41 }
 0x9fd   : > { %v4680_v60 = vpop.f32.mrf.mxu1 }
 0x9fe   : > { %v4681_v17 = vadd.f32 %v5541_v41, %v4680_v60  ;;  %6793 = vmatprep.mubr.msk.f32.mxu1 %vm262_vm0, %v4701_v38  ;;  %v4704_v53 = vmax.f32 %v4686_v37, 0.0 }
 0x9ff   : > { %6794 = vmatmul.mubr.msk.f32.gmra.mxu1 %vm262_vm0, %v4702_v36 }
 0xa00   : > { %v4703_v44 = vmax.f32 %v4681_v17, 0.0 }
 0xa02   : > { %6796 = vmatprep.mubr.msk.f32.mxu1 %vm262_vm0, %v4703_v44 }
 0xa03   : > { %6797 = vmatmul.mubr.msk.f32.gmra.mxu1 %vm262_vm0, %v4704_v53 }
 0xaa7   : > { %v6777_v35 = vpop.f32.mrf.mxu1 }
 0xaa8   : > { %v4832_v21 = vadd.f32 %v6777_v35, %v5558_v24 }
 0xaa9   : > { %v4826_v49 = vpop.f32.mrf.mxu1 }
 0xaaa   : > { %v4827_v9 = vadd.f32 %v5558_v24, %v4826_v49  ;;  %v4906_v16 = vmax.f32 %v4832_v21, 0.0 }
 0xaab   : > { %v6780_v42 = vpop.f32.mrf.mxu1 }
 0xaac   : > { %v4905_v39 = vmax.f32 %v4827_v9, 0.0  ;;  %v4842_v3 = vadd.f32 %v6780_v42, %v5558_v24 }
 0xaad   : > { %v4836_v61 = vpop.f32.mrf.mxu1 }
 0xaae   : > { %v4837_v50 = vadd.f32 %v5558_v24, %v4836_v61  ;;  %6801 = vmatprep.mubr.msk.f32.mxu0 %vm744_vm2, %v4905_v39  ;;  %v4908_v22 = vmax.f32 %v4842_v3, 0.0 }
 0xaaf   : > { %v6783_v20 = vpop.f32.mrf.mxu1  ;;  %6802 = vmatmul.mubr.msk.f32.vlgmr.msra.gmra.mxu0 %vm744_vm2, %v4906_v16 }
 0xab0   : > { %v4907_v27 = vmax.f32 %v4837_v50, 0.0  ;;  %v4852_v1 = vadd.f32 %v6783_v20, %v5558_v24 }
 0xab1   : > { %v4846_v41 = vpop.f32.mrf.mxu1 }
 0xab2   : > { %v4847_v30 = vadd.f32 %v5558_v24, %v4846_v41  ;;  %6804 = vmatprep.mubr.msk.f32.mxu0 %vm744_vm2, %v4907_v27  ;;  %v4910_v40 = vmax.f32 %v4852_v1, 0.0 }
 0xab3   : > { %v6786_v7 = vpop.f32.mrf.mxu1  ;;  %6805 = vmatmul.mubr.msk.f32.gmra.mxu0 %vm744_vm2, %v4908_v22 }
 0xab4   : > { %v4909_v43 = vmax.f32 %v4847_v30, 0.0  ;;  %v4862_v10 = vadd.f32 %v6786_v7, %v5558_v24 }
 0xab5   : > { %v4856_v6 = vpop.f32.mrf.mxu1 }
 0xab6   : > { %v4857_v18 = vadd.f32 %v5558_v24, %v4856_v6  ;;  %6807 = vmatprep.mubr.msk.f32.mxu0 %vm744_vm2, %v4909_v43  ;;  %v4912_v34 = vmax.f32 %v4862_v10, 0.0 }
 0xab7   : > { %v6789_v11 = vpop.f32.mrf.mxu1  ;;  %6808 = vmatmul.mubr.msk.f32.gmra.mxu0 %vm744_vm2, %v4910_v40 }
 0xab8   : > { %v4911_v15 = vmax.f32 %v4857_v18, 0.0  ;;  %v4872_v54 = vadd.f32 %v6789_v11, %v5558_v24 }
 0xab9   : > { %v4866_v48 = vpop.f32.mrf.mxu1 }
 0xaba   : > { %v4867_v8 = vadd.f32 %v5558_v24, %v4866_v48  ;;  %6810 = vmatprep.mubr.msk.f32.mxu0 %vm744_vm2, %v4911_v15  ;;  %v4914_v33 = vmax.f32 %v4872_v54, 0.0 }
 0xabb   : > { %v6792_v26 = vpop.f32.mrf.mxu1  ;;  %6811 = vmatmul.mubr.msk.f32.gmra.mxu0 %vm744_vm2, %v4912_v34 }
 0xabc   : > { %v4913_v2 = vmax.f32 %v4867_v8, 0.0  ;;  %v4882_v13 = vadd.f32 %v6792_v26, %v5558_v24 }
 0xabd   : > { %v4876_v63 = vpop.f32.mrf.mxu1 }
 0xabe   : > { %v4877_v59 = vadd.f32 %v5558_v24, %v4876_v63  ;;  %6813 = vmatprep.mubr.msk.f32.mxu0 %vm744_vm2, %v4913_v2  ;;  %v4916_v31 = vmax.f32 %v4882_v13, 0.0 }
 0xabf   : > { %v6795_v55 = vpop.f32.mrf.mxu1  ;;  %6814 = vmatmul.mubr.msk.f32.gmra.mxu0 %vm744_vm2, %v4914_v33 }
 0xac0   : > { %v4915_v56 = vmax.f32 %v4877_v59, 0.0  ;;  %v4892_v45 = vadd.f32 %v6795_v55, %v5558_v24 }
 0xac1   : > { %v4886_v62 = vpop.f32.mrf.mxu1 }
 0xac2   : > { %v4887_v46 = vadd.f32 %v5558_v24, %v4886_v62  ;;  %6816 = vmatprep.mubr.msk.f32.mxu0 %vm744_vm2, %v4915_v56  ;;  %v4918_v23 = vmax.f32 %v4892_v45, 0.0 }
 0xac3   : > { %v6798_v52 = vpop.f32.mrf.mxu1  ;;  %6817 = vmatmul.mubr.msk.f32.gmra.mxu0 %vm744_vm2, %v4916_v31 }
 0xac4   : > { %v4917_v4 = vmax.f32 %v4887_v46, 0.0  ;;  %v4902_v19 = vadd.f32 %v6798_v52, %v5558_v24 }
 0xac5   : > { %v4896_v32 = vpop.f32.mrf.mxu1 }
 0xac6   : > { %v4897_v47 = vadd.f32 %v5558_v24, %v4896_v32  ;;  %6819 = vmatprep.mubr.msk.f32.mxu0 %vm744_vm2, %v4917_v4  ;;  %v4920_v51 = vmax.f32 %v4902_v19, 0.0 }
 0xac7   : > { %6820 = vmatmul.mubr.msk.f32.gmra.mxu0 %vm744_vm2, %v4918_v23 }
 0xac8   : > { %v4919_v57 = vmax.f32 %v4897_v47, 0.0 }
 0xaca   : > { %6822 = vmatprep.mubr.msk.f32.mxu0 %vm744_vm2, %v4919_v57 }
 0xacb   : > { %6823 = vmatmul.mubr.msk.f32.gmra.mxu0 %vm744_vm2, %v4920_v51 }
 0xb6f   : > { %v6803_v29 = vpop.f32.mrf.mxu0 }
 0xb70   : > { %v5047_v14 = vadd.f32 %v6803_v29, %v5575_v0 }
 0xb71   : > { %v5041_v5 = vpop.f32.mrf.mxu0 }
 0xb72   : > { %5121 = vst [vmem:[%s9034_s21 + $0x8] sm:$0xff] %v5047_v14  ;;  %v5042_v58 = vadd.f32 %v5575_v0, %v5041_v5 }
 0xb73   : > { %v6806_v28 = vpop.f32.mrf.mxu0 }
 0xb74   : > { %5120 = vst [vmem:[%s9034_s21] sm:$0xff] %v5042_v58  ;;  %v5057_v12 = vadd.f32 %v6806_v28, %v5575_v0 }
 0xb75   : > { %v5051_v25 = vpop.f32.mrf.mxu0 }
 0xb76   : > { %5123 = vst [vmem:[%s9034_s21 + $0x18] sm:$0xff] %v5057_v12  ;;  %v5052_v38 = vadd.f32 %v5575_v0, %v5051_v25 }
 0xb77   : > { %v6809_v36 = vpop.f32.mrf.mxu0 }
 0xb78   : > { %5122 = vst [vmem:[%s9034_s21 + $0x10] sm:$0xff] %v5052_v38  ;;  %v5067_v37 = vadd.f32 %v6809_v36, %v5575_v0 }
 0xb79   : > { %v5061_v60 = vpop.f32.mrf.mxu0 }
 0xb7a   : > { %5125 = vst [vmem:[%s9034_s21 + $0x28] sm:$0xff] %v5067_v37  ;;  %v5062_v17 = vadd.f32 %v5575_v0, %v5061_v60 }
 0xb7b   : > { %v6812_v44 = vpop.f32.mrf.mxu0 }
 0xb7c   : > { %5124 = vst [vmem:[%s9034_s21 + $0x20] sm:$0xff] %v5062_v17  ;;  %v5077_v53 = vadd.f32 %v6812_v44, %v5575_v0 }
 0xb7d   : > { %v5071_v24 = vpop.f32.mrf.mxu0 }
 0xb7e   : > { %5127 = vst [vmem:[%s9034_s21 + $0x38] sm:$0xff] %v5077_v53  ;;  %v5072_v35 = vadd.f32 %v5575_v0, %v5071_v24 }
 0xb7f   : > { %v6815_v21 = vpop.f32.mrf.mxu0 }
 0xb80   : > { %5126 = vst [vmem:[%s9034_s21 + $0x30] sm:$0xff] %v5072_v35  ;;  %v5087_v49 = vadd.f32 %v6815_v21, %v5575_v0 }
 0xb81   : > { %v5081_v9 = vpop.f32.mrf.mxu0 }
 0xb82   : > { %5129 = vst [vmem:[%s9034_s21 + $0x48] sm:$0xff] %v5087_v49  ;;  %v5082_v42 = vadd.f32 %v5575_v0, %v5081_v9 }
 0xb83   : > { %v6818_v39 = vpop.f32.mrf.mxu0 }
 0xb84   : > { %5128 = vst [vmem:[%s9034_s21 + $0x40] sm:$0xff] %v5082_v42  ;;  %v5097_v16 = vadd.f32 %v6818_v39, %v5575_v0 }
 0xb85   : > { %v5091_v3 = vpop.f32.mrf.mxu0 }
 0xb86   : > { %5131 = vst [vmem:[%s9034_s21 + $0x58] sm:$0xff] %v5097_v16  ;;  %v5092_v61 = vadd.f32 %v5575_v0, %v5091_v3 }
 0xb87   : > { %v6821_v50 = vpop.f32.mrf.mxu0 }
 0xb88   : > { %5130 = vst [vmem:[%s9034_s21 + $0x50] sm:$0xff] %v5092_v61  ;;  %v5107_v20 = vadd.f32 %v6821_v50, %v5575_v0 }
 0xb89   : > { %v5101_v27 = vpop.f32.mrf.mxu0 }
 0xb8a   : > { %5133 = vst [vmem:[%s9034_s21 + $0x68] sm:$0xff] %v5107_v20  ;;  %v5102_v22 = vadd.f32 %v5575_v0, %v5101_v27 }
 0xb8b   : > { %v6824_v1 = vpop.f32.mrf.mxu0 }
 0xb8c   : > { %5132 = vst [vmem:[%s9034_s21 + $0x60] sm:$0xff] %v5102_v22  ;;  %v5117_v41 = vadd.f32 %v6824_v1, %v5575_v0 }
 0xb8d   : > { %v5111_v30 = vpop.f32.mrf.mxu0 }
 0xb8e   : > { %5135 = vst [vmem:[%s9034_s21 + $0x78] sm:$0xff] %v5117_v41  ;;  %v5112_v7 = vadd.f32 %v5575_v0, %v5111_v30 }
 0xb90   : > { %5134 = vst [vmem:[%s9034_s21 + $0x70] sm:$0xff] %v5112_v7 }
 0xb91 PF: > { %s14_s15 = sadd.s32 1, %s7132_s15  }
 0xb92   : > { %p11_p4 = scmp.ge.s32.totalorder %s14_s15, 6  }
 0xb94   :  { %13 = sbr.rel (!%p11_p4) target bundleno = 1 (0x1), region = 69 }

</bundles_post_ra>
